<compile_context>
chip_gen: v7x
topology: tpu7x:2x2x1
jax: 0.10.0
libtpu: 0.0.40
codegen_flags: <defaults>
</compile_context>

<pallas_src>
import functools
import math

import jax
import jax.numpy as jnp
from jax.experimental import pallas as pl
from jax.experimental.pallas import tpu as pltpu

EPS = 1e-5
NEG_INF = -1e9      # finite "minus infinity": exp underflows to exactly 0 in f32
M_INIT = -1e30      # running-max init


def _rms_norm(x, w):
    var = jnp.mean(x * x, axis=-1, keepdims=True)
    return x * jax.lax.rsqrt(var + EPS) * w


def _apply_rope(x, cos_t, sina_t, sinb_t, head_dim):
    """RoPE on the lane-dense (rows, H) layout.

    rotate_half per head-block is realized with two full-width lane rolls; the
    sign and half-selection live in the precomputed sina/sinb tables:
      out = x*cos + x[j+hd/2]*sina + x[j-hd/2]*sinb
    """
    H = x.shape[-1]
    left = pltpu.roll(x, shift=H - head_dim // 2, axis=1)   # value x[j + hd/2]
    right = pltpu.roll(x, shift=head_dim // 2, axis=1)      # value x[j - hd/2]
    return x * cos_t + left * sina_t + right * sinb_t


# --------------------------------------------------------------------------
# Pass 1: attention_norm -> K/V projection -> RoPE(K), written head-major.
# --------------------------------------------------------------------------
def _kv_kernel(x_ref, cosf_ref, sina_ref, sinb_ref, anw_ref, wk_ref, wv_ref,
               k_out_ref, v_out_ref, *, num_heads, head_dim):
    x = x_ref[0]                                            # (ts, H) f32
    ts = x.shape[0]
    xn = _rms_norm(x, anw_ref[0]).astype(jnp.bfloat16)

    k = jnp.dot(xn, wk_ref[...], preferred_element_type=jnp.float32)
    v = jnp.dot(xn, wv_ref[...], preferred_element_type=jnp.float32)
    k = _apply_rope(k, cosf_ref[...], sina_ref[...], sinb_ref[...], head_dim)

    # One (ts, nh, hd) -> (nh, ts, hd) relayout here instead of per q-tile later.
    k_out_ref[0] = jnp.transpose(
        k.reshape(ts, num_heads, head_dim), (1, 0, 2)).astype(k_out_ref.dtype)
    v_out_ref[0] = jnp.transpose(
        v.reshape(ts, num_heads, head_dim), (1, 0, 2)).astype(v_out_ref.dtype)


# --------------------------------------------------------------------------
# Pass 2: flash attention over KV chunks + o_proj + residual.
# --------------------------------------------------------------------------
def _attn_kernel(qmin_ref, qmax_ref, kmin_ref, kmax_ref,          # SMEM prefetch
                 x_ref, k_ref, v_ref, segq_ref, segk_ref,
                 cosf_ref, sina_ref, sinb_ref, anw_ref, wq_ref, wo_ref,
                 h1_ref,
                 qh_scr, m_scr, l_scr, acc_scr,
                 *, num_heads, head_dim):
    b = pl.program_id(0)
    qi = pl.program_id(1)
    kk = pl.program_id(2)
    nq = pl.num_programs(1)
    nk = pl.num_programs(2)
    hidden = num_heads * head_dim
    scale = 1.0 / math.sqrt(head_dim)

    # ---- first KV chunk: build (scaled, RoPE'd) Q into scratch, reset stats ----
    @pl.when(kk == 0)
    def _():
        x = x_ref[0]                                        # (tq, H) f32
        tq = x.shape[0]
        xn = _rms_norm(x, anw_ref[0]).astype(jnp.bfloat16)
        q = jnp.dot(xn, wq_ref[...], preferred_element_type=jnp.float32)
        q = _apply_rope(q, cosf_ref[...], sina_ref[...], sinb_ref[...], head_dim)
        q = q * scale
        qh_scr[...] = jnp.transpose(
            q.reshape(tq, num_heads, head_dim), (1, 0, 2)).astype(jnp.bfloat16)
        m_scr[...] = jnp.full(m_scr.shape, M_INIT, jnp.float32)
        l_scr[...] = jnp.zeros(l_scr.shape, jnp.float32)
        acc_scr[...] = jnp.zeros(acc_scr.shape, jnp.float32)

    # ---- block-diagonal structural skip: process only overlapping KV chunks ----
    overlap = jnp.logical_and(qmin_ref[b * nq + qi] <= kmax_ref[b * nk + kk],
                              kmin_ref[b * nk + kk] <= qmax_ref[b * nq + qi])

    @pl.when(overlap)
    def _():
        kc = k_ref[0]                                       # (nh, tk, hd) bf16
        vc = v_ref[0]                                       # (nh, tk, hd) bf16
        # fine per-patch image mask (seg ids compared as f32; exact for ids < 2^24)
        bias = jnp.where(segq_ref[0] == segk_ref[0], 0.0, NEG_INF)   # (tq, tk)

        s = jnp.einsum('hqd,hkd->hqk', qh_scr[...], kc,
                       preferred_element_type=jnp.float32)
        s = s + bias[None, :, :]

        m_prev = m_scr[...]
        m_new = jnp.maximum(m_prev, jnp.max(s, axis=-1, keepdims=True))
        alpha = jnp.exp(m_prev - m_new)
        p = jnp.exp(s - m_new)
        l_scr[...] = alpha * l_scr[...] + jnp.sum(p, axis=-1, keepdims=True)
        acc_scr[...] = alpha * acc_scr[...] + jnp.einsum(
            'hqk,hkd->hqd', p.astype(jnp.bfloat16), vc,
            preferred_element_type=jnp.float32)
        m_scr[...] = m_new

    # ---- last KV chunk: normalize, o_proj, residual ----
    @pl.when(kk == nk - 1)
    def _():
        o = acc_scr[...] * pl.reciprocal(l_scr[...], approx=True)   # (nh, tq, hd)
        tq = o.shape[1]
        attn = jnp.transpose(o, (1, 0, 2)).reshape(tq, hidden)
        h1 = x_ref[0] + jnp.dot(attn.astype(jnp.bfloat16), wo_ref[...],
                                preferred_element_type=jnp.float32)
        h1_ref[0] = h1.astype(h1_ref.dtype)


# --------------------------------------------------------------------------
# Pass 3: ffn_norm + MLP, tiled over the intermediate dimension.
# --------------------------------------------------------------------------
def _mlp_kernel(h1_ref, fnw_ref, wg_ref, wu_ref, wd_ref, out_ref,
                hn_scr, acc_scr):
    ii = pl.program_id(2)
    ni = pl.num_programs(2)

    @pl.when(ii == 0)
    def _():
        hn_scr[...] = _rms_norm(h1_ref[0], fnw_ref[0]).astype(jnp.bfloat16)
        acc_scr[...] = jnp.zeros(acc_scr.shape, jnp.float32)

    hn = hn_scr[...]
    gate = jnp.dot(hn, wg_ref[...], preferred_element_type=jnp.float32)
    up = jnp.dot(hn, wu_ref[...], preferred_element_type=jnp.float32)
    act = (gate * jax.nn.sigmoid(gate) * up).astype(jnp.bfloat16)   # silu(gate)*up
    acc_scr[...] += jnp.dot(act, wd_ref[...], preferred_element_type=jnp.float32)

    @pl.when(ii == ni - 1)
    def _():
        out_ref[0] = (h1_ref[0] + acc_scr[...]).astype(out_ref.dtype)


# --------------------------------------------------------------------------
# Wrappers
# --------------------------------------------------------------------------
def _vmem_limit_bytes():
    """Generation-aware VMEM limit (~80% of physical, capped at 100 MiB)."""
    try:
        cap = int(pltpu.get_tpu_info().vmem_capacity_bytes)
    except Exception:
        return 48 * 1024 * 1024
    return min(int(cap * 0.8), 100 * 1024 * 1024)


def _prep_layer(p):
    """Split merged weights and cast all matmul weights to bf16 once."""
    wq, wk, wv = jnp.split(p["w_qkv"], 3, axis=1)
    wg, wu = jnp.split(p["w_gate_up"], 2, axis=1)
    return dict(
        attn_norm_w=p["attn_norm_w"].astype(jnp.float32).reshape(1, -1),
        ffn_norm_w=p["ffn_norm_w"].astype(jnp.float32).reshape(1, -1),
        w_q=wq.astype(jnp.bfloat16), w_k=wk.astype(jnp.bfloat16),
        w_v=wv.astype(jnp.bfloat16), w_o=p["w_o"].astype(jnp.bfloat16),
        w_gate=wg.astype(jnp.bfloat16), w_up=wu.astype(jnp.bfloat16),
        w_down=p["w_down"].astype(jnp.bfloat16),
    )


def _tile_minmax(seg, t):
    B, S = seg.shape
    n = S // t
    r = seg.astype(jnp.int32).reshape(B, n, t)
    return (r.min(axis=-1).reshape(-1), r.max(axis=-1).reshape(-1))


def pixtral_block(x, seg_q, seg_k, qmin, qmax, kmin, kmax, cosf, sina, sinb, wp,
                  *, num_heads, head_dim, ts, tq, tk, ti):
    B, S, H = x.shape
    inter = wp["w_down"].shape[0]
    ns, nq, nk, ni = S // ts, S // tq, S // tk, inter // ti
    vlim = _vmem_limit_bytes()

    cp2 = pltpu.CompilerParams(
        dimension_semantics=("parallel", "parallel", "arbitrary"),
        vmem_limit_bytes=vlim)
    cp1 = pltpu.CompilerParams(
        dimension_semantics=("parallel", "parallel"),
        vmem_limit_bytes=vlim)

    # ---- pass 1: K/V (bf16, head-major) for the whole sequence, computed once ----
    k_hm, v_hm = pl.pallas_call(
        functools.partial(_kv_kernel, num_heads=num_heads, head_dim=head_dim),
        out_shape=(jax.ShapeDtypeStruct((B, num_heads, S, head_dim), jnp.bfloat16),
                   jax.ShapeDtypeStruct((B, num_heads, S, head_dim), jnp.bfloat16)),
        grid=(B, ns),
        in_specs=[
            pl.BlockSpec((1, ts, H), lambda b, i: (b, i, 0)),      # x
            pl.BlockSpec((ts, H), lambda b, i: (i, 0)),            # cos (full width)
            pl.BlockSpec((ts, H), lambda b, i: (i, 0)),            # sinA
            pl.BlockSpec((ts, H), lambda b, i: (i, 0)),            # sinB
            pl.BlockSpec((1, H), lambda b, i: (0, 0)),             # attention_norm w
            pl.BlockSpec((H, H), lambda b, i: (0, 0)),             # w_k (bf16)
            pl.BlockSpec((H, H), lambda b, i: (0, 0)),             # w_v (bf16)
        ],
        out_specs=(pl.BlockSpec((1, num_heads, ts, head_dim), lambda b, i: (b, 0, i, 0)),
                   pl.BlockSpec((1, num_heads, ts, head_dim), lambda b, i: (b, 0, i, 0))),
        compiler_params=cp1,
    )(x, cosf, sina, sinb, wp["attn_norm_w"], wp["w_k"], wp["w_v"])

    # ---- pass 2: flash attention over KV chunks + o_proj + residual ----
    h1 = pl.pallas_call(
        functools.partial(_attn_kernel, num_heads=num_heads, head_dim=head_dim),
        out_shape=jax.ShapeDtypeStruct((B, S, H), jnp.float32),
        grid_spec=pltpu.PrefetchScalarGridSpec(
            num_scalar_prefetch=4,
            grid=(B, nq, nk),
            in_specs=[
                pl.BlockSpec((1, tq, H), lambda b, i, k, *_: (b, i, 0)),            # x
                pl.BlockSpec((1, num_heads, tk, head_dim),
                             lambda b, i, k, *_: (b, 0, k, 0)),                     # K
                pl.BlockSpec((1, num_heads, tk, head_dim),
                             lambda b, i, k, *_: (b, 0, k, 0)),                     # V
                pl.BlockSpec((1, tq, 1), lambda b, i, k, *_: (b, i, 0)),            # seg q
                pl.BlockSpec((1, 1, tk), lambda b, i, k, *_: (b, 0, k)),            # seg k
                pl.BlockSpec((tq, H), lambda b, i, k, *_: (i, 0)),                  # cos
                pl.BlockSpec((tq, H), lambda b, i, k, *_: (i, 0)),                  # sinA
                pl.BlockSpec((tq, H), lambda b, i, k, *_: (i, 0)),                  # sinB
                pl.BlockSpec((1, H), lambda b, i, k, *_: (0, 0)),                   # norm w
                pl.BlockSpec((H, H), lambda b, i, k, *_: (0, 0)),                   # w_q
                pl.BlockSpec((H, H), lambda b, i, k, *_: (0, 0)),                   # w_o
            ],
            out_specs=pl.BlockSpec((1, tq, H), lambda b, i, k, *_: (b, i, 0)),
            scratch_shapes=[
                pltpu.VMEM((num_heads, tq, head_dim), jnp.bfloat16),   # q (scaled)
                pltpu.VMEM((num_heads, tq, 1), jnp.float32),           # running max
                pltpu.VMEM((num_heads, tq, 1), jnp.float32),           # running denom
                pltpu.VMEM((num_heads, tq, head_dim), jnp.float32),    # accumulator
            ]),
        compiler_params=cp2,
    )(qmin, qmax, kmin, kmax, x, k_hm, v_hm, seg_q, seg_k,
      cosf, sina, sinb, wp["attn_norm_w"], wp["w_q"], wp["w_o"])

    # ---- pass 3: MLP, tiled over the intermediate dimension ----
    return pl.pallas_call(
        _mlp_kernel,
        out_shape=jax.ShapeDtypeStruct((B, S, H), x.dtype),
        grid=(B, nq, ni),
        in_specs=[
            pl.BlockSpec((1, tq, H), lambda b, i, j: (b, i, 0)),   # h1
            pl.BlockSpec((1, H), lambda b, i, j: (0, 0)),          # ffn_norm w
            pl.BlockSpec((H, ti), lambda b, i, j: (0, j)),         # w_gate chunk
            pl.BlockSpec((H, ti), lambda b, i, j: (0, j)),         # w_up chunk
            pl.BlockSpec((ti, H), lambda b, i, j: (j, 0)),         # w_down chunk
        ],
        out_specs=pl.BlockSpec((1, tq, H), lambda b, i, j: (b, i, 0)),
        scratch_shapes=[pltpu.VMEM((tq, H), jnp.bfloat16),         # normed h1
                        pltpu.VMEM((tq, H), jnp.float32)],         # down accumulator
        compiler_params=cp2,
    )(h1, wp["ffn_norm_w"], wp["w_gate"], wp["w_up"], wp["w_down"])


def pixtral_hf_transformer(x, seg, cos, sin, layer_params, num_heads,
                           return_all_hidden_states=False, *,
                           ts=None, tq=None, tk=None, ti=None):
    """Matches PixtralHFTransformer.forward.  `seg` are per-patch image ids
    (B, S) int32 defining the block-diagonal attention mask; cos/sin are the
    HF-convention (S, head_dim) RoPE tables."""
    B, S, H = x.shape
    head_dim = H // num_heads
    inter = layer_params[0]["w_gate_up"].shape[1] // 2

    # Tile defaults; on v6e/v7x prefer tq=ts=256 (256-wide MXU), keep 128 on v5e.
    ts = min(S, 256) if ts is None else ts
    tq = min(S, 128) if tq is None else tq
    tk = min(S, 128) if tk is None else tk
    ti = min(inter, 512) if ti is None else ti
    assert S % ts == 0 and S % tq == 0 and S % tk == 0 and inter % ti == 0

    # Full-width RoPE tables; rotate_half's sign/half-selection folded into sinA/sinB.
    cosf = jnp.tile(cos.astype(jnp.float32), (1, num_heads))          # (S, H)
    sin_d = jnp.tile(sin.astype(jnp.float32), (1, num_heads))         # (S, H)
    first_half = (jnp.arange(H) % head_dim) < (head_dim // 2)
    sina = jnp.where(first_half, -sin_d, 0.0)    # multiplies x[j + hd/2]
    sinb = jnp.where(first_half, 0.0, sin_d)     # multiplies x[j - hd/2]

    # Per-patch image ids (fine mask) and per-tile id ranges (structural skip).
    seg_f = seg.astype(jnp.float32)              # exact for image ids < 2^24
    seg_q = seg_f[:, :, None]                    # (B, S, 1)
    seg_k = seg_f[:, None, :]                    # (B, 1, S)
    qmin, qmax = _tile_minmax(seg, tq)
    kmin, kmax = _tile_minmax(seg, tk)

    prepped = [_prep_layer(p) for p in layer_params]
    pool = [x]
    for wp in prepped:
        x = pixtral_block(x, seg_q, seg_k, qmin, qmax, kmin, kmax,
                          cosf, sina, sinb, wp,
                          num_heads=num_heads, head_dim=head_dim,
                          ts=ts, tq=tq, tk=tk, ti=ti)
        if return_all_hidden_states:
            pool.append(x)
    return pool if return_all_hidden_states else x


# -------------------- pure-JAX f32 reference (for verification) --------------------
def _ref_block(x, mask, cos, sin, p, num_heads, head_dim):
    B, S, H = x.shape
    inter = p["w_gate_up"].shape[1] // 2

    def rms(v, w):
        var = jnp.mean(v * v, axis=-1, keepdims=True)
        return v * jax.lax.rsqrt(var + EPS) * w[0]

    xn = rms(x, p["attn_norm_w"])
    qkv = xn @ p["w_qkv"]
    q, k, v = jnp.split(qkv, 3, axis=-1)

    def heads(t):
        return t.reshape(B, S, num_heads, head_dim).transpose(0, 2, 1, 3)

    q, k, v = heads(q), heads(k), heads(v)

    def rot(t):
        d = head_dim // 2
        return jnp.concatenate([-t[..., d:], t[..., :d]], axis=-1)

    q = q * cos + rot(q) * sin
    k = k * cos + rot(k) * sin
    s = jnp.einsum("bhqd,bhkd->bhqk", q, k) / math.sqrt(head_dim)
    s = s + mask[:, None, :, :]
    pmat = jax.nn.softmax(s, axis=-1)
    o = jnp.einsum("bhqk,bhkd->bhqd", pmat, v)
    o = o.transpose(0, 2, 1, 3).reshape(B, S, H)
    h1 = x + o @ p["w_o"]
    hn = rms(h1, p["ffn_norm_w"])
    gu = hn @ p["w_gate_up"]
    gate, up = gu[..., :inter], gu[..., inter:]
    return h1 + (jax.nn.silu(gate) * up) @ p["w_down"]


def reference(x, seg, cos, sin, layer_params, num_heads, head_dim):
    eq = seg[:, :, None] == seg[:, None, :]
    mask = jnp.where(eq, 0.0, NEG_INF).astype(jnp.float32)
    for p in layer_params:
        x = _ref_block(x, mask, cos, sin, p, num_heads, head_dim)
    return x


# -------------------- deterministic parameter init --------------------
def init_layer_params(key, H, inter):
    ks = jax.random.split(key, 6)
    s = 0.02
    return dict(
        attn_norm_w=1.0 + 0.1 * jax.random.normal(ks[0], (1, H), jnp.float32),
        w_qkv=s * jax.random.normal(ks[1], (H, 3 * H), jnp.float32),
        w_o=s * jax.random.normal(ks[2], (H, H), jnp.float32),
        ffn_norm_w=1.0 + 0.1 * jax.random.normal(ks[3], (1, H), jnp.float32),
        w_gate_up=s * jax.random.normal(ks[4], (H, 2 * inter), jnp.float32),
        w_down=s * jax.random.normal(ks[5], (inter, H), jnp.float32),
    )


if __name__ == "__main__":
    # Small config: batch=2, patches(seq)=256, hidden=128, heads=2, head_dim=64,
    # intermediate=256, layers=2 -- lane-dense tiles (128) at small scale.
    B, S, H, NH, HD, I, L = 2, 256, 128, 2, 64, 256, 2

    key = jax.random.PRNGKey(0)
    k_x, k_p = jax.random.split(key)
    x = jax.random.normal(k_x, (B, S, H), jnp.float32)

    # RoPE tables (S, head_dim), HF convention (freqs duplicated on the last dim).
    inv_freq = 1.0 / (10000.0 ** (jnp.arange(0, HD, 2, dtype=jnp.float32) / HD))
    pos = jnp.arange(S, dtype=jnp.float32)
    freqs = jnp.outer(pos, inv_freq)
    emb = jnp.concatenate([freqs, freqs], axis=-1)
    cos, sin = jnp.cos(emb), jnp.sin(emb)

    # Three "images" (64, 64, 128 patches): exercises skipped KV chunks,
    # partially-masked chunks, and fully-unmasked chunks.
    sizes = [64, 64, 128]
    seg1 = jnp.concatenate([jnp.full((n,), i, jnp.int32) for i, n in enumerate(sizes)])
    seg = jnp.broadcast_to(seg1, (B, S))

    layer_keys = jax.random.split(k_p, L)
    layer_params = [init_layer_params(k, H, I) for k in layer_keys]

    out = pixtral_hf_transformer(x, seg, cos, sin, layer_params, NH,
                                 return_all_hidden_states=False,
                                 ts=128, tq=128, tk=128, ti=128)
    out = jax.block_until_ready(out)

    # Exercise the return_all_hidden_states=True path (list of L+1 tensors).
    pool = pixtral_hf_transformer(x, seg, cos, sin, layer_params, NH,
                                  return_all_hidden_states=True,
                                  ts=128, tq=128, tk=128, ti=128)
    pool = jax.block_until_ready(pool)
    assert len(pool) == L + 1 and pool[-1].shape == (B, S, H)

    ref = reference(x, seg, cos, sin, layer_params, NH, HD)
    assert out.shape == (B, S, H)
    err = float(jnp.max(jnp.abs(out - ref)))
    # bf16 MXU operands + approx reciprocal -> relaxed tolerance.
    assert jnp.allclose(out, ref, rtol=2e-2, atol=1e-2), err

    print("KERNEL_OK")
</pallas_src>

<mosaic_0001>
module attributes {stable_mosaic.version = 11 : i64} {
  func.func @_kv_kernel(%arg0: i32, %arg1: i32, %arg2: memref<1x128x128xf32, #tpu.memory_space<vmem>>, %arg3: memref<128x128xf32, #tpu.memory_space<vmem>>, %arg4: memref<128x128xf32, #tpu.memory_space<vmem>>, %arg5: memref<128x128xf32, #tpu.memory_space<vmem>>, %arg6: memref<1x128xf32, #tpu.memory_space<vmem>>, %arg7: memref<128x128xbf16, #tpu.memory_space<vmem>>, %arg8: memref<128x128xbf16, #tpu.memory_space<vmem>>, %arg9: memref<1x2x128x64xbf16, #tpu.memory_space<vmem>>, %arg10: memref<1x2x128x64xbf16, #tpu.memory_space<vmem>>) attributes {dimension_semantics = [#tpu.dimension_semantics<parallel>, #tpu.dimension_semantics<parallel>], iteration_bounds = array<i64: 2, 2>, scalar_prefetch = 0 : i64, scratch_operands = 0 : i64, tpu.core_type = #tpu.core_type<tc>, window_params = [{transform_indices = @transform_0, window_bounds = array<i64: 1, 128, 128>}, {transform_indices = @transform_1, window_bounds = array<i64: 128, 128>}, {transform_indices = @transform_2, window_bounds = array<i64: 128, 128>}, {transform_indices = @transform_3, window_bounds = array<i64: 128, 128>}, {pipeline_mode = #tpu.pipeline_mode<synchronous>, transform_indices = @transform_4, window_bounds = array<i64: 1, 128>}, {pipeline_mode = #tpu.pipeline_mode<synchronous>, transform_indices = @transform_5, window_bounds = array<i64: 128, 128>}, {pipeline_mode = #tpu.pipeline_mode<synchronous>, transform_indices = @transform_6, window_bounds = array<i64: 128, 128>}, {transform_indices = @transform_7, window_bounds = array<i64: 1, 2, 128, 64>}, {transform_indices = @transform_8, window_bounds = array<i64: 1, 2, 128, 64>}]} {
    %c0 = arith.constant 0 : index
    %c0_0 = arith.constant 0 : index
    %c0_1 = arith.constant 0 : index
    %0 = vector.load %arg2[%c0, %c0_0, %c0_1] : memref<1x128x128xf32, #tpu.memory_space<vmem>>, vector<1x128x128xf32>
    %1 = vector.shape_cast %0 : vector<1x128x128xf32> to vector<128x128xf32>
    %c0_2 = arith.constant 0 : index
    %c0_3 = arith.constant 0 : index
    %2 = vector.load %arg6[%c0_2, %c0_3] : memref<1x128xf32, #tpu.memory_space<vmem>>, vector<1x128xf32>
    %3 = vector.shape_cast %2 : vector<1x128xf32> to vector<128xf32>
    %4 = arith.mulf %1, %1 : vector<128x128xf32>
    %cst = arith.constant dense<0.000000e+00> : vector<128xf32>
    %5 = vector.multi_reduction <add>, %4, %cst [1] : vector<128x128xf32> to vector<128xf32>
    %6 = vector.shape_cast %5 : vector<128xf32> to vector<128x1xf32>
    %cst_4 = arith.constant 1.280000e+02 : f32
    %7 = vector.broadcast %cst_4 : f32 to vector<128x1xf32>
    %8 = arith.divf %6, %7 : vector<128x1xf32>
    %cst_5 = arith.constant 9.99999974E-6 : f32
    %9 = vector.broadcast %cst_5 : f32 to vector<128x1xf32>
    %10 = arith.addf %8, %9 : vector<128x1xf32>
    %11 = math.rsqrt %10 : vector<128x1xf32>
    %12 = vector.broadcast %11 : vector<128x1xf32> to vector<128x128xf32>
    %13 = arith.mulf %1, %12 : vector<128x128xf32>
    %14 = vector.shape_cast %3 : vector<128xf32> to vector<1x128xf32>
    %15 = vector.broadcast %14 : vector<1x128xf32> to vector<128x128xf32>
    %16 = arith.mulf %13, %15 : vector<128x128xf32>
    %17 = arith.truncf %16 : vector<128x128xf32> to vector<128x128xbf16>
    %c0_6 = arith.constant 0 : index
    %c0_7 = arith.constant 0 : index
    %18 = vector.load %arg7[%c0_6, %c0_7] : memref<128x128xbf16, #tpu.memory_space<vmem>>, vector<128x128xbf16>
    %cst_8 = arith.constant dense<0.000000e+00> : vector<128x128xf32>
    %19 = tpu.matmul %17, %18, %cst_8 {dimension_numbers = #tpu.dot_dimension_numbers<[1], [0], [0], [1], [0, 0, 1, 1], [], []>} : vector<128x128xbf16>, vector<128x128xbf16>, vector<128x128xf32> -> vector<128x128xf32>
    %c0_9 = arith.constant 0 : index
    %c0_10 = arith.constant 0 : index
    %20 = vector.load %arg8[%c0_9, %c0_10] : memref<128x128xbf16, #tpu.memory_space<vmem>>, vector<128x128xbf16>
    %cst_11 = arith.constant dense<0.000000e+00> : vector<128x128xf32>
    %21 = tpu.matmul %17, %20, %cst_11 {dimension_numbers = #tpu.dot_dimension_numbers<[1], [0], [0], [1], [0, 0, 1, 1], [], []>} : vector<128x128xbf16>, vector<128x128xbf16>, vector<128x128xf32> -> vector<128x128xf32>
    %c0_12 = arith.constant 0 : index
    %c0_13 = arith.constant 0 : index
    %22 = vector.load %arg3[%c0_12, %c0_13] : memref<128x128xf32, #tpu.memory_space<vmem>>, vector<128x128xf32>
    %c0_14 = arith.constant 0 : index
    %c0_15 = arith.constant 0 : index
    %23 = vector.load %arg4[%c0_14, %c0_15] : memref<128x128xf32, #tpu.memory_space<vmem>>, vector<128x128xf32>
    %c0_16 = arith.constant 0 : index
    %c0_17 = arith.constant 0 : index
    %24 = vector.load %arg5[%c0_16, %c0_17] : memref<128x128xf32, #tpu.memory_space<vmem>>, vector<128x128xf32>
    %c96_i32 = arith.constant 96 : i32
    %25 = tpu.dynamic_rotate %19 by %c96_i32 dim 1 : vector<128x128xf32>, i32 -> vector<128x128xf32>
    %c32_i32 = arith.constant 32 : i32
    %26 = tpu.dynamic_rotate %19 by %c32_i32 dim 1 : vector<128x128xf32>, i32 -> vector<128x128xf32>
    %27 = arith.mulf %19, %22 : vector<128x128xf32>
    %28 = arith.mulf %25, %23 : vector<128x128xf32>
    %29 = arith.addf %27, %28 : vector<128x128xf32>
    %30 = arith.mulf %26, %24 : vector<128x128xf32>
    %31 = arith.addf %29, %30 : vector<128x128xf32>
    %32 = vector.shape_cast %31 : vector<128x128xf32> to vector<128x2x64xf32>
    %33 = tpu.transpose %32, [1, 0, 2] : vector<128x2x64xf32> -> vector<2x128x64xf32>
    %34 = arith.truncf %33 : vector<2x128x64xf32> to vector<2x128x64xbf16>
    %c0_18 = arith.constant 0 : index
    %c0_19 = arith.constant 0 : index
    %c0_20 = arith.constant 0 : index
    %c0_21 = arith.constant 0 : index
    %35 = vector.load %arg9[%c0_18, %c0_19, %c0_20, %c0_21] : memref<1x2x128x64xbf16, #tpu.memory_space<vmem>>, vector<1x2x128x64xbf16>
    %36 = vector.shape_cast %35 : vector<1x2x128x64xbf16> to vector<2x128x64xbf16>
    %37 = vector.shape_cast %34 : vector<2x128x64xbf16> to vector<1x2x128x64xbf16>
    tpu.vector_store %arg9[%c0_18, %c0_19, %c0_20, %c0_21], %37 {strides = array<i32>} : memref<1x2x128x64xbf16, #tpu.memory_space<vmem>>, vector<1x2x128x64xbf16>,
    %38 = vector.shape_cast %21 : vector<128x128xf32> to vector<128x2x64xf32>
    %39 = tpu.transpose %38, [1, 0, 2] : vector<128x2x64xf32> -> vector<2x128x64xf32>
    %40 = arith.truncf %39 : vector<2x128x64xf32> to vector<2x128x64xbf16>
    %c0_22 = arith.constant 0 : index
    %c0_23 = arith.constant 0 : index
    %c0_24 = arith.constant 0 : index
    %c0_25 = arith.constant 0 : index
    %41 = vector.load %arg10[%c0_22, %c0_23, %c0_24, %c0_25] : memref<1x2x128x64xbf16, #tpu.memory_space<vmem>>, vector<1x2x128x64xbf16>
    %42 = vector.shape_cast %41 : vector<1x2x128x64xbf16> to vector<2x128x64xbf16>
    %43 = vector.shape_cast %40 : vector<2x128x64xbf16> to vector<1x2x128x64xbf16>
    tpu.vector_store %arg10[%c0_22, %c0_23, %c0_24, %c0_25], %43 {strides = array<i32>} : memref<1x2x128x64xbf16, #tpu.memory_space<vmem>>, vector<1x2x128x64xbf16>,
    return
  }
  func.func @transform_0(%arg0: i32, %arg1: i32) -> (i32, i32, i32) {
    %c0_i32 = arith.constant 0 : i32
    %c0_i32_0 = arith.constant 0 : i32
    return %arg0, %arg1, %c0_i32 : i32, i32, i32
  }
  func.func @transform_1(%arg0: i32, %arg1: i32) -> (i32, i32) {
    %c0_i32 = arith.constant 0 : i32
    %c0_i32_0 = arith.constant 0 : i32
    return %arg1, %c0_i32 : i32, i32
  }
  func.func @transform_2(%arg0: i32, %arg1: i32) -> (i32, i32) {
    %c0_i32 = arith.constant 0 : i32
    %c0_i32_0 = arith.constant 0 : i32
    return %arg1, %c0_i32 : i32, i32
  }
  func.func @transform_3(%arg0: i32, %arg1: i32) -> (i32, i32) {
    %c0_i32 = arith.constant 0 : i32
    %c0_i32_0 = arith.constant 0 : i32
    return %arg1, %c0_i32 : i32, i32
  }
  func.func @transform_4(%arg0: i32, %arg1: i32) -> (i32, i32) {
    %c0_i32 = arith.constant 0 : i32
    %c0_i32_0 = arith.constant 0 : i32
    %c0_i32_1 = arith.constant 0 : i32
    return %c0_i32, %c0_i32_0 : i32, i32
  }
  func.func @transform_5(%arg0: i32, %arg1: i32) -> (i32, i32) {
    %c0_i32 = arith.constant 0 : i32
    %c0_i32_0 = arith.constant 0 : i32
    %c0_i32_1 = arith.constant 0 : i32
    return %c0_i32, %c0_i32_0 : i32, i32
  }
  func.func @transform_6(%arg0: i32, %arg1: i32) -> (i32, i32) {
    %c0_i32 = arith.constant 0 : i32
    %c0_i32_0 = arith.constant 0 : i32
    %c0_i32_1 = arith.constant 0 : i32
    return %c0_i32, %c0_i32_0 : i32, i32
  }
  func.func @transform_7(%arg0: i32, %arg1: i32) -> (i32, i32, i32, i32) {
    %c0_i32 = arith.constant 0 : i32
    %c0_i32_0 = arith.constant 0 : i32
    %c0_i32_1 = arith.constant 0 : i32
    return %arg0, %c0_i32, %arg1, %c0_i32_0 : i32, i32, i32, i32
  }
  func.func @transform_8(%arg0: i32, %arg1: i32) -> (i32, i32, i32, i32) {
    %c0_i32 = arith.constant 0 : i32
    %c0_i32_0 = arith.constant 0 : i32
    %c0_i32_1 = arith.constant 0 : i32
    return %arg0, %c0_i32, %arg1, %c0_i32_0 : i32, i32, i32, i32
  }
}

</mosaic_0001>

<bundles_post_ra>
// kernel: tpu_custom_call.1
= control target key start
LH: loop header
LB: loop body
LE: loop exit
PB: predicated region body
PF: predicated region fallthrough
CT: control target
= control target key end

     0   :  { %s8596_s0 = inlined_call_operand.hbm [shape: f32[2,256,128], index: 0, kind: input, shape index: {}]   ;;  %s8597_s1 = inlined_call_operand.hbm [shape: f32[256,128], index: 1, kind: input, shape index: {}]   ;;  %s8598_s2 = inlined_call_operand.hbm [shape: f32[256,128], index: 2, kind: input, shape index: {}]   ;;  %s8599_s3 = inlined_call_operand.hbm [shape: f32[256,128], index: 3, kind: input, shape index: {}]   ;;  %s8600_s4 = inlined_call_operand.vmem [shape: f32[1,128], index: 4, kind: input, shape index: {}]   ;;  %s8601_s5 = inlined_call_operand.hbm [shape: bf16[128,128], index: 5, kind: input, shape index: {}]   ;;  %s8602_s6 = inlined_call_operand.hbm [shape: bf16[128,128], index: 6, kind: input, shape index: {}]   ;;  %s8603_s7 = inlined_call_operand.vmem [shape: bf16[2,2,256,64], index: 7, kind: output, shape index: {0}]   ;;  %s8604_s8 = inlined_call_operand.vmem [shape: bf16[2,2,256,64], index: 8, kind: output, shape index: {1}]  }
   0x1   :  { %8660 = sst [smem:[#allocation53_spill]] %s8597_s1 }
   0x2   :  { %8661 = sst [smem:[#allocation54_spill]] %s8600_s4 }
   0x3   :  { %8662 = sst [smem:[#allocation55_spill]] %s8601_s5 }
   0x4   :  { %8663 = sst [smem:[#allocation56_spill]] %s8602_s6 }
   0x5   :  { %8664 = sst [smem:[#allocation57_spill]] %s8603_s7 }
   0x6   :  { %8665 = sst [smem:[#allocation58_spill]] %s8604_s8 }
   0x7   :  { %14 = vsyncpa [#allocation3], 0 }
   0x8   :  { %16 = vsyncpa [#allocation3 + $0x1], 0 }
   0x9   :  { %17 = vsyncpa [#allocation5], 0 }
   0xa   :  { %19 = vsyncpa [#allocation5 + $0x1], 0 }
   0xb   :  { %20 = vsyncpa [#allocation8], 0 }
   0xc   :  { %22 = vsyncpa [#allocation8 + $0x1], 0 }
   0xd   :  { %23 = vsyncpa [#allocation11], 0  ;;  %s6760_s27 = smov 0   ;;  %s6762_s28 = smov 0  }
   0xe   :  { %s6764_s29 = smov 0   ;;  %s6766_s30 = smov 0  }
   0xf   :  { %s6768_s9 = smov 0   ;;  %s6770_s10 = smov 0  }
  0x10   :  { %s6772_s11 = smov 0   ;;  %s6774_s12 = smov 0  }
  0x11   :  { %s6776_s13 = smov 0   ;;  %s6778_s14 = smov 0  }
  0x12   :  { %s6780_s15 = smov 0  }
  0x13 LB: > { %8666 = sst [smem:[#allocation19_spill]] %s6661_s28  ;;  %s6812_s16 = sadd.s32 4294967295, %s6697_s15   ;;  %s6697_s15 = sphi %s6780_s15, %s29_s15   ;;  %s6693_s14 = sphi %s6778_s14, %s8786_s14   ;;  %s6689_s13 = sphi %s6776_s13, %s8785_s13   ;;  %s6685_s12 = sphi %s6774_s12, %s8784_s12   ;;  %s6681_s11 = sphi %s6772_s11, %s8783_s11   ;;  %s6677_s10 = sphi %s6770_s10, %s8782_s10   ;;  %s6673_s9 = sphi %s6768_s9, %s8781_s9   ;;  %s6669_s30 = sphi %s6766_s30, %s8780_s30   ;;  %s6665_s29 = sphi %s6764_s29, %s8778_s29   ;;  %s6661_s28 = sphi %s6762_s28, %s8777_s28   ;;  %s6657_s27 = sphi %s6760_s27, %s8776_s27  }
  0x14   : > { %8667 = sst [smem:[#allocation20_spill]] %s6665_s29  ;;  %p63_p0 = scmp.ne.s32.totalorder %s6673_s9, %s6669_s30 }
  0x15   : > { %8668 = sst [smem:[#allocation21_spill]] %s6681_s11  ;;  %p8605_p1 = scmp.eq.s32.totalorder %s6812_s16, 0 }
  0x16   : > { %8669 = sst [smem:[#allocation22_spill]] %s6685_s12  ;;  %p89_p2 = scmp.ne.s32.totalorder %s6661_s28, %s6657_s27 }
  0x17   : > { %8670 = sst [smem:[#allocation23_spill]] %s6812_s16  ;;  %p5882_p4 = scmp.ge.s32.totalorder %s6697_s15, 1 }
  0x18   : > { %p6821_p5 = por %p8605_p1, %p63_p0  ;;  %p6827_p6 = por %p89_p2, %p8605_p1 }
  0x19   : > { %p271_p7 = scmp.lt.s32.totalorder %s6697_s15, 5  ;;  %s6699_s20 = smov [#allocation9]  }
  0x1a   : > { %s8671_s17 = scalar_select %p6821_p5, 1, 0 }
  0x1b   : > { %s8673_s18 = scalar_select %p6827_p6, 1, 0 }
  0x1c   : > { %8672 = sst [smem:[#allocation24_spill]] %s8671_s17  ;;  %p6832_p8 = pnand %p5882_p4, %p271_p7 }
  0x1d   : > { %8674 = sst [smem:[#allocation25_spill]] %s8673_s18  ;;  %s286_s21 = sshll.u32 %s6699_s20, 4  ;;  %s287_s21 = int_to_ptr.vmem [resolvable:$true] %s286_s21 }
  0x1e   : > { %s8675_s19 = scalar_select %p6832_p8, 1, 0 }
  0x1f   : > { %p6242_p9 = pneg %p6832_p8  ;;  %s38_s23 = sadd.s32 1, %s6689_s13 }
  0x20   : > { %8676 = sst [smem:[#allocation26_spill]] %s8675_s19  ;;  %p6845_p11 = scmp.ge.s32.totalorder %s38_s23, 2 }
  0x21   : > { %p6840_p10 = pnand %p6242_p9, %p8605_p1  ;;  %s8679_s5 = sld [smem:[#allocation55_spill]] }
  0x22   : > { %s8678_s24 = scalar_select %p6845_p11, 1, 0 }
  0x23   : > { %s8677_s22 = scalar_select %p6840_p10, 1, 0 }
  0x24   : > { %p8618_p13 = pneg %p6840_p10 }
  0x27   : > { %s6415_s27 = scalar_lea.hbm %s8679_s5, 1024 }
  0x28   : > { %p6416_p12 = scmp.ne.s32.totalorder %s8679_s5, %s6415_s27  ;;  %p6422_p4 = scmp.lt.u32.totalorder %s6415_s27, %s8679_s5 }
  0x2a   : > { %p6418_p0 = pnand %p8618_p13, %p6416_p12 }
  0x2c   : > { %p6419_p2 = pneg %p6418_p0 }
  0x2e   : > { %p6424_p7 = pnand %p6422_p4, %p6419_p2 }
  0x30   : > { %6427 = shalt.err (!%p6424_p7)
}
  0x31   : > { %s6428_s12 = scalar_lea.vmem %s287_s21, 1024  ;;  %p6436_p6 = scmp.lt.s32.totalorder %s287_s21, %s287_s21 }
  0x32   : > { %p6429_p9 = scmp.ne.s32.totalorder %s287_s21, %s6428_s12  ;;  %p6437_p5 = scmp.lt.s32.totalorder %s6428_s12, %s6428_s12 }
  0x34   : > { %p6431_p1 = pnand %p6429_p9, %p8618_p13  ;;  %p6438_p8 = por %p6437_p5, %p6436_p6 }
  0x36   : > { %p6432_p3 = pneg %p6431_p1 }
  0x38   : > { %p6439_p11 = pnand %p6438_p8, %p6432_p3 }
  0x3a   : > { %6442 = shalt.err (!%p6439_p11)
}
  0x3b   : > { %s8610_s25 = smov 64   ;;  %s8611_s7 = smov 4  }
  0x3c   : > { %6245 = dma.hbm_to_vmem [thread:$0]  (!%p6840_p10), %s8679_s5, 1024, %s287_s21, [#allocation8], %s8610_s25, %s8610_s25, %s8611_s7  }
  0x3d   : > { %p8680_p1 = scmp.ne.s32.totalorder %s8678_s24, 0  ;;  %p8617_p3 = scmp.eq.s32.totalorder %s6697_s15, 0 }
  0x3e   : > { %s76_s26 = sadd.s32 1, %s6665_s29  ;;  %p83_p5 = scmp.ne.s32.totalorder %s6665_s29, %s6661_s28 }
  0x3f   : > { %s8788_s23 = smov (%p8680_p1, %s38_s23), 0  ;;  %p8616_p8 = scmp.lt.s32.totalorder %s6697_s15, 4 }
  0x40   : > { %8681 = sst [smem:[#allocation27_spill]] %s8788_s23  ;;  %s6882_s27 = ssub.s32 %s6689_s13, %s8788_s23 }
  0x41   : > { %p74_p6 = scmp.eq.s32.totalorder %s6882_s27, 0  ;;  %p85_p11 = por %p83_p5, %p8617_p3 }
  0x42   : > { %s338_s21 = sand.u32 1, %s6665_s29   ;;  %s6898_s12 = sshll.u32 %s6689_s13, 11 }
  0x43   : > { %s6891_s30 = scalar_select %p74_p6, %s6665_s29, %s76_s26  }
  0x44   : > { %s6895_s8 = sshll.u32 %s338_s21, 7  ;;  %s8683_s1 = sld [smem:[#allocation53_spill]] }
  0x45   : > { %8682 = sst [smem:[#allocation28_spill]] %s6891_s30  ;;  %s340_s23 = scalar_lea.vmem [#allocation4], %s6895_s8 }
  0x46   : > { %s347_s26 = sshll.u32 %s340_s23, 4  ;;  %p6909_p12 = pnand %p8616_p8, %p85_p11  ;;  %s6913_s26 = int_to_ptr.vmem [resolvable:$true] %s347_s26 }
  0x47   : > { %s8685_s21 = sand.u32 1, %s6697_s15  }
  0x48   : > { %s8684_s20 = scalar_select %p6909_p12, 1, 0 }
  0x49   : > { %s6917_s30 = scalar_lea.sflag [#allocation5], %s8685_s21  ;;  %p6923_p2 = pneg %p6909_p12 }
  0x4a   : > { %s6904_s5 = scalar_lea.hbm %s8683_s1, %s6898_s12  ;;  %s6448_s11 = scalar_lea.hbm %s8683_s1, 4096 }
  0x4b   : > { %s6443_s25 = scalar_lea.hbm %s6904_s5, 2048  ;;  %p6449_p9 = scmp.lt.u32.totalorder %s6904_s5, %s8683_s1 }
  0x4c   : > { %p6444_p0 = scmp.ne.s32.totalorder %s6904_s5, %s6443_s25  ;;  %p6450_p5 = scmp.lt.u32.totalorder %s6448_s11, %s6443_s25 }
  0x4d   : > { %s8686_s7 = scalar_select %p6923_p2, 1, 0 }
  0x4e   : > { %p6446_p4 = pnand %p6923_p2, %p6444_p0  ;;  %p6451_p6 = por %p6450_p5, %p6449_p9 }
  0x4f   : > { %p6452_p11 = scmp.lt.u32.totalorder %s6443_s25, %s6904_s5 }
  0x50   : > { %p6447_p7 = pneg %p6446_p4 }
  0x51   : > { %p6453_p8 = por %p6452_p11, %p6451_p6 }
  0x53   : > { %p6454_p3 = pnand %p6453_p8, %p6447_p7 }
  0x55   : > { %6457 = shalt.err (!%p6454_p3)
}
  0x56   : > { %s6458_s21 = scalar_lea.vmem %s6913_s26, 2048  ;;  %s6702_s29 = smov [#allocation4]  }
  0x57   : > { %p6459_p0 = scmp.ne.s32.totalorder %s6913_s26, %s6458_s21  ;;  %s6463_s23 = sshll.u32 %s6702_s29, 4  ;;  %s6464_s23 = int_to_ptr.vmem [resolvable:$false] %s6463_s23 }
  0x58   : > { %s6465_s4 = scalar_lea.vmem %s6464_s23, 4096  ;;  %p6466_p1 = scmp.lt.s32.totalorder %s6913_s26, %s6464_s23 }
  0x59   : > { %p6461_p4 = pnand %p6459_p0, %p6923_p2  ;;  %p6467_p10 = scmp.lt.s32.totalorder %s6465_s4, %s6458_s21 }
  0x5b   : > { %p6462_p13 = pneg %p6461_p4  ;;  %p6468_p9 = por %p6467_p10, %p6466_p1 }
  0x5d   : > { %p6469_p5 = pnand %p6468_p9, %p6462_p13 }
  0x5f   : > { %6472 = shalt.err (!%p6469_p5)
}
  0x60   : > { %s8629_s11 = smov 128   ;;  %s8631_s18 = smov 8  }
  0x61   : > { %6255 = dma.hbm_to_vmem [thread:$0]  (!%p6909_p12), %s6904_s5, 2048, %s6913_s26, %s6917_s30, %s8629_s11, %s8629_s11, %s8631_s18  }
  0x62   : > { %s6705_s25 = smov [#allocation10]   ;;  %s8687_s6 = sld [smem:[#allocation56_spill]] }
  0x63   : > { %s299_s29 = sshll.u32 %s6705_s25, 4  ;;  %p8688_p13 = scmp.ne.s32.totalorder %s8677_s22, 0  ;;  %s300_s29 = int_to_ptr.vmem [resolvable:$true] %s299_s29 }
  0x65   : > { %p8689_p1 = pneg %p8688_p13 }
  0x68   : > { %s6473_s4 = scalar_lea.hbm %s8687_s6, 1024 }
  0x69   : > { %p6474_p10 = scmp.ne.s32.totalorder %s8687_s6, %s6473_s4  ;;  %p6480_p7 = scmp.lt.u32.totalorder %s6473_s4, %s8687_s6 }
  0x6b   : > { %p6476_p3 = pnand %p6474_p10, %p8689_p1 }
  0x6d   : > { %p6477_p8 = pneg %p6476_p3 }
  0x6f   : > { %p6482_p6 = pnand %p6480_p7, %p6477_p8 }
  0x71   : > { %6485 = shalt.err (!%p6482_p6)
}
  0x72   : > { %s6486_s5 = scalar_lea.vmem %s300_s29, 1024  ;;  %p8690_p0 = pmov %p8689_p1 }
  0x73   : > { %p6487_p11 = scmp.ne.s32.totalorder %s300_s29, %s6486_s5  ;;  %p6494_p5 = scmp.lt.s32.totalorder %s300_s29, %s300_s29 }
  0x74   : > { %p6495_p12 = scmp.lt.s32.totalorder %s6486_s5, %s6486_s5 }
  0x75   : > { %p6489_p4 = pnand %p6487_p11, %p8690_p0 }
  0x76   : > { %p6496_p2 = por %p6495_p12, %p6494_p5 }
  0x77   : > { %p6490_p9 = pneg %p6489_p4 }
  0x79   : > { %p6497_p1 = pnand %p6496_p2, %p6490_p9 }
  0x7b   : > { %6500 = shalt.err (!%p6497_p1)
}
  0x7c   : > { %s8691_s1 = smov 4   ;;  %s8692_s28 = smov 64  }
  0x7d   : > { %6248 = dma.hbm_to_vmem [thread:$0]  (!%p8688_p13), %s8687_s6, 1024, %s300_s29, [#allocation11], %s8692_s28, %s8692_s28, %s8691_s1  }
  0x7e   : > { %s41_s22 = sadd.s32 1, %s6693_s14  ;;  %s50_s26 = sadd.s32 1, %s6677_s10 }
  0x7f   : > { %p8693_p12 = scmp.ne.s32.totalorder %s8678_s24, 0  ;;  %p57_p2 = scmp.ne.s32.totalorder %s6677_s10, %s6673_s9 }
  0x80   : > { %s313_s25 = sand.u32 1, %s6677_s10   ;;  %p8694_p3 = scmp.eq.s32.totalorder %s6697_s15, 0 }
  0x81   : > { %s8790_s22 = smov (!%p8693_p12, %s41_s22), %s6693_s14  ;;  %p8696_p7 = scmp.eq.s32.totalorder %s6812_s16, 3 }
  0x82   : > { %p43_p10 = scmp.ge.s32.totalorder %s8790_s22, 2  ;;  %p6983_p8 = por %p8694_p3, %p57_p2 }
  0x83   : > { %p6989_p6 = por %p8696_p7, %p57_p2  ;;  %s5886_s24 = sshll.u32 %s313_s25, 7 }
  0x84   : > { %s8792_s22 = smov (%p43_p10, %s8790_s22), 0  ;;  %s5887_s29 = sshll.u32 %s6689_s13, 4 }
  0x85   : > { %s8697_s21 = scalar_select %p6989_p6, 1, 0 }
  0x86   : > { %s45_s4 = ssub.s32 %s6693_s14, %s8792_s22  ;;  %s5888_s1 = sshll.u32 %s6693_s14, 5 }
  0x87   : > { %8698 = sst [smem:[#allocation29_spill]] %s8697_s21  ;;  %s47_s5 = sor.u32 %s6882_s27, %s45_s4 }
  0x88   : > { %p48_p13 = scmp.eq.s32.totalorder %s47_s5, 0  ;;  %s323_s28 = sadd.s32 %s5888_s1, %s5887_s29 }
  0x89   : > { %s5889_s17 = sshll.u32 %s323_s28, 7  ;;  %s317_s19 = scalar_lea.vmem [#allocation2], %s5886_s24 }
  0x8a   : > { %s326_s11 = sshll.u32 %s317_s19, 4  ;;  %s7006_s21 = scalar_lea.hbm %s8596_s0, %s5889_s17  ;;  %s7008_s11 = int_to_ptr.vmem [resolvable:$true] %s326_s11 }
  0x8b   : > { %s7001_s18 = scalar_select %p48_p13, %s6677_s10, %s50_s26  }
  0x8c   : > { %p8699_p11 = scmp.lt.s32.totalorder %s6697_s15, 4  ;;  %s7022_s6 = scalar_lea.hbm %s8598_s2, %s6898_s12 }
  0x8d   : > { %s361_s16 = scalar_lea.vmem [#allocation6], %s6895_s8  ;;  %s7027_s4 = scalar_lea.sflag [#allocation3], %s313_s25 }
  0x8e   : > { %p7014_p0 = pnand %p8699_p11, %p6983_p8  ;;  %s368_s29 = sshll.u32 %s361_s16, 4  ;;  %s7025_s29 = int_to_ptr.vmem [resolvable:$true] %s368_s29 }
  0x8f   : > { %s6501_s23 = scalar_lea.hbm %s7006_s21, 2048  ;;  %s6506_s28 = scalar_lea.hbm %s8596_s0, 8192 }
  0x90   : > { %p6502_p4 = scmp.ne.s32.totalorder %s7006_s21, %s6501_s23  ;;  %p6503_p9 = pneg %p7014_p0 }
  0x91   : > { %p6507_p12 = scmp.lt.u32.totalorder %s7006_s21, %s8596_s0  ;;  %p6508_p2 = scmp.lt.u32.totalorder %s6506_s28, %s6501_s23 }
  0x92   : > { %p6504_p5 = pnand %p6503_p9, %p6502_p4  ;;  %p6510_p3 = scmp.lt.u32.totalorder %s6501_s23, %s7006_s21 }
  0x93   : > { %p6509_p10 = por %p6508_p2, %p6507_p12 }
  0x94   : > { %p6505_p1 = pneg %p6504_p5 }
  0x95   : > { %p6511_p8 = por %p6510_p3, %p6509_p10 }
  0x97   : > { %p6512_p7 = pnand %p6511_p8, %p6505_p1 }
  0x99   : > { %6515 = shalt.err (!%p6512_p7)
}
  0x9a   : > { %s6516_s25 = scalar_lea.vmem %s7008_s11, 2048  ;;  %s6706_s24 = smov [#allocation2]  }
  0x9b   : > { %p6517_p13 = scmp.ne.s32.totalorder %s7008_s11, %s6516_s25  ;;  %s6521_s26 = sshll.u32 %s6706_s24, 4  ;;  %s6522_s26 = int_to_ptr.vmem [resolvable:$false] %s6521_s26 }
  0x9c   : > { %s6523_s16 = scalar_lea.vmem %s6522_s26, 4096  ;;  %p6524_p5 = scmp.lt.s32.totalorder %s7008_s11, %s6522_s26 }
  0x9d   : > { %p6519_p11 = pnand %p6517_p13, %p6503_p9  ;;  %p6525_p12 = scmp.lt.s32.totalorder %s6523_s16, %s6516_s25 }
  0x9f   : > { %p6520_p4 = pneg %p6519_p11  ;;  %p6526_p2 = por %p6525_p12, %p6524_p5 }
  0xa1   : > { %p6527_p10 = pnand %p6526_p2, %p6520_p4 }
  0xa3   : > { %6530 = shalt.err (!%p6527_p10)
}
  0xa4   : > { %s8701_s23 = smov 8   ;;  %s8702_s5 = smov 128  }
  0xa5   : > { %6252 = dma.hbm_to_vmem [thread:$0]  (!%p7014_p0), %s7006_s21, 2048, %s7008_s11, %s7027_s4, %s8702_s5, %s8702_s5, %s8701_s23  }
  0xa6   : > { %s6531_s1 = scalar_lea.hbm %s7022_s6, 2048  ;;  %p8703_p1 = scmp.ne.s32.totalorder %s8686_s7, 0 }
  0xa7   : > { %p6532_p9 = scmp.ne.s32.totalorder %s7022_s6, %s6531_s1  ;;  %s6536_s27 = scalar_lea.hbm %s8598_s2, 4096 }
  0xa8   : > { %p6537_p7 = scmp.lt.u32.totalorder %s7022_s6, %s8598_s2  ;;  %p6538_p13 = scmp.lt.u32.totalorder %s6536_s27, %s6531_s1 }
  0xa9   : > { %p6534_p3 = pnand %p6532_p9, %p8703_p1  ;;  %p6540_p4 = scmp.lt.u32.totalorder %s6531_s1, %s7022_s6 }
  0xaa   : > { %p6539_p11 = por %p6538_p13, %p6537_p7 }
  0xab   : > { %p6535_p8 = pneg %p6534_p3 }
  0xac   : > { %p6541_p5 = por %p6540_p4, %p6539_p11 }
  0xae   : > { %p6542_p12 = pnand %p6541_p5, %p6535_p8 }
  0xb0   : > { %6545 = shalt.err (!%p6542_p12)
}
  0xb1   : > { %s6546_s11 = scalar_lea.vmem %s7025_s29, 2048  ;;  %s6707_s21 = smov [#allocation6]  }
  0xb2   : > { %p6547_p0 = scmp.ne.s32.totalorder %s7025_s29, %s6546_s11  ;;  %s6551_s4 = sshll.u32 %s6707_s21, 4  ;;  %s6552_s4 = int_to_ptr.vmem [resolvable:$false] %s6551_s4 }
  0xb3   : > { %s6553_s24 = scalar_lea.vmem %s6552_s4, 4096  ;;  %p6554_p9 = scmp.lt.s32.totalorder %s7025_s29, %s6552_s4 }
  0xb4   : > { %p6549_p2 = pnand %p6547_p0, %p8703_p1  ;;  %p6555_p3 = scmp.lt.s32.totalorder %s6553_s24, %s6546_s11 }
  0xb6   : > { %p6550_p10 = pneg %p6549_p2  ;;  %p6556_p7 = por %p6555_p3, %p6554_p9 }
  0xb8   : > { %p6557_p13 = pnand %p6556_p7, %p6550_p10 }
  0xba   : > { %6560 = shalt.err (!%p6557_p13)
}
  0xbb   : > { %p8704_p8 = scmp.ne.s32.totalorder %s8684_s20, 0  ;;  %s7087_s1 = scalar_lea.hbm %s8599_s3, %s6898_s12 }
  0xbc   : > { %s382_s28 = scalar_lea.vmem [#allocation7], %s6895_s8  ;;  %s8705_s27 = sand.u32 1, %s6697_s15  }
  0xbd   : > { %6258 = dma.hbm_to_vmem [thread:$0]  (!%p8704_p8), %s7022_s6, 2048, %s7025_s29, %s6917_s30, %s8702_s5, %s8702_s5, %s8701_s23  }
  0xbe   : > { %s389_s17 = sshll.u32 %s382_s28, 4  ;;  %s7094_s19 = scalar_lea.sflag [#allocation8], %s8705_s27  ;;  %s7090_s17 = int_to_ptr.vmem [resolvable:$true] %s389_s17 }
  0xbf   : > { %s6561_s25 = scalar_lea.hbm %s7087_s1, 2048  ;;  %s6566_s12 = scalar_lea.hbm %s8599_s3, 4096 }
  0xc0   : > { %p6562_p11 = scmp.ne.s32.totalorder %s7087_s1, %s6561_s25  ;;  %p6567_p12 = scmp.lt.u32.totalorder %s7087_s1, %s8599_s3 }
  0xc1   : > { %p6568_p0 = scmp.lt.u32.totalorder %s6566_s12, %s6561_s25  ;;  %p6570_p10 = scmp.lt.u32.totalorder %s6561_s25, %s7087_s1 }
  0xc2   : > { %p6564_p4 = pnand %p6562_p11, %p8703_p1 }
  0xc3   : > { %p6569_p2 = por %p6568_p0, %p6567_p12 }
  0xc4   : > { %p6565_p5 = pneg %p6564_p4 }
  0xc5   : > { %p6571_p9 = por %p6570_p10, %p6569_p2 }
  0xc7   : > { %p6572_p3 = pnand %p6571_p9, %p6565_p5 }
  0xc9   : > { %6575 = shalt.err (!%p6572_p3)
}
  0xca   : > { %s6576_s8 = scalar_lea.vmem %s7090_s17, 2048  ;;  %s6708_s21 = smov [#allocation7]  }
  0xcb   : > { %p6577_p7 = scmp.ne.s32.totalorder %s7090_s17, %s6576_s8  ;;  %s6581_s4 = sshll.u32 %s6708_s21, 4  ;;  %s6582_s4 = int_to_ptr.vmem [resolvable:$false] %s6581_s4 }
  0xcc   : > { %s6583_s24 = scalar_lea.vmem %s6582_s4, 4096  ;;  %p6584_p4 = scmp.lt.s32.totalorder %s7090_s17, %s6582_s4 }
  0xcd   : > { %p6579_p13 = pnand %p6577_p7, %p8703_p1  ;;  %p6585_p6 = scmp.lt.s32.totalorder %s6583_s24, %s6576_s8 }
  0xcf   : > { %p6580_p11 = pneg %p6579_p13  ;;  %p6586_p12 = por %p6585_p6, %p6584_p4 }
  0xd1   : > { %p6587_p0 = pnand %p6586_p12, %p6580_p11 }
  0xd3   : > { %6590 = shalt.err (!%p6587_p0)
}
  0xd4   : > { %6261 = dma.hbm_to_vmem [thread:$0]  (!%p8704_p8), %s7087_s1, 2048, %s7090_s17, %s7094_s19, %s8702_s5, %s8702_s5, %s8701_s23  }
  0xd5   : > { %s8706_s7 = sld [smem:[#allocation26_spill]] }
  0xdb   : > { %p8707_p1 = scmp.ne.s32.totalorder %s8706_s7, 0 }
  0xdd   : > { %401 = sbr.rel (%p8707_p1) target bundleno = 1084 (0x43c), region = 48 }
  0xe4   : > { %s8708_s26 = sld [smem:[#allocation24_spill]]  ;;  %s403_s16 = sand.u32 1, %s6673_s9  }
  0xe5   : > { %s7124_s28 = sshll.u32 %s403_s16, 7  ;;  %s404_s27 = scalar_lea.sflag [#allocation3], %s403_s16 }
  0xe6   : > { %s7127_s25 = scalar_lea.vmem [#allocation2], %s7124_s28 }
  0xea   : > { %p8709_p6 = scmp.ne.s32.totalorder %s8708_s26, 0 }
  0xec   : > { %6636 = dma.done.wait (%p8709_p6), %s404_s27, 2048  }
  0xed   : > { %6638 = vsyncadd (%p8709_p6), %s404_s27, 4294965248  ;;  %s8710_s20 = sld [smem:[#allocation23_spill]]  ;;  %s8711_s30 = sld [smem:[#allocation19_spill]] }
  0xee   : > { %s8712_s23 = sld [smem:[#allocation25_spill]] }
  0xf3   : > { %s412_s5 = sand.u32 1, %s8710_s20   ;;  %s414_s1 = sand.u32 1, %s8711_s30  }
  0xf4   : > { %s5901_s17 = sshll.u32 %s414_s1, 7  ;;  %s413_s19 = scalar_lea.sflag [#allocation5], %s412_s5 }
  0xf5   : > { %s7135_s6 = scalar_lea.vmem [#allocation4], %s5901_s17  ;;  %p8713_p8 = scmp.ne.s32.totalorder %s8712_s23, 0 }
  0xf7   : > { %6640 = dma.done.wait (%p8713_p8), %s413_s19, 4096  }
  0xf8   : > { %6642 = vsyncadd (%p8713_p8), %s413_s19, 4294963200  ;;  %s7141_s12 = scalar_lea.vmem [#allocation6], %s5901_s17  ;;  %s431_s29 = scalar_lea.sflag [#allocation8], %s412_s5 }
  0xf9   : > { %s7143_s11 = scalar_lea.vmem [#allocation7], %s5901_s17 }
  0xfa   : > { %6644 = dma.done.wait (%p8713_p8), %s431_s29, 2048  }
  0xfb   : > { %6646 = vsyncadd (%p8713_p8), %s431_s29, 4294965248  ;;  %p8714_p5 = scmp.eq.s32.totalorder %s8710_s20, 0 }
  0xfd   : > { %6648 = dma.done.wait (%p8714_p5), [#allocation8], 1024   ;;  %p8715_p2 = pmov %p8714_p5 }
  0xff   : > { %6650 = vsyncadd (%p8715_p2), [#allocation8], 4294966272  ;;  %p8716_p10 = pmov %p8715_p2 }
 0x100   : > { %p8717_p9 = pmov %p8715_p2 }
 0x101   : > { %6652 = dma.done.wait (%p8716_p10), [#allocation11], 1024  }
 0x102   : > { %6654 = vsyncadd (%p8717_p9), [#allocation11], 4294966272  ;;  %v7158_v0 = vld [vmem:[%s7127_s25 + $0x10] sm:$0xff]  ;;  %v7161_v1 = vld [vmem:[%s7127_s25] sm:$0xff]  ;;  %s8718_s4 = sld [smem:[#allocation54_spill]]  ;;  %s6709_s24 = smov 32  }
 0x103   : > { %v7164_v2 = vld [vmem:[%s7127_s25 + $0x18] sm:$0xff]  ;;  %v519_v3 = vmul.f32 %v7158_v0, %v7158_v0  ;;  %v517_v4 = vmul.f32 %v7161_v1, %v7161_v1  ;;  %v7171_v5 = vld [vmem:[%s7127_s25 + $0x8] sm:$0xff]  ;;  %v7181_v9 = vld [vmem:[%s7127_s25 + $0x20] sm:$0xff]  ;;  %s6710_s7 = smov 96   ;;  %s6711_s26 = smov 64   ;;  %vm3222_vm0 = vcmask 519168  }
 0x104   : > { %v520_v6 = vmul.f32 %v7164_v2, %v7164_v2  ;;  %v518_v7 = vmul.f32 %v7171_v5, %v7171_v5  ;;  %v7178_v8 = vld [vmem:[%s7127_s25 + $0x28] sm:$0xff]  ;;  %v7184_v10 = vld [vmem:[%s7127_s25 + $0x38] sm:$0xff]  ;;  %v7187_v11 = vld [vmem:[%s7127_s25 + $0x30] sm:$0xff]  ;;  %v521_v14 = vmul.f32 %v7181_v9, %v7181_v9  ;;  %s7887_s16 = scalar_lea.vmem [#allocation13], %s7124_s28  ;;  %s8181_s27 = scalar_lea.vmem [#allocation12], %s7124_s28 }
 0x105   : > { %537 = vadd.xlane.f32.xlu1 %v519_v3  ;;  %533 = vadd.xlane.f32.xlu0 %v517_v4  ;;  %v6367_v12 = vld [vmem:[#allocation9] sm:$0xff]   ;;  %v522_v13 = vmul.f32 %v7178_v8, %v7178_v8  ;;  %v6369_v16 = vld [vmem:[#allocation9 + $0x8] sm:$0xff]   ;;  %v524_v20 = vmul.f32 %v7184_v10, %v7184_v10  ;;  %v523_v21 = vmul.f32 %v7187_v11, %v7187_v11  ;;  %v7204_v22 = vld [vmem:[%s7127_s25 + $0x58] sm:$0xff]  ;;  %s8766_s28 = sld [smem:[#allocation29_spill]] }
 0x106   : > { %v6368_v15 = vld [vmem:[#allocation10] sm:$0xff]   ;;  %6162 = vmatprep.subr.bf16.mxu0 %v6367_v12  ;;  %v6370_v17 = vld [vmem:[#allocation10 + $0x8] sm:$0xff]   ;;  %v7207_v23 = vld [vmem:[%s7127_s25 + $0x50] sm:$0xff]  ;;  %v528_v28 = vmul.f32 %v7204_v22, %v7204_v22 }
 0x107   : > { %6194 = vmatprep.subr.bf16.mxu1 %v6368_v15  ;;  %6163 = vmatpush3.bf16.msra.mxu0 %v6367_v12  ;;  %v7194_v18 = vld [vmem:[%s7127_s25 + $0x48] sm:$0xff]  ;;  %v7197_v19 = vld [vmem:[%s7127_s25 + $0x40] sm:$0xff]  ;;  %v6371_v26 = vld [vmem:[#allocation9 + $0x10] sm:$0xff]   ;;  %v527_v29 = vmul.f32 %v7207_v23, %v7207_v23 }
 0x108   : > { %6195 = vmatpush3.bf16.msra.mxu1 %v6368_v15  ;;  %6164 = vmatprep.subr.bf16.mxu0 %v6369_v16  ;;  %v526_v24 = vmul.f32 %v7194_v18, %v7194_v18  ;;  %v525_v25 = vmul.f32 %v7197_v19, %v7197_v19  ;;  %v6372_v27 = vld [vmem:[#allocation10 + $0x10] sm:$0xff]   ;;  %v7218_v30 = vld [vmem:[%s7127_s25 + $0x68] sm:$0xff]  ;;  %v7221_v31 = vld [vmem:[%s7127_s25 + $0x60] sm:$0xff] }
 0x109   : > { %539 = vadd.xlane.f32.xlu1 %v520_v6  ;;  %535 = vadd.xlane.f32.xlu0 %v518_v7  ;;  %v6373_v32 = vld [vmem:[#allocation9 + $0x18] sm:$0xff]   ;;  %v530_v34 = vmul.f32 %v7218_v30, %v7218_v30  ;;  %v529_v35 = vmul.f32 %v7221_v31, %v7221_v31  ;;  %v7231_v37 = vld [vmem:[%s7127_s25 + $0x70] sm:$0xff]  ;;  %v6375_v38 = vld [vmem:[#allocation9 + $0x20] sm:$0xff]  }
 0x10a   : > { %6196 = vmatprep.subr.bf16.mxu1 %v6370_v17  ;;  %v6374_v33 = vld [vmem:[#allocation10 + $0x18] sm:$0xff]   ;;  %v6376_v39 = vld [vmem:[#allocation10 + $0x20] sm:$0xff]   ;;  %v531_v41 = vmul.f32 %v7231_v37, %v7231_v37  ;;  %v6377_v42 = vld [vmem:[#allocation9 + $0x28] sm:$0xff]  }
 0x10b   : > { %6165 = vmatpush3.bf16.msra.mxu0 %v6369_v16  ;;  %v7228_v36 = vld [vmem:[%s7127_s25 + $0x78] sm:$0xff]  ;;  %v6378_v43 = vld [vmem:[#allocation10 + $0x28] sm:$0xff]   ;;  %v6379_v44 = vld [vmem:[#allocation9 + $0x30] sm:$0xff]   ;;  %p8767_p3 = scmp.ne.s32.totalorder %s8766_s28, 0 }
 0x10c   : > { %6197 = vmatpush3.bf16.msra.mxu1 %v6370_v17  ;;  %6166 = vmatprep.subr.bf16.mxu0 %v6371_v26  ;;  %v532_v40 = vmul.f32 %v7228_v36, %v7228_v36  ;;  %v6380_v45 = vld [vmem:[#allocation10 + $0x30] sm:$0xff]   ;;  %v6381_v46 = vld [vmem:[#allocation9 + $0x38] sm:$0xff]   ;;  %s8768_s25 = sld [smem:[#allocation21_spill]] (%p8767_p3)  ;;  %s8769_s20 = sld [smem:[#allocation22_spill]] (%p8767_p3) }
 0x10d   : > { %543 = vadd.xlane.f32.xlu1 %v522_v13  ;;  %541 = vadd.xlane.f32.xlu0 %v521_v14  ;;  %v6382_v47 = vld [vmem:[#allocation10 + $0x38] sm:$0xff]  }
 0x10e   : > { %6198 = vmatprep.subr.bf16.mxu1 %v6372_v27 }
 0x10f   : > { %6167 = vmatpush3.bf16.msra.mxu0 %v6371_v26 }
 0x110   : > { %6199 = vmatpush3.bf16.msra.mxu1 %v6372_v27  ;;  %6168 = vmatprep.subr.bf16.mxu0 %v6373_v32 }
 0x111   : > { %547 = vadd.xlane.f32.xlu1 %v524_v20  ;;  %545 = vadd.xlane.f32.xlu0 %v523_v21 }
 0x112   : > { %6200 = vmatprep.subr.bf16.mxu1 %v6374_v33  ;;  %s6055_s30 = sshll.u32 (%p8767_p3), %s8768_s25, 4  ;;  %s6056_s23 = sshll.u32 (%p8767_p3), %s8769_s20, 6 }
 0x113   : > { %6169 = vmatpush3.bf16.msra.mxu0 %v6373_v32  ;;  %s5348_s5 = sadd.s32 (%p8767_p3), %s6056_s23, %s6055_s30 }
 0x114   : > { %6201 = vmatpush3.bf16.msra.mxu1 %v6374_v33  ;;  %6170 = vmatprep.subr.bf16.mxu0 %v6375_v38  ;;  %s6057_s1 = sshll.u32 (%p8767_p3), %s5348_s5, 2 }
 0x115   : > { %551 = vadd.xlane.f32.xlu1 %v526_v24  ;;  %549 = vadd.xlane.f32.xlu0 %v525_v25 }
 0x116   : > { %6202 = vmatprep.subr.bf16.mxu1 %v6376_v39 }
 0x117   : > { %6171 = vmatpush3.bf16.msra.mxu0 %v6375_v38 }
 0x118   : > { %6203 = vmatpush3.bf16.msra.mxu1 %v6376_v39  ;;  %6172 = vmatprep.subr.bf16.mxu0 %v6377_v42 }
 0x119   : > { %555 = vadd.xlane.f32.xlu1 %v528_v28  ;;  %553 = vadd.xlane.f32.xlu0 %v527_v29  ;;  %v7241_v28 = vld [vmem:[%s8718_s4] ss:$0 sm:$0xff] }
 0x11a   : > { %6204 = vmatprep.subr.bf16.mxu1 %v6378_v43 }
 0x11b   : > { %6173 = vmatpush3.bf16.msra.mxu0 %v6377_v42 }
 0x11c   : > { %6205 = vmatpush3.bf16.msra.mxu1 %v6378_v43  ;;  %6174 = vmatprep.subr.bf16.mxu0 %v6379_v44 }
 0x11d   : > { %559 = vadd.xlane.f32.xlu1 %v530_v34  ;;  %557 = vadd.xlane.f32.xlu0 %v529_v35 }
 0x11e   : > { %6206 = vmatprep.subr.bf16.mxu1 %v6380_v45 }
 0x11f   : > { %6175 = vmatpush3.bf16.msra.mxu0 %v6379_v44 }
 0x120   : > { %6207 = vmatpush3.bf16.msra.mxu1 %v6380_v45  ;;  %6176 = vmatprep.subr.bf16.mxu0 %v6381_v46 }
 0x121   : > { %563 = vadd.xlane.f32.xlu1 %v532_v40  ;;  %561 = vadd.xlane.f32.xlu0 %v531_v41 }
 0x122   : > { %6208 = vmatprep.subr.bf16.mxu1 %v6382_v47 }
 0x123   : > { %6177 = vmatpush3.bf16.msra.mxu0 %v6381_v46 }
 0x124   : > { %6209 = vmatpush3.bf16.msra.mxu1 %v6382_v47 }
 0x192   : > { %v538_v48 = vpop.xlane.xlu1 %537  ;;  %v534_v49 = vpop.xlane.xlu0 %533 }
 0x193   : > { %v568_v50 = vmul.f32 0.0078125, %v538_v48  ;;  %v566_v51 = vmul.f32 0.0078125, %v534_v49 }
 0x195   : > { %v584_v52 = vadd.f32 1e-05, %v568_v50  ;;  %v582_v53 = vadd.f32 1e-05, %v566_v51 }
 0x196   : > { %v540_v54 = vpop.xlane.xlu1 %539  ;;  %v536_v55 = vpop.xlane.xlu0 %535 }
 0x197   : > { %6383 = vrsqrt.f32 %v584_v52  ;;  %v569_v56 = vmul.f32 0.0078125, %v540_v54  ;;  %v567_v57 = vmul.f32 0.0078125, %v536_v55 }
 0x198   : > { %6385 = vrsqrt.f32 %v582_v53 }
 0x199   : > { %v585_v58 = vadd.f32 1e-05, %v569_v56  ;;  %v583_v59 = vadd.f32 1e-05, %v567_v57 }
 0x19a   : > { %v544_v60 = vpop.xlane.xlu1 %543  ;;  %v542_v61 = vpop.xlane.xlu0 %541 }
 0x19b   : > { %6387 = vrsqrt.f32 %v585_v58  ;;  %v571_v62 = vmul.f32 0.0078125, %v544_v60  ;;  %v570_v63 = vmul.f32 0.0078125, %v542_v61 }
 0x19c   : > { %6389 = vrsqrt.f32 %v583_v59 }
 0x19d   : > { %v587_v3 = vadd.f32 1e-05, %v571_v62  ;;  %v586_v4 = vadd.f32 1e-05, %v570_v63 }
 0x19e   : > { %v548_v6 = vpop.xlane.xlu1 %547  ;;  %v546_v7 = vpop.xlane.xlu0 %545 }
 0x19f   : > { %6391 = vrsqrt.f32 %v587_v3  ;;  %v573_v12 = vmul.f32 0.0078125, %v548_v6  ;;  %v572_v13 = vmul.f32 0.0078125, %v546_v7 }
 0x1a0   : > { %6393 = vrsqrt.f32 %v586_v4 }
 0x1a1   : > { %v6384_v14 = vpop.eup %6383  ;;  %v589_v15 = vadd.f32 1e-05, %v573_v12  ;;  %v588_v16 = vadd.f32 1e-05, %v572_v13 }
 0x1a2   : > { %v6386_v17 = vpop.eup %6385  ;;  %v552_v20 = vpop.xlane.xlu1 %551  ;;  %v616_v26 = vmul.f32 %v6384_v14, %v7158_v0 }
 0x1a3   : > { %v550_v21 = vpop.xlane.xlu0 %549  ;;  %6395 = vrsqrt.f32 %v589_v15  ;;  %v575_v24 = vmul.f32 0.0078125, %v552_v20  ;;  %v614_v29 = vmul.f32 %v6386_v17, %v7161_v1 }
 0x1a4   : > { %v574_v25 = vmul.f32 0.0078125, %v550_v21  ;;  %6397 = vrsqrt.f32 %v588_v16  ;;  %v638_v42 = vmul.f32 %v7241_v28, %v616_v26 }
 0x1a5   : > { %v6388_v27 = vpop.eup %6387  ;;  %v591_v32 = vadd.f32 1e-05, %v575_v24  ;;  %v636_v1 = vmul.f32 %v7241_v28, %v614_v29 }
 0x1a6   : > { %v590_v33 = vadd.f32 1e-05, %v574_v25  ;;  %v6390_v34 = vpop.eup %6389  ;;  %v617_v35 = vmul.f32 %v6388_v27, %v7164_v2  ;;  %v556_v38 = vpop.xlane.xlu1 %555 }
 0x1a7   : > { %v554_v39 = vpop.xlane.xlu0 %553  ;;  %v615_v40 = vmul.f32 %v6390_v34, %v7171_v5  ;;  %6399 = vrsqrt.f32 %v591_v32  ;;  %v577_v41 = vmul.f32 0.0078125, %v556_v38 }
 0x1a8   : > { %v576_v0 = vmul.f32 0.0078125, %v554_v39  ;;  %v639_v43 = vmul.f32 %v7241_v28, %v617_v35  ;;  %6401 = vrsqrt.f32 %v590_v33 }
 0x1a9   : > { %v6392_v44 = vpop.eup %6391  ;;  %v637_v45 = vmul.f32 %v7241_v28, %v615_v40  ;;  %v593_v46 = vadd.f32 1e-05, %v577_v41 }
 0x1aa   : > { %v592_v47 = vadd.f32 1e-05, %v576_v0  ;;  %v6394_v2 = vpop.eup %6393  ;;  %v653_v48 = vpack.c.bf16 %v639_v43, %v638_v42  ;;  %v619_v49 = vmul.f32 %v6392_v44, %v7178_v8  ;;  %v560_v5 = vpop.xlane.xlu1 %559 }
 0x1ab   : > { %v558_v50 = vpop.xlane.xlu0 %557  ;;  %v652_v51 = vpack.c.bf16 %v637_v45, %v636_v1  ;;  %6403 = vrsqrt.f32 %v593_v46  ;;  %v618_v52 = vmul.f32 %v6394_v2, %v7181_v9  ;;  %v579_v53 = vmul.f32 0.0078125, %v560_v5 }
 0x1ac   : > { %6405 = vrsqrt.f32 %v592_v47  ;;  %v641_v54 = vmul.f32 %v7241_v28, %v619_v49  ;;  %v578_v55 = vmul.f32 0.0078125, %v558_v50 }
 0x1ad   : > { %v6396_v56 = vpop.eup %6395  ;;  %6178 = vmatprep.mubr.bf16.mxu0 %v652_v51  ;;  %6210 = vmatprep.mubr.bf16.mxu1 %v652_v51  ;;  %v640_v57 = vmul.f32 %v7241_v28, %v618_v52  ;;  %v595_v58 = vadd.f32 1e-05, %v579_v53 }
 0x1ae   : > { %v6398_v59 = vpop.eup %6397  ;;  %6179 = vmatmul.mubr.bf16.vlgmr.msra.gmra.mrb[0].mxu0 %v653_v48  ;;  %6211 = vmatmul.mubr.bf16.vlgmr.msra.gmra.mrb[0].mxu1 %v653_v48  ;;  %v621_v8 = vmul.f32 %v6396_v56, %v7184_v10  ;;  %v594_v60 = vadd.f32 1e-05, %v578_v55  ;;  %v564_v61 = vpop.xlane.xlu1 %563 }
 0x1af   : > { %v562_v62 = vpop.xlane.xlu0 %561  ;;  %v654_v9 = vpack.c.bf16 %v641_v54, %v640_v57  ;;  %v620_v63 = vmul.f32 %v6398_v59, %v7187_v11  ;;  %6407 = vrsqrt.f32 %v595_v58  ;;  %v581_v3 = vmul.f32 0.0078125, %v564_v61 }
 0x1b0   : > { %v643_v4 = vmul.f32 %v7241_v28, %v621_v8  ;;  %6409 = vrsqrt.f32 %v594_v60  ;;  %v580_v6 = vmul.f32 0.0078125, %v562_v62 }
 0x1b1   : > { %v6400_v7 = vpop.eup %6399  ;;  %6182 = vmatprep.mubr.bf16.mxu0 %v654_v9  ;;  %v642_v12 = vmul.f32 %v7241_v28, %v620_v63  ;;  %6214 = vmatprep.mubr.bf16.mxu1 %v654_v9  ;;  %v597_v13 = vadd.f32 1e-05, %v581_v3 }
 0x1b2   : > { %v6402_v14 = vpop.eup %6401  ;;  %v596_v10 = vadd.f32 1e-05, %v580_v6  ;;  %v623_v15 = vmul.f32 %v6400_v7, %v7194_v18  ;;  %v984_v7 = vld [vmem:[%s7135_s6 + $0x10] sm:$0xff] }
 0x1b3   : > { %v655_v16 = vpack.c.bf16 %v643_v4, %v642_v12  ;;  %6411 = vrsqrt.f32 %v597_v13  ;;  %v622_v11 = vmul.f32 %v6402_v14, %v7197_v19  ;;  %v1000_v12 = vld [vmem:[%s7141_s12 + $0x10] sm:$0xff] }
 0x1b4   : > { %6413 = vrsqrt.f32 %v596_v10  ;;  %v645_v17 = vmul.f32 %v7241_v28, %v623_v15  ;;  %v1016_v14 = vld [vmem:[%s7143_s11 + $0x10] sm:$0xff] }
 0x1b5   : > { %v6404_v20 = vpop.eup %6403  ;;  %v644_v21 = vmul.f32 %v7241_v28, %v622_v11  ;;  %v1001_v11 = vld [vmem:[%s7141_s12 + $0x18] sm:$0xff] }
 0x1b6   : > { %v6406_v24 = vpop.eup %6405  ;;  %6183 = vmatmul.mubr.bf16.gmra.mrb[4].mxu0 %v655_v16  ;;  %6215 = vmatmul.mubr.bf16.gmra.mrb[4].mxu1 %v655_v16  ;;  %v625_v25 = vmul.f32 %v6404_v20, %v7204_v22 }
 0x1b7   : > { %v656_v26 = vpack.c.bf16 %v645_v17, %v644_v21  ;;  %v624_v27 = vmul.f32 %v6406_v24, %v7207_v23  ;;  %v998_v17 = vld [vmem:[%s7141_s12] sm:$0xff] }
 0x1b8   : > { %v647_v18 = vmul.f32 %v7241_v28, %v625_v25  ;;  %v982_v24 = vld [vmem:[%s7135_s6] sm:$0xff]  ;;  %v985_v25 = vld [vmem:[%s7135_s6 + $0x18] sm:$0xff] }
 0x1b9   : > { %v6408_v29 = vpop.eup %6407  ;;  %6186 = vmatprep.mubr.bf16.mxu0 %v656_v26  ;;  %v646_v19 = vmul.f32 %v7241_v28, %v624_v27  ;;  %6218 = vmatprep.mubr.bf16.mxu1 %v656_v26 }
 0x1ba   : > { %v6410_v32 = vpop.eup %6409  ;;  %v627_v33 = vmul.f32 %v6408_v29, %v7218_v30 }
 0x1bb   : > { %v657_v34 = vpack.c.bf16 %v647_v18, %v646_v19  ;;  %v626_v35 = vmul.f32 %v6410_v32, %v7221_v31  ;;  %v1017_v32 = vld [vmem:[%s7143_s11 + $0x18] sm:$0xff] }
 0x1bc   : > { %v649_v38 = vmul.f32 %v7241_v28, %v627_v33  ;;  %v1014_v33 = vld [vmem:[%s7143_s11] sm:$0xff] }
 0x1bd   : > { %v6412_v39 = vpop.eup %6411  ;;  %v648_v22 = vmul.f32 %v7241_v28, %v626_v35 }
 0x1be   : > { %v6414_v40 = vpop.eup %6413  ;;  %6187 = vmatmul.mubr.bf16.gmra.mrb[8].mxu0 %v657_v34  ;;  %6219 = vmatmul.mubr.bf16.gmra.mrb[8].mxu1 %v657_v34  ;;  %v629_v23 = vmul.f32 %v6412_v39, %v7228_v36 }
 0x1bf   : > { %v658_v41 = vpack.c.bf16 %v649_v38, %v648_v22  ;;  %v628_v0 = vmul.f32 %v6414_v40, %v7231_v37 }
 0x1c0   : > { %v651_v42 = vmul.f32 %v7241_v28, %v629_v23 }
 0x1c1   : > { %6190 = vmatprep.mubr.bf16.mxu0 %v658_v41  ;;  %v650_v30 = vmul.f32 %v7241_v28, %v628_v0  ;;  %6222 = vmatprep.mubr.bf16.mxu1 %v658_v41  ;;  %v999_v0 = vld [vmem:[%s7141_s12 + $0x8] sm:$0xff] }
 0x1c3   : > { %v659_v31 = vpack.c.bf16 %v651_v42, %v650_v30  ;;  %v1004_v42 = vld [vmem:[%s7141_s12 + $0x30] sm:$0xff] }
 0x1c6   : > { %6191 = vmatmul.mubr.bf16.gmra.mrb[12].mxu0 %v659_v31  ;;  %6223 = vmatmul.mubr.bf16.gmra.mrb[12].mxu1 %v659_v31 }
 0x281   : > { %v7274_v43 = vpop.f32.mrb[0].mxu0  ;;  %v7276_v44 = vpop.f32.mrb[0].mxu1 }
 0x282   : > { %v7278_v1 = vpop.f32.mrb[1].mxu1  ;;  %1066 = vrot.lane.b32.xlu0 %v7274_v43, %s6709_s24  ;;  %1034 = vrot.lane.b32.xlu1 %v7274_v43, %s6710_s7  ;;  %v7284_v36 = vpop.f32.mrb[1].mxu0  ;;  %v1096_v15 = vmul.f32 %v7274_v43, %v984_v7  ;;  %v983_v43 = vld [vmem:[%s7135_s6 + $0x8] sm:$0xff] }
 0x283   : > { %v7286_v37 = vpop.f32.mrb[2].mxu0  ;;  %v7288_v28 = vpop.f32.mrb[2].mxu1  ;;  %v1094_v34 = vmul.f32 %v982_v24, %v7284_v36 }
 0x284   : > { %v7290_v45 = vpop.f32.mrb[3].mxu0  ;;  %v7292_v46 = vpop.f32.mrb[3].mxu1  ;;  %v1097_v35 = vmul.f32 %v7286_v37, %v985_v25 }
 0x286   : > { %1030 = vrot.lane.b32.xlu0 %v7284_v36, %s6710_s7  ;;  %1036 = vrot.lane.b32.xlu1 %v7286_v37, %s6710_s7 }
 0x289   : > { %v7298_v47 = vpop.f32.mrb[4].mxu0  ;;  %v7300_v2 = vpop.f32.mrb[4].mxu1 }
 0x28a   : > { %1062 = vrot.lane.b32.xlu0 %v7284_v36, %s6709_s24  ;;  %1068 = vrot.lane.b32.xlu1 %v7286_v37, %s6709_s24  ;;  %v7306_v48 = vpop.f32.mrb[5].mxu0  ;;  %v7308_v49 = vpop.f32.mrb[5].mxu1  ;;  %v988_v36 = vld [vmem:[%s7135_s6 + $0x30] sm:$0xff] }
 0x28b   : > { %v7310_v5 = vpop.f32.mrb[6].mxu1  ;;  %v7312_v50 = vpop.f32.mrb[6].mxu0 }
 0x28c   : > { %v7314_v51 = vpop.f32.mrb[7].mxu0  ;;  %v7316_v52 = vpop.f32.mrb[7].mxu1 }
 0x28e   : > { %1032 = vrot.lane.b32.xlu1 %v7290_v45, %s6710_s7  ;;  %1042 = vrot.lane.b32.xlu0 %v7298_v47, %s6710_s7 }
 0x291   : > { %v7322_v53 = vpop.f32.mrb[8].mxu0  ;;  %v7324_v54 = vpop.f32.mrb[8].mxu1 }
 0x292   : > { %1064 = vrot.lane.b32.xlu1 %v7290_v45, %s6709_s24  ;;  %1074 = vrot.lane.b32.xlu0 %v7298_v47, %s6709_s24  ;;  %v7330_v55 = vpop.f32.mrb[9].mxu0  ;;  %v7332_v56 = vpop.f32.mrb[9].mxu1 }
 0x293   : > { %v7334_v57 = vpop.f32.mrb[10].mxu1  ;;  %v7336_v58 = vpop.f32.mrb[10].mxu0 }
 0x294   : > { %v7338_v59 = vpop.f32.mrb[11].mxu0  ;;  %v7340_v8 = vpop.f32.mrb[11].mxu1 }
 0x296   : > { %1038 = vrot.lane.b32.xlu0 %v7306_v48, %s6710_s7  ;;  %1044 = vrot.lane.b32.xlu1 %v7312_v50, %s6710_s7 }
 0x299   : > { %v7346_v60 = vpop.f32.mrb[12].mxu0  ;;  %v7348_v61 = vpop.f32.mrb[12].mxu1 }
 0x29a   : > { %1070 = vrot.lane.b32.xlu0 %v7306_v48, %s6709_s24  ;;  %1076 = vrot.lane.b32.xlu1 %v7312_v50, %s6709_s24  ;;  %v7354_v62 = vpop.f32.mrb[13].mxu0  ;;  %v7356_v9 = vpop.f32.mrb[13].mxu1 }
 0x29b   : > { %v7358_v63 = vpop.f32.mrb[14].mxu1  ;;  %v7360_v3 = vpop.f32.mrb[14].mxu0 }
 0x29c   : > { %v7362_v4 = vpop.f32.mrb[15].mxu0  ;;  %v7364_v6 = vpop.f32.mrb[15].mxu1 }
 0x29e   : > { %1040 = vrot.lane.b32.xlu1 %v7314_v51, %s6710_s7  ;;  %1050 = vrot.lane.b32.xlu0 %v7322_v53, %s6710_s7 }
 0x2a2   : > { %1072 = vrot.lane.b32.xlu1 %v7314_v51, %s6709_s24  ;;  %1082 = vrot.lane.b32.xlu0 %v7322_v53, %s6709_s24 }
 0x2a6   : > { %1046 = vrot.lane.b32.xlu0 %v7330_v55, %s6710_s7  ;;  %1052 = vrot.lane.b32.xlu1 %v7336_v58, %s6710_s7 }
 0x2aa   : > { %1078 = vrot.lane.b32.xlu0 %v7330_v55, %s6709_s24  ;;  %1084 = vrot.lane.b32.xlu1 %v7336_v58, %s6709_s24 }
 0x2ae   : > { %1048 = vrot.lane.b32.xlu1 %v7338_v59, %s6710_s7  ;;  %1058 = vrot.lane.b32.xlu0 %v7346_v60, %s6710_s7 }
 0x2b2   : > { %1080 = vrot.lane.b32.xlu1 %v7338_v59, %s6709_s24  ;;  %1090 = vrot.lane.b32.xlu0 %v7346_v60, %s6709_s24 }
 0x2b6   : > { %1054 = vrot.lane.b32.xlu0 %v7354_v62, %s6710_s7  ;;  %1060 = vrot.lane.b32.xlu1 %v7360_v3, %s6710_s7 }
 0x2ba   : > { %1086 = vrot.lane.b32.xlu0 %v7354_v62, %s6709_s24  ;;  %1092 = vrot.lane.b32.xlu1 %v7360_v3, %s6709_s24 }
 0x2be   : > { %3271 = vrot.lane.b32.xlu0 %v7278_v1, %s6711_s26  ;;  %1056 = vrot.lane.b32.xlu1 %v7362_v4, %s6710_s7 }
 0x2c2   : > { %3275 = vrot.lane.b32.xlu0 %v7276_v44, %s6711_s26  ;;  %1088 = vrot.lane.b32.xlu1 %v7362_v4, %s6709_s24 }
 0x2c6   : > { %3279 = vrot.lane.b32.xlu0 %v7308_v49, %s6711_s26  ;;  %3273 = vrot.lane.b32.xlu1 %v7292_v46, %s6711_s26 }
 0x2ca   : > { %3283 = vrot.lane.b32.xlu0 %v7300_v2, %s6711_s26  ;;  %3277 = vrot.lane.b32.xlu1 %v7288_v28, %s6711_s26 }
 0x2ce   : > { %3287 = vrot.lane.b32.xlu0 %v7332_v56, %s6711_s26  ;;  %3281 = vrot.lane.b32.xlu1 %v7316_v52, %s6711_s26 }
 0x2d2   : > { %3291 = vrot.lane.b32.xlu0 %v7324_v54, %s6711_s26  ;;  %3285 = vrot.lane.b32.xlu1 %v7310_v5, %s6711_s26 }
 0x2d6   : > { %3295 = vrot.lane.b32.xlu0 %v7356_v9, %s6711_s26  ;;  %3289 = vrot.lane.b32.xlu1 %v7340_v8, %s6711_s26 }
 0x2da   : > { %3293 = vrot.lane.b32.xlu1 %v7334_v57, %s6711_s26 }
 0x2de   : > { %3297 = vrot.lane.b32.xlu1 %v7364_v6, %s6711_s26 }
 0x2f4   : > { %v1035_v13 = vpop.permute.xlu1 %1034  ;;  %v1067_v10 = vpop.permute.xlu0 %1066 }
 0x2f5   : > { %v1112_v16 = vmul.f32 %v1035_v13, %v1000_v12  ;;  %v1144_v21 = vmul.f32 %v1067_v10, %v1016_v14  ;;  %v1015_v14 = vld [vmem:[%s7143_s11 + $0x8] sm:$0xff]  ;;  %v1020_v10 = vld [vmem:[%s7143_s11 + $0x30] sm:$0xff] }
 0x2f7   : > { %v1128_v20 = vadd.f32 %v1112_v16, %v1096_v15  ;;  %v1095_v15 = vmul.f32 %v983_v43, %v7290_v45  ;;  %v1100_v16 = vmul.f32 %v7298_v47, %v988_v36  ;;  %v986_v45 = vld [vmem:[%s7135_s6 + $0x20] sm:$0xff] }
 0x2f8   : > { %v1037_v26 = vpop.permute.xlu1 %1036  ;;  %v1031_v27 = vpop.permute.xlu0 %1030 }
 0x2f9   : > { %v7438_v18 = vadd.f32 %v1144_v21, %v1128_v20  ;;  %v1113_v29 = vmul.f32 %v1037_v26, %v1001_v11  ;;  %v1110_v19 = vmul.f32 %v1031_v27, %v998_v17  ;;  %v6712_v26 = vmov 1983009808  }
 0x2fa   : > { %v1240_v27 = vunpack.c.l.s4 %v6712_v26 }
 0x2fb   : > { %1194 = vrot.lane.b32.xlu0 %v7438_v18, %s6711_s26  ;;  %v1129_v22 = vadd.f32 %v1113_v29, %v1097_v35  ;;  %v1126_v40 = vadd.f32 %v1110_v19, %v1094_v34  ;;  %v1242_v29 = vlaneseq  ;;  %v1005_v19 = vld [vmem:[%s7141_s12 + $0x38] sm:$0xff] }
 0x2fc   : > { %v1069_v38 = vpop.permute.xlu1 %1068  ;;  %v1063_v39 = vpop.permute.xlu0 %1062  ;;  %v989_v35 = vld [vmem:[%s7135_s6 + $0x38] sm:$0xff] }
 0x2fd   : > { %v1145_v23 = vmul.f32 %v1069_v38, %v1017_v32  ;;  %v1142_v41 = vmul.f32 %v1063_v39, %v1014_v33  ;;  %v1002_v32 = vld [vmem:[%s7141_s12 + $0x20] sm:$0xff]  ;;  %v1101_v43 = vmul.f32 %v7312_v50, %v989_v35 }
 0x2ff   : > { %v7448_v30 = vadd.f32 %v1145_v23, %v1129_v22  ;;  %v7450_v31 = vadd.f32 %v1142_v41, %v1126_v40  ;;  %v1241_v40 = vunpack.c.0.s8 %v1240_v27  ;;  %v7472_v23 = vshrl.u32 %v1242_v29, 7  ;;  %v1021_v41 = vld [vmem:[%s7143_s11 + $0x38] sm:$0xff] }
 0x300   : > { %v1033_v37 = vpop.permute.xlu1 %1032  ;;  %v1043_v7 = vpop.permute.xlu0 %1042 }
 0x301   : > { %v1111_v12 = vmul.f32 %v1033_v37, %v999_v0  ;;  %v1116_v13 = vmul.f32 %v1043_v7, %v1004_v42  ;;  %1196 = vrot.lane.b32.xlu1 %v7448_v30, %s6711_s26  ;;  %1190 = vrot.lane.b32.xlu0 %v7450_v31, %s6711_s26  ;;  %v1018_v0 = vld [vmem:[%s7143_s11 + $0x20] sm:$0xff]  ;;  %v1098_v42 = vmul.f32 %v986_v45, %v7306_v48 }
 0x303   : > { %v1127_v20 = vadd.f32 %v1111_v12, %v1095_v15  ;;  %v1132_v21 = vadd.f32 %v1116_v13, %v1100_v16  ;;  %v1003_v15 = vld [vmem:[%s7141_s12 + $0x28] sm:$0xff]  ;;  %v1008_v16 = vld [vmem:[%s7141_s12 + $0x50] sm:$0xff] }
 0x304   : > { %v1065_v11 = vpop.permute.xlu1 %1064  ;;  %v1075_v17 = vpop.permute.xlu0 %1074 }
 0x305   : > { %v1143_v24 = vmul.f32 %v1065_v11, %v1015_v14  ;;  %v1148_v25 = vmul.f32 %v1075_v17, %v1020_v10  ;;  %v7481_v10 = vsub.s32 %v1241_v40, %v7472_v23  ;;  %v8652_v11 = vmov 0.0  }
 0x306   : > { %v3451_v17 = vcombine.high %v7276_v44, %v8652_v11  ;;  %v3517_v45 = vcombine.high %v7288_v28, %v8652_v11  ;;  %v3385_v35 = vcombine.high %v7292_v46, %v8652_v11 }
 0x307   : > { %v7464_v33 = vadd.f32 %v1143_v24, %v1127_v20  ;;  %v7466_v34 = vadd.f32 %v1148_v25, %v1132_v21  ;;  %v3319_v20 = vcombine.high %v7278_v1, %v8652_v11  ;;  %v987_v21 = vld [vmem:[%s7135_s6 + $0x28] sm:$0xff]  ;;  %v992_v24 = vld [vmem:[%s7135_s6 + $0x50] sm:$0xff] }
 0x308   : > { %v1045_v47 = vpop.permute.xlu1 %1044  ;;  %v1039_v38 = vpop.permute.xlu0 %1038 }
 0x309   : > { %v1117_v39 = vmul.f32 %v1045_v47, %v1005_v19  ;;  %v1114_v22 = vmul.f32 %v1039_v38, %v1002_v32  ;;  %1192 = vrot.lane.b32.xlu1 %v7464_v33, %s6711_s26  ;;  %1202 = vrot.lane.b32.xlu0 %v7466_v34, %s6711_s26  ;;  %v7499_v19 = vrot.slane %v7276_v44, %v7481_v10  ;;  %v1019_v47 = vld [vmem:[%s7143_s11 + $0x28] sm:$0xff]  ;;  %v1024_v38 = vld [vmem:[%s7143_s11 + $0x50] sm:$0xff] }
 0x30a   : > { %v7503_v32 = vrot.slane %v7278_v1, %v7481_v10  ;;  %v7518_v44 = vrot.slane %v7288_v28, %v7481_v10  ;;  %v1099_v1 = vmul.f32 %v987_v21, %v7314_v51  ;;  %v7523_v40 = vrot.slane %v3319_v20, %v7481_v10  ;;  %v990_v20 = vld [vmem:[%s7135_s6 + $0x40] sm:$0xff] }
 0x30b   : > { %v1133_v7 = vadd.f32 %v1117_v39, %v1101_v43  ;;  %v1130_v12 = vadd.f32 %v1114_v22, %v1098_v42  ;;  %v7514_v39 = vrot.slane %v3451_v17, %v7481_v10  ;;  %v1104_v22 = vmul.f32 %v7322_v53, %v992_v24 }
 0x30c   : > { %v1077_v36 = vpop.permute.xlu1 %1076  ;;  %v1071_v37 = vpop.permute.xlu0 %1070  ;;  %v3583_v28 = vcombine.high %v7308_v49, %v8652_v11  ;;  %v7551_v17 = vrot.slane %v7308_v49, %v7481_v10  ;;  %v3847_v49 = vcombine.high %v7332_v56, %v8652_v11 }
 0x30d   : > { %v1149_v13 = vmul.f32 %v1077_v36, %v1021_v41  ;;  %v1146_v14 = vmul.f32 %v1071_v37, %v1018_v0  ;;  %v7527_v41 = vrot.slane %v7292_v46, %v7481_v10  ;;  %v3715_v0 = vcombine.high %v7300_v2, %v8652_v11 }
 0x30e   : > { %v7537_v46 = vrot.slane %v3385_v35, %v7481_v10  ;;  %v7571_v35 = vrot.slane %v3583_v28, %v7481_v10  ;;  %v1102_v28 = vmul.f32 %v990_v20, %v7330_v55  ;;  %v7606_v55 = vrot.slane %v3847_v49, %v7481_v10 }
 0x30f   : > { %v7487_v48 = vadd.f32 %v1149_v13, %v1133_v7  ;;  %v7489_v50 = vadd.f32 %v1146_v14, %v1130_v12  ;;  %v7534_v7 = vrot.slane %v3517_v45, %v7481_v10  ;;  %v3781_v12 = vcombine.high %v7310_v5, %v8652_v11  ;;  %v1009_v14 = vld [vmem:[%s7141_s12 + $0x58] sm:$0xff] }
 0x310   : > { %v1041_v25 = vpop.permute.xlu1 %1040  ;;  %v1051_v26 = vpop.permute.xlu0 %1050  ;;  %v3649_v13 = vcombine.high %v7316_v52, %v8652_v11  ;;  %v7618_v49 = vrot.slane %v7340_v8, %v7481_v10 }
 0x311   : > { %v1115_v27 = vmul.f32 %v1041_v25, %v1003_v15  ;;  %v1120_v29 = vmul.f32 %v1051_v26, %v1008_v16  ;;  %1204 = vrot.lane.b32.xlu1 %v7487_v48, %s6711_s26  ;;  %1198 = vrot.lane.b32.xlu0 %v7489_v50, %s6711_s26  ;;  %v1006_v15 = vld [vmem:[%s7141_s12 + $0x40] sm:$0xff]  ;;  %v7547_v16 = vrot.slane %v7300_v2, %v7481_v10 }
 0x312   : > { %v7559_v25 = vrot.slane %v3715_v0, %v7481_v10  ;;  %v7563_v26 = vrot.slane %v7310_v5, %v7481_v10  ;;  %v3979_v2 = vcombine.high %v7324_v54, %v8652_v11  ;;  %v7587_v0 = vrot.slane %v7324_v54, %v7481_v10 }
 0x313   : > { %v1131_v43 = vadd.f32 %v1115_v27, %v1099_v1  ;;  %v1136_v36 = vadd.f32 %v1120_v29, %v1104_v22  ;;  %v993_v27 = vld [vmem:[%s7135_s6 + $0x58] sm:$0xff]  ;;  %v7580_v1 = vrot.slane %v3781_v12, %v7481_v10  ;;  %v7583_v22 = vrot.slane %v3649_v13, %v7481_v10 }
 0x314   : > { %v1073_v42 = vpop.permute.xlu1 %1072  ;;  %v1083_v51 = vpop.permute.xlu0 %1082  ;;  %8719 = vst [vmem:[#allocation30_spill] sm:$0xff] %v7587_v0  ;;  %v7603_v54 = vrot.slane %v3979_v2, %v7481_v10 }
 0x315   : > { %v1147_v53 = vmul.f32 %v1073_v42, %v1019_v47  ;;  %v1152_v37 = vmul.f32 %v1083_v51, %v1024_v38  ;;  %v7575_v47 = vrot.slane %v7316_v52, %v7481_v10  ;;  %v1025_v52 = vld [vmem:[%s7143_s11 + $0x58] sm:$0xff]  ;;  %v1022_v42 = vld [vmem:[%s7143_s11 + $0x40] sm:$0xff]  ;;  %v7596_v51 = vrot.slane %v7332_v56, %v7481_v10 }
 0x316   : > { %8720 = vst [vmem:[#allocation31_spill] sm:$0xff] %v7603_v54  ;;  %v3913_v56 = vcombine.high %v7340_v8, %v8652_v11  ;;  %v6714_v54 = vmov 1934713408  }
 0x317   : > { %v7554_v21 = vadd.f32 %v1147_v53, %v1131_v43  ;;  %v7556_v24 = vadd.f32 %v1152_v37, %v1136_v36  ;;  %v4045_v43 = vcombine.high %v7334_v57, %v8652_v11  ;;  %v1105_v36 = vmul.f32 %v7336_v58, %v993_v27  ;;  %v991_v53 = vld [vmem:[%s7135_s6 + $0x48] sm:$0xff]  ;;  %v996_v58 = vld [vmem:[%s7135_s6 + $0x70] sm:$0xff] }
 0x318   : > { %v1053_v29 = vpop.permute.xlu1 %1052  ;;  %v1047_v45 = vpop.permute.xlu0 %1046  ;;  %v7610_v37 = vrot.slane %v7334_v57, %v7481_v10  ;;  %v1103_v2 = vmul.f32 %v991_v53, %v7338_v59  ;;  %v4243_v57 = vcombine.high %v7348_v61, %v8652_v11  ;;  %v1271_v0 = vunpack.c.l.s4 %v6714_v54  ;;  %v995_v53 = vld [vmem:[%s7135_s6 + $0x68] sm:$0xff] }
 0x319   : > { %v1121_v5 = vmul.f32 %v1053_v29, %v1009_v14  ;;  %v1118_v38 = vmul.f32 %v1047_v45, %v1006_v15  ;;  %1200 = vrot.lane.b32.xlu1 %v7554_v21, %s6711_s26  ;;  %1210 = vrot.lane.b32.xlu0 %v7556_v24, %s6711_s26  ;;  %v994_v29 = vld [vmem:[%s7135_s6 + $0x60] sm:$0xff]  ;;  %v1007_v45 = vld [vmem:[%s7141_s12 + $0x48] sm:$0xff]  ;;  %v4111_v59 = vcombine.high %v7356_v9, %v8652_v11 }
 0x31a   : > { %8721 = vst [vmem:[#allocation32_spill] sm:$0xff] %v7610_v37  ;;  %v1012_v37 = vld [vmem:[%s7141_s12 + $0x70] sm:$0xff]  ;;  %v7635_v8 = vrot.slane %v3913_v56, %v7481_v10  ;;  %v7651_v56 = vrot.slane %v7356_v9, %v7481_v10  ;;  %v1023_v9 = vld [vmem:[%s7143_s11 + $0x48] sm:$0xff] }
 0x31b   : > { %v1137_v14 = vadd.f32 %v1121_v5, %v1105_v36  ;;  %v1134_v15 = vadd.f32 %v1118_v38, %v1102_v28  ;;  %v7626_v5 = vrot.slane %v4045_v43, %v7481_v10  ;;  %v4309_v43 = vcombine.high %v7358_v63, %v8652_v11  ;;  %v997_v36 = vld [vmem:[%s7135_s6 + $0x78] sm:$0xff]  ;;  %s8770_s6 = sld [smem:[#allocation57_spill]] (%p8767_p3) }
 0x31c   : > { %v1085_v12 = vpop.permute.xlu1 %1084  ;;  %v1079_v13 = vpop.permute.xlu0 %1078 }
 0x31d   : > { %v1153_v20 = vmul.f32 %v1085_v12, %v1025_v52  ;;  %v1150_v27 = vmul.f32 %v1079_v13, %v1022_v42  ;;  %8722 = vst [vmem:[#allocation33_spill] sm:$0xff] %v7626_v5  ;;  %v1108_v52 = vmul.f32 %v7346_v60, %v996_v58  ;;  %v7640_v42 = vrot.slane %v7348_v61, %v7481_v10 }
 0x31e   : > { %v7647_v13 = vmul.f32 %v994_v29, %v7354_v62  ;;  %v4177_v62 = vcombine.high %v7364_v6, %v8652_v11  ;;  %v7673_v29 = vmul.f32 %v995_v53, %v7362_v4  ;;  %v7700_v5 = vrot.slane %v7438_v18, %v7481_v10 }
 0x31f   : > { %v7630_v38 = vadd.f32 %v1153_v20, %v1137_v14  ;;  %v7632_v28 = vadd.f32 %v1150_v27, %v1134_v15  ;;  %8723 = vst [vmem:[#allocation34_spill] sm:$0xff] %v7640_v42  ;;  %v7656_v14 = vrot.slane %v4243_v57, %v7481_v10  ;;  %v7660_v15 = vrot.slane %v7358_v63, %v7481_v10  ;;  %v1028_v20 = vld [vmem:[%s7143_s11 + $0x70] sm:$0xff] }
 0x320   : > { %v1049_v54 = vpop.permute.xlu1 %1048  ;;  %v1059_v12 = vpop.permute.xlu0 %1058  ;;  %v1272_v27 = vunpack.c.0.s8 %v1271_v0  ;;  %v1109_v57 = vmul.f32 %v7360_v3, %v997_v36  ;;  %v1436_v0 = vcombine.high %v7448_v30, %v8652_v11  ;;  %v1238_v3 = vcombine.high %v7450_v31, %v8652_v11 }
 0x321   : > { %v1119_v60 = vmul.f32 %v1049_v54, %v1007_v45  ;;  %v1124_v58 = vmul.f32 %v1059_v12, %v1012_v37  ;;  %1212 = vrot.lane.b32.xlu1 %v7630_v38, %s6711_s26  ;;  %8724 = vst [vmem:[#allocation35_spill] sm:$0xff] %v7656_v14  ;;  %8725 = vst [vmem:[#allocation36_spill] sm:$0xff] %v7660_v15  ;;  %1206 = vrot.lane.b32.xlu0 %v7632_v28, %s6711_s26 }
 0x322   : > { %v7669_v37 = vrot.slane %v4111_v59, %v7481_v10  ;;  %v1370_v45 = vcombine.high %v7438_v18, %v8652_v11  ;;  %v7678_v54 = vrot.slane %v4309_v43, %v7481_v10  ;;  %v7682_v12 = vrot.slane %v7364_v6, %v7481_v10  ;;  %v1013_v6 = vld [vmem:[%s7141_s12 + $0x78] sm:$0xff] }
 0x323   : > { %v1135_v4 = vadd.f32 %v1119_v60, %v1103_v2  ;;  %v1140_v53 = vadd.f32 %v1124_v58, %v1108_v52  ;;  %v7689_v42 = vrot.slane %v4177_v62, %v7481_v10  ;;  %v1304_v43 = vcombine.high %v7464_v33, %v8652_v11 }
 0x324   : > { %8726 = vst [vmem:[#allocation37_spill] sm:$0xff] %v7678_v54  ;;  %8727 = vst [vmem:[#allocation38_spill] sm:$0xff] %v7682_v12  ;;  %v1081_v59 = vpop.permute.xlu1 %1080  ;;  %v1091_v36 = vpop.permute.xlu0 %1090  ;;  %v1010_v54 = vld [vmem:[%s7141_s12 + $0x60] sm:$0xff]  ;;  %v7696_v12 = vsub.s32 %v1272_v27, %v7472_v23  ;;  %v1634_v2 = vcombine.high %v7466_v34, %v8652_v11  ;;  %v7705_v58 = vrot.slane %v1370_v45, %v7481_v10 }
 0x325   : > { %v1151_v15 = vmul.f32 %v1081_v59, %v1023_v9  ;;  %v1156_v14 = vmul.f32 %v1091_v36, %v1028_v20  ;;  %v1700_v62 = vcombine.high %v7487_v48, %v8652_v11  ;;  %v1502_v23 = vcombine.high %v7489_v50, %v8652_v11 }
 0x326   : > { %v7713_v18 = vrot.slane %v7448_v30, %v7481_v10  ;;  %v7721_v45 = vrot.slane %v1436_v0, %v7481_v10  ;;  %v7724_v59 = vrot.slane %v1238_v3, %v7481_v10  ;;  %v1568_v36 = vcombine.high %v7554_v21, %v8652_v11  ;;  %v1029_v30 = vld [vmem:[%s7143_s11 + $0x78] sm:$0xff] }
 0x327   : > { %v1167_v52 = vadd.f32 %v1151_v15, %v1135_v4  ;;  %v1172_v60 = vadd.f32 %v1156_v14, %v1140_v53  ;;  %v7717_v15 = vrot.slane %v7450_v31, %v7481_v10  ;;  %v1026_v4 = vld [vmem:[%s7143_s11 + $0x60] sm:$0xff]  ;;  %v7733_v31 = vrot.slane %v7464_v33, %v7481_v10 }
 0x328   : > { %v1061_v9 = vpop.permute.xlu1 %1060  ;;  %v1055_v20 = vpop.permute.xlu0 %1054  ;;  %8728 = vst [vmem:[#allocation39_spill] sm:$0xff] %v7724_v59  ;;  %v7740_v0 = vrot.slane %v7466_v34, %v7481_v10  ;;  %v1898_v3 = vcombine.high %v7556_v24, %v8652_v11  ;;  %v7745_v53 = vrot.slane %v1634_v2, %v7481_v10  ;;  %v7753_v33 = vrot.slane %v7489_v50, %v7481_v10 }
 0x329   : > { %v1125_v14 = vmul.f32 %v1061_v9, %v1013_v6  ;;  %v1122_v27 = vmul.f32 %v1055_v20, %v1010_v54  ;;  %1208 = vrot.lane.b32.xlu1 %v1167_v52, %s6711_s26  ;;  %1218 = vrot.lane.b32.xlu0 %v1172_v60, %s6711_s26  ;;  %8729 = vst [vmem:[#allocation40_spill] sm:$0xff] %v7733_v31 }
 0x32a   : > { %v7736_v54 = vrot.slane %v1304_v43, %v7481_v10  ;;  %8731 = vst [vmem:[#allocation42_spill] sm:$0xff] %v7740_v0  ;;  %8732 = vst [vmem:[#allocation43_spill] sm:$0xff] %v7745_v53  ;;  %v7749_v6 = vrot.slane %v7487_v48, %v7481_v10  ;;  %v1964_v43 = vcombine.high %v7630_v38, %v8652_v11 }
 0x32b   : > { %8734 = vst [vmem:[#allocation45_spill] sm:$0xff] %v7753_v33  ;;  %v1766_v34 = vcombine.high %v7632_v28, %v8652_v11  ;;  %v7760_v0 = vrot.slane %v1700_v62, %v7481_v10  ;;  %v7763_v2 = vrot.slane %v1502_v23, %v7481_v10  ;;  %v1141_v48 = vadd.f32 %v1125_v14, %v1109_v57 }
 0x32c   : > { %8730 = vst [vmem:[#allocation41_spill] sm:$0xff] %v7736_v54  ;;  %8733 = vst [vmem:[#allocation44_spill] sm:$0xff] %v7749_v6  ;;  %v1093_v9 = vpop.permute.xlu1 %1092  ;;  %v1087_v20 = vpop.permute.xlu0 %1086  ;;  %v1138_v6 = vadd.f32 %v1122_v27, %v7647_v13  ;;  %v1832_v33 = vcombine.high %v1167_v52, %v8652_v11  ;;  %v1011_v54 = vld [vmem:[%s7141_s12 + $0x68] sm:$0xff]  ;;  %v7770_v31 = vrot.slane %v7554_v21, %v7481_v10  ;;  %s5350_s12 = scalar_lea.vmem (%p8767_p3), %s8770_s6, %s6057_s1 }
 0x32d   : > { %v1157_v53 = vmul.f32 %v1093_v9, %v1029_v30  ;;  %v1154_v50 = vmul.f32 %v1087_v20, %v1026_v4  ;;  %v7773_v59 = vrot.slane %v1568_v36, %v7481_v10  ;;  %v7777_v62 = vrot.slane %v7556_v24, %v7481_v10 }
 0x32e   : > { %v2162_v57 = vcombine.high %v1172_v60, %v8652_v11  ;;  %v7781_v14 = vrot.slane %v1898_v3, %v7481_v10  ;;  %v7785_v21 = vrot.slane %v7630_v38, %v7481_v10  ;;  %v7788_v36 = vrot.slane %v1964_v43, %v7481_v10 }
 0x32f   : > { %v1173_v23 = vadd.f32 %v1157_v53, %v1141_v48  ;;  %v1170_v13 = vadd.f32 %v1154_v50, %v1138_v6  ;;  %v7792_v24 = vrot.slane %v7632_v28, %v7481_v10  ;;  %v7795_v4 = vrot.slane %v1766_v34, %v7481_v10  ;;  %v1027_v28 = vld [vmem:[%s7143_s11 + $0x68] sm:$0xff] }
 0x330   : > { %v1057_v27 = vpop.permute.xlu1 %1056  ;;  %v3272_v30 = vpop.permute.xlu0 %3271  ;;  %v7801_v38 = vrot.slane %v1167_v52, %v7481_v10  ;;  %v7808_v34 = vrot.slane %v1832_v33, %v7481_v10  ;;  %v7811_v20 = vrot.slane %v1172_v60, %v7481_v10  ;;  %v7815_v48 = vrot.slane %v2162_v57, %v7481_v10 }
 0x331   : > { %v2228_v53 = vcombine.high %v1173_v23, %v8652_v11  ;;  %v1123_v3 = vmul.f32 %v1057_v27, %v1011_v54  ;;  %v3334_v6 = vcombine.high %v3272_v30, %v8652_v11  ;;  %1220 = vrot.lane.b32.xlu1 %v1173_v23, %s6711_s26  ;;  %v2030_v43 = vcombine.high %v1170_v13, %v8652_v11 }
 0x332   : > { %v3341_v9 = vrot.slane %v3272_v30, %v7481_v10  ;;  %1214 = vrot.lane.b32.xlu0 %v1170_v13, %s6711_s26  ;;  %8735 = vst [vmem:[#allocation46_spill] sm:$0xff] %v7811_v20  ;;  %8736 = vst [vmem:[#allocation47_spill] sm:$0xff] %v7815_v48  ;;  %v7818_v52 = vrot.slane %v1173_v23, %v7481_v10  ;;  %v7821_v50 = vrot.slane %v1170_v13, %v7481_v10 }
 0x333   : > { %v3348_v54 = vrot.slane %v3334_v6, %v7481_v10  ;;  %v1139_v27 = vadd.f32 %v1123_v3, %v7673_v29  ;;  %v7827_v20 = vrot.slane %v2228_v53, %v7481_v10 }
 0x334   : > { %8737 = vst [vmem:[#allocation48_spill] sm:$0xff] %v7818_v52  ;;  %8738 = vst [vmem:[#allocation49_spill] sm:$0xff] %v7821_v50  ;;  %v3349_v30 = vcombine.low %v7503_v32, %v3341_v9  ;;  %v3350_v33 = vcombine.high %v7503_v32, %v3341_v9  ;;  %v1089_v11 = vpop.permute.xlu1 %1088  ;;  %v3276_v60 = vpop.permute.xlu0 %3275  ;;  %v8739_v52 = vmov 0.0   ;;  %v7838_v32 = vrot.slane %v2030_v43, %v7481_v10 }
 0x335   : > { %v3365_v57 = vcombine.low %v7523_v40, %v3348_v54  ;;  %v3366_v6 = vcombine.high %v7523_v40, %v3348_v54  ;;  %v1155_v23 = vmul.f32 %v1089_v11, %v1027_v28  ;;  %v3466_v48 = vcombine.high %v3276_v60, %v8739_v52 }
 0x336   : > { %v3357_v13 = vrot.slane %v3349_v30, %v7696_v12  ;;  %v3364_v29 = vrot.slane %v3350_v33, %v7696_v12  ;;  %v3473_v3 = vrot.slane %v3276_v60, %v7481_v10  ;;  %3299 = vrot.lane.b32.xlu0 %v7348_v61, %s6711_s26  ;;  %8740 = vst [vmem:[#allocation50_spill] sm:$0xff] %v7838_v32 }
 0x337   : > { %v3373_v53 = vrot.slane %v3365_v57, %v7696_v12  ;;  %v3380_v9 = vrot.slane %v3366_v6, %v7696_v12  ;;  %v7842_v40 = vadd.f32 %v1155_v23, %v1139_v27  ;;  %v3480_v11 = vrot.slane %v3466_v48, %v7481_v10 }
 0x338   : > { %v4375_v28 = vcombine.low %v3357_v13, %v3364_v29  ;;  %v5989_v54 = vcombine.high %v3357_v13, %v3364_v29  ;;  %v3481_v30 = vcombine.low %v7499_v19, %v3473_v3  ;;  %v3482_v33 = vcombine.high %v7499_v19, %v3473_v3  ;;  %v3274_v57 = vpop.permute.xlu1 %3273  ;;  %v3280_v23 = vpop.permute.xlu0 %3279 }
 0x339   : > { %8741 = vst [vmem:[#allocation51_spill] sm:$0xff] %v7842_v40  ;;  %v4391_v60 = vcombine.low %v3373_v53, %v3380_v9  ;;  %v5990_v50 = vcombine.high %v3373_v53, %v3380_v9  ;;  %v7849_v61 = vcombine.high %v7842_v40, %v8739_v52  ;;  %v3497_v43 = vcombine.low %v7514_v39, %v3480_v11 }
 0x33a   : > { %1216 = vrot.lane.b32.xlu1 %v7842_v40, %s6711_s26  ;;  %v4382_v48 = vrot.slane %v4375_v28, %v7481_v10  ;;  %v4390_v27 = vrot.slane %v5989_v54, %v7481_v10  ;;  %v3489_v6 = vrot.slane %v3481_v30, %v7696_v12  ;;  %v3496_v19 = vrot.slane %v3482_v33, %v7696_v12 }
 0x33b   : > { %8742 = vst [vmem:[#allocation52_spill] sm:$0xff] %v7849_v61  ;;  %v4398_v13 = vrot.slane %v4391_v60, %v7481_v10  ;;  %v4406_v29 = vrot.slane %v5990_v50, %v7481_v10  ;;  %v3498_v3 = vcombine.high %v7514_v39, %v3480_v11  ;;  %v3505_v53 = vrot.slane %v3497_v43, %v7696_v12 }
 0x33c   : > { %v4407_v9 = vcombine.low %v4382_v48, %v4390_v27  ;;  %v4475_v61 = vcombine.low %v3489_v6, %v3496_v19  ;;  %v5993_v40 = vcombine.high %v3489_v6, %v3496_v19  ;;  %v3400_v28 = vcombine.high %v3274_v57, %v8739_v52 }
 0x33d   : > { %v4415_v32 = vcombine.low %v4398_v13, %v4406_v29  ;;  %v3512_v54 = vrot.slane %v3498_v3, %v7696_v12  ;;  %v3407_v30 = vrot.slane %v3274_v57, %v7481_v10  ;;  %v3598_v33 = vcombine.high %v3280_v23, %v8739_v52 }
 0x33e   : > { %3301 = vrot.lane.b32.xlu1 %v7358_v63, %s6711_s26  ;;  %v4414_v50 = vrot.slane %v4407_v9, %v7696_v12  ;;  %v4482_v39 = vrot.slane %v4475_v61, %v7481_v10  ;;  %v4490_v11 = vrot.slane %v5993_v40, %v7481_v10  ;;  %v3414_v60 = vrot.slane %v3400_v28, %v7481_v10 }
 0x33f   : > { %v4422_v43 = vrot.slane %v4415_v32, %v7696_v12  ;;  %v4491_v48 = vcombine.low %v3505_v53, %v3512_v54  ;;  %v5994_v27 = vcombine.high %v3505_v53, %v3512_v54  ;;  %v3415_v6 = vcombine.low %v7527_v41, %v3407_v30 }
 0x340   : > { %v4507_v57 = vcombine.low %v4482_v39, %v4490_v11  ;;  %v3416_v19 = vcombine.high %v7527_v41, %v3407_v30  ;;  %v3431_v13 = vcombine.low %v7537_v46, %v3414_v60  ;;  %v3432_v63 = vcombine.high %v7537_v46, %v3414_v60  ;;  %v3278_v41 = vpop.permute.xlu1 %3277 }
 0x341   : > { %v4423_v29 = vcombine.low %v4414_v50, %v4422_v43  ;;  %v4424_v3 = vcombine.high %v4414_v50, %v4422_v43  ;;  %v4498_v40 = vrot.slane %v4491_v48, %v7481_v10  ;;  %v4506_v61 = vrot.slane %v5994_v27, %v7481_v10 }
 0x342   : > { %v4514_v32 = vrot.slane %v4507_v57, %v7696_v12  ;;  %v3423_v53 = vrot.slane %v3415_v6, %v7696_v12  ;;  %v3430_v9 = vrot.slane %v3416_v19, %v7696_v12  ;;  %v3439_v28 = vrot.slane %v3431_v13, %v7696_v12 }
 0x343   : > { %v6098_v54 = vpack.c.bf16 %v4423_v29, %v4423_v29  ;;  %v6114_v30 = vpack.c.bf16 %v4424_v3, %v4424_v3  ;;  %v4515_v39 = vcombine.low %v4498_v40, %v4506_v61  ;;  %v3446_v46 = vrot.slane %v3432_v63, %v7696_v12 }
 0x344   : > { %v4425_v50 = vcombine.low %v3423_v53, %v3430_v9  ;;  %v5991_v11 = vcombine.high %v3423_v53, %v3430_v9  ;;  %v3605_v60 = vrot.slane %v3280_v23, %v7481_v10  ;;  %v3612_v43 = vrot.slane %v3598_v33, %v7481_v10 }
 0x345   : > { %5303 = vst.msk [vmem:[%s7887_s16] sm:$0xf] %vm3222_vm0, %v6098_v54  ;;  %5319 = vst.msk [vmem:[%s7887_s16 + $0x40] sm:$0xf] %vm3222_vm0, %v6114_v30  ;;  %v4522_v48 = vrot.slane %v4515_v39, %v7696_v12  ;;  %v4441_v27 = vcombine.low %v3439_v28, %v3446_v46  ;;  %v5992_v6 = vcombine.high %v3439_v28, %v3446_v46  ;;  %v3284_v46 = vpop.permute.xlu0 %3283 }
 0x346   : > { %v3532_v57 = vcombine.high %v3278_v41, %v8739_v52  ;;  %v4432_v19 = vrot.slane %v4425_v50, %v7481_v10  ;;  %v4440_v23 = vrot.slane %v5991_v11, %v7481_v10  ;;  %v3613_v33 = vcombine.low %v7551_v17, %v3605_v60 }
 0x347   : > { %v3614_v13 = vcombine.high %v7551_v17, %v3605_v60  ;;  %v4523_v63 = vcombine.low %v4514_v32, %v4522_v48  ;;  %v4524_v29 = vcombine.high %v4514_v32, %v4522_v48  ;;  %v4448_v3 = vrot.slane %v4441_v27, %v7481_v10 }
 0x348   : > { %v4456_v40 = vrot.slane %v5992_v6, %v7481_v10  ;;  %v4457_v61 = vcombine.low %v4432_v19, %v4440_v23  ;;  %v3621_v53 = vrot.slane %v3613_v33, %v7696_v12  ;;  %v3629_v28 = vcombine.low %v7571_v35, %v3612_v43 }
 0x349   : > { %v3628_v9 = vrot.slane %v3614_v13, %v7696_v12  ;;  %v6100_v54 = vpack.c.bf16 %v4523_v63, %v4523_v63  ;;  %v6116_v30 = vpack.c.bf16 %v4524_v29, %v4524_v29  ;;  %v3630_v17 = vcombine.high %v7571_v35, %v3612_v43 }
 0x34a   : > { %v4465_v39 = vcombine.low %v4448_v3, %v4456_v40  ;;  %v4464_v32 = vrot.slane %v4457_v61, %v7696_v12  ;;  %v3637_v50 = vrot.slane %v3629_v28, %v7696_v12  ;;  %v3539_v6 = vrot.slane %v3278_v41, %v7481_v10 }
 0x34b   : > { %v4575_v11 = vcombine.low %v3621_v53, %v3628_v9  ;;  %v5997_v60 = vcombine.high %v3621_v53, %v3628_v9  ;;  %5305 = vst.msk [vmem:[%s7887_s16 + $0x8] sm:$0xf] %vm3222_vm0, %v6100_v54  ;;  %5321 = vst.msk [vmem:[%s7887_s16 + $0x48] sm:$0xf] %vm3222_vm0, %v6116_v30  ;;  %v3644_v27 = vrot.slane %v3630_v17, %v7696_v12 }
 0x34c   : > { %v4472_v48 = vrot.slane %v4465_v39, %v7696_v12  ;;  %v3546_v19 = vrot.slane %v3532_v57, %v7481_v10  ;;  %v3730_v23 = vcombine.high %v3284_v46, %v8739_v52  ;;  %v3737_v33 = vrot.slane %v3284_v46, %v7481_v10 }
 0x34d   : > { %v4582_v35 = vrot.slane %v4575_v11, %v7481_v10  ;;  %v4590_v43 = vrot.slane %v5997_v60, %v7481_v10  ;;  %v4591_v29 = vcombine.low %v3637_v50, %v3644_v27  ;;  %v5998_v3 = vcombine.high %v3637_v50, %v3644_v27 }
 0x34e   : > { %v4473_v13 = vcombine.low %v4464_v32, %v4472_v48  ;;  %v4474_v63 = vcombine.high %v4464_v32, %v4472_v48  ;;  %v3547_v61 = vcombine.low %v7518_v44, %v3539_v6  ;;  %v3548_v41 = vcombine.high %v7518_v44, %v3539_v6 }
 0x34f   : > { %v4607_v40 = vcombine.low %v4582_v35, %v4590_v43  ;;  %v3563_v57 = vcombine.low %v7534_v7, %v3546_v19  ;;  %v4598_v28 = vrot.slane %v4591_v29, %v7481_v10  ;;  %v4606_v54 = vrot.slane %v5998_v3, %v7481_v10 }
 0x350   : > { %v6099_v53 = vpack.c.bf16 %v4473_v13, %v4473_v13  ;;  %v6115_v9 = vpack.c.bf16 %v4474_v63, %v4474_v63  ;;  %v3555_v39 = vrot.slane %v3547_v61, %v7696_v12  ;;  %v3562_v17 = vrot.slane %v3548_v41, %v7696_v12 }
 0x351   : > { %v4614_v30 = vrot.slane %v4607_v40, %v7696_v12  ;;  %v3564_v46 = vcombine.high %v7534_v7, %v3546_v19  ;;  %v4615_v44 = vcombine.low %v4598_v28, %v4606_v54  ;;  %v3571_v32 = vrot.slane %v3563_v57, %v7696_v12 }
 0x352   : > { %5304 = vst.msk [vmem:[%s7887_s16 + $0x4] sm:$0xf] %vm3222_vm0, %v6099_v53  ;;  %5320 = vst.msk [vmem:[%s7887_s16 + $0x44] sm:$0xf] %vm3222_vm0, %v6115_v9  ;;  %v3744_v50 = vrot.slane %v3730_v23, %v7481_v10  ;;  %v3745_v11 = vcombine.low %v7547_v16, %v3737_v33  ;;  %v4525_v48 = vcombine.low %v3555_v39, %v3562_v17  ;;  %v3282_v53 = vpop.permute.xlu1 %3281 }
 0x353   : > { %v3578_v60 = vrot.slane %v3564_v46, %v7696_v12  ;;  %v5995_v27 = vcombine.high %v3555_v39, %v3562_v17  ;;  %v3746_v6 = vcombine.high %v7547_v16, %v3737_v33  ;;  %v4622_v35 = vrot.slane %v4615_v44, %v7696_v12  ;;  %v3288_v17 = vpop.permute.xlu0 %3287 }
 0x354   : > { %v3753_v7 = vrot.slane %v3745_v11, %v7696_v12  ;;  %v3761_v19 = vcombine.low %v7559_v25, %v3744_v50  ;;  %v3762_v43 = vcombine.high %v7559_v25, %v3744_v50  ;;  %v4532_v13 = vrot.slane %v4525_v48, %v7481_v10 }
 0x355   : > { %v4540_v23 = vrot.slane %v5995_v27, %v7481_v10  ;;  %v4541_v63 = vcombine.low %v3571_v32, %v3578_v60  ;;  %v5996_v29 = vcombine.high %v3571_v32, %v3578_v60  ;;  %v4623_v3 = vcombine.low %v4614_v30, %v4622_v35 }
 0x356   : > { %v4624_v40 = vcombine.high %v4614_v30, %v4622_v35  ;;  %v3760_v61 = vrot.slane %v3746_v6, %v7696_v12  ;;  %v3769_v16 = vrot.slane %v3761_v19, %v7696_v12  ;;  %v3776_v25 = vrot.slane %v3762_v43, %v7696_v12 }
 0x357   : > { %v4548_v33 = vrot.slane %v4541_v63, %v7481_v10  ;;  %v4556_v41 = vrot.slane %v5996_v29, %v7481_v10  ;;  %v4557_v57 = vcombine.low %v4532_v13, %v4540_v23  ;;  %v6102_v9 = vpack.c.bf16 %v4623_v3, %v4623_v3 }
 0x358   : > { %v6118_v28 = vpack.c.bf16 %v4624_v40, %v4624_v40  ;;  %v4675_v54 = vcombine.low %v3753_v7, %v3760_v61  ;;  %v6001_v39 = vcombine.high %v3753_v7, %v3760_v61  ;;  %v4691_v44 = vcombine.low %v3769_v16, %v3776_v25 }
 0x359   : > { %v4564_v30 = vrot.slane %v4557_v57, %v7696_v12  ;;  %v4565_v46 = vcombine.low %v4548_v33, %v4556_v41  ;;  %v6002_v32 = vcombine.high %v3769_v16, %v3776_v25  ;;  %5307 = vst.msk [vmem:[%s7887_s16 + $0x10] sm:$0xf] %vm3222_vm0, %v6102_v9  ;;  %v3664_v60 = vcombine.high %v3282_v53, %v8739_v52 }
 0x35a   : > { %5323 = vst.msk [vmem:[%s7887_s16 + $0x50] sm:$0xf] %vm3222_vm0, %v6118_v28  ;;  %v4682_v50 = vrot.slane %v4675_v54, %v7481_v10  ;;  %v4690_v11 = vrot.slane %v6001_v39, %v7481_v10  ;;  %v3671_v48 = vrot.slane %v3282_v53, %v7481_v10  ;;  %v4698_v6 = vrot.slane %v4691_v44, %v7481_v10 }
 0x35b   : > { %v4572_v27 = vrot.slane %v4565_v46, %v7696_v12  ;;  %v4706_v35 = vrot.slane %v6002_v32, %v7481_v10  ;;  %v3862_v7 = vcombine.high %v3288_v17, %v8739_v52  ;;  %v3678_v43 = vrot.slane %v3664_v60, %v7481_v10  ;;  %v3286_v60 = vpop.permute.xlu1 %3285 }
 0x35c   : > { %v4707_v19 = vcombine.low %v4682_v50, %v4690_v11  ;;  %v3679_v13 = vcombine.low %v7575_v47, %v3671_v48  ;;  %v3680_v23 = vcombine.high %v7575_v47, %v3671_v48  ;;  %v3869_v40 = vrot.slane %v3288_v17, %v7481_v10 }
 0x35d   : > { %v4573_v63 = vcombine.low %v4564_v30, %v4572_v27  ;;  %v4574_v29 = vcombine.high %v4564_v30, %v4572_v27  ;;  %v4715_v3 = vcombine.low %v4698_v6, %v4706_v35  ;;  %v3695_v41 = vcombine.low %v7583_v22, %v3678_v43 }
 0x35e   : > { %v4714_v61 = vrot.slane %v4707_v19, %v7696_v12  ;;  %v3687_v16 = vrot.slane %v3679_v13, %v7696_v12  ;;  %v3694_v33 = vrot.slane %v3680_v23, %v7696_v12  ;;  %v3696_v47 = vcombine.high %v7583_v22, %v3678_v43  ;;  %v3292_v23 = vpop.permute.xlu0 %3291 }
 0x35f   : > { %v6101_v57 = vpack.c.bf16 %v4573_v63, %v4573_v63  ;;  %v6117_v25 = vpack.c.bf16 %v4574_v29, %v4574_v29  ;;  %v4722_v53 = vrot.slane %v4715_v3, %v7696_v12  ;;  %v3703_v9 = vrot.slane %v3695_v41, %v7696_v12 }
 0x360   : > { %v4625_v28 = vcombine.low %v3687_v16, %v3694_v33  ;;  %v5999_v54 = vcombine.high %v3687_v16, %v3694_v33  ;;  %v3876_v39 = vrot.slane %v3862_v7, %v7481_v10  ;;  %v3710_v46 = vrot.slane %v3696_v47, %v7696_v12 }
 0x361   : > { %5306 = vst.msk [vmem:[%s7887_s16 + $0xc] sm:$0xf] %vm3222_vm0, %v6101_v57  ;;  %5322 = vst.msk [vmem:[%s7887_s16 + $0x4c] sm:$0xf] %vm3222_vm0, %v6117_v25  ;;  %v4723_v17 = vcombine.low %v4714_v61, %v4722_v53  ;;  %v4724_v30 = vcombine.high %v4714_v61, %v4722_v53  ;;  %v3877_v44 = vcombine.low %v7596_v51, %v3869_v40 }
 0x362   : > { %v4632_v22 = vrot.slane %v4625_v28, %v7481_v10  ;;  %v4640_v32 = vrot.slane %v5999_v54, %v7481_v10  ;;  %v3878_v50 = vcombine.high %v7596_v51, %v3869_v40  ;;  %v3893_v11 = vcombine.low %v7606_v55, %v3876_v39 }
 0x363   : > { %v6104_v48 = vpack.c.bf16 %v4723_v17, %v4723_v17  ;;  %v6120_v27 = vpack.c.bf16 %v4724_v30, %v4724_v30  ;;  %v4641_v6 = vcombine.low %v3703_v9, %v3710_v46  ;;  %v6000_v35 = vcombine.high %v3703_v9, %v3710_v46 }
 0x364   : > { %v4657_v7 = vcombine.low %v4632_v22, %v4640_v32  ;;  %v3885_v19 = vrot.slane %v3877_v44, %v7696_v12  ;;  %v3892_v43 = vrot.slane %v3878_v50, %v7696_v12  ;;  %v3894_v13 = vcombine.high %v7606_v55, %v3876_v39 }
 0x365   : > { %5309 = vst.msk [vmem:[%s7887_s16 + $0x18] sm:$0xf] %vm3222_vm0, %v6104_v48  ;;  %5325 = vst.msk [vmem:[%s7887_s16 + $0x58] sm:$0xf] %vm3222_vm0, %v6120_v27  ;;  %v4648_v51 = vrot.slane %v4641_v6, %v7481_v10  ;;  %v4656_v63 = vrot.slane %v6000_v35, %v7481_v10  ;;  %v3901_v29 = vrot.slane %v3893_v11, %v7696_v12 }
 0x366   : > { %v3796_v3 = vcombine.high %v3286_v60, %v8739_v52  ;;  %v4664_v40 = vrot.slane %v4657_v7, %v7696_v12  ;;  %v3908_v61 = vrot.slane %v3894_v13, %v7696_v12  ;;  %v4775_v16 = vcombine.low %v3885_v19, %v3892_v43  ;;  %v3290_v7 = vpop.permute.xlu1 %3289 }
 0x367   : > { %v6005_v33 = vcombine.high %v3885_v19, %v3892_v43  ;;  %v4665_v55 = vcombine.low %v4648_v51, %v4656_v63  ;;  %v3803_v41 = vrot.slane %v3286_v60, %v7481_v10  ;;  %v3994_v25 = vcombine.high %v3292_v23, %v8739_v52 }
 0x368   : > { %v3810_v57 = vrot.slane %v3796_v3, %v7481_v10  ;;  %v4782_v53 = vrot.slane %v4775_v16, %v7481_v10  ;;  %v4791_v9 = vcombine.low %v3901_v29, %v3908_v61  ;;  %v6006_v28 = vcombine.high %v3901_v29, %v3908_v61 }
 0x369   : > { %v4790_v47 = vrot.slane %v6005_v33, %v7481_v10  ;;  %v4672_v54 = vrot.slane %v4665_v55, %v7696_v12  ;;  %v3811_v39 = vcombine.low %v7563_v26, %v3803_v41  ;;  %v3812_v17 = vcombine.high %v7563_v26, %v3803_v41 }
 0x36a   : > { %v3827_v30 = vcombine.low %v7580_v1, %v3810_v57  ;;  %v4798_v46 = vrot.slane %v4791_v9, %v7481_v10  ;;  %v4806_v44 = vrot.slane %v6006_v28, %v7481_v10  ;;  %v3828_v32 = vcombine.high %v7580_v1, %v3810_v57 }
 0x36b   : > { %v4807_v22 = vcombine.low %v4782_v53, %v4790_v47  ;;  %v4673_v50 = vcombine.low %v4664_v40, %v4672_v54  ;;  %v4674_v11 = vcombine.high %v4664_v40, %v4672_v54  ;;  %v3819_v60 = vrot.slane %v3811_v39, %v7696_v12  ;;  %v8743_v47 = vld [vmem:[#allocation30_spill] sm:$0xff]  ;;  %v8744_v54 = vld [vmem:[#allocation31_spill] sm:$0xff] }
 0x36c   : > { %v3826_v48 = vrot.slane %v3812_v17, %v7696_v12  ;;  %v4815_v26 = vcombine.low %v4798_v46, %v4806_v44  ;;  %v3835_v6 = vrot.slane %v3827_v30, %v7696_v12  ;;  %v3842_v35 = vrot.slane %v3828_v32, %v7696_v12  ;;  %v3296_v44 = vpop.permute.xlu0 %3295 }
 0x36d   : > { %v4814_v27 = vrot.slane %v4807_v22, %v7696_v12  ;;  %v6103_v19 = vpack.c.bf16 %v4673_v50, %v4673_v50  ;;  %v6119_v43 = vpack.c.bf16 %v4674_v11, %v4674_v11  ;;  %v4001_v3 = vrot.slane %v3292_v23, %v7481_v10 }
 0x36e   : > { %v4725_v13 = vcombine.low %v3819_v60, %v3826_v48  ;;  %v6003_v1 = vcombine.high %v3819_v60, %v3826_v48  ;;  %v4822_v51 = vrot.slane %v4815_v26, %v7696_v12  ;;  %v4741_v63 = vcombine.low %v3835_v6, %v3842_v35 }
 0x36f   : > { %v6004_v29 = vcombine.high %v3835_v6, %v3842_v35  ;;  %5308 = vst.msk [vmem:[%s7887_s16 + $0x14] sm:$0xf] %vm3222_vm0, %v6103_v19  ;;  %5324 = vst.msk [vmem:[%s7887_s16 + $0x54] sm:$0xf] %vm3222_vm0, %v6119_v43  ;;  %v4008_v16 = vrot.slane %v3994_v25, %v7481_v10  ;;  %v3928_v33 = vcombine.high %v3290_v7, %v8739_v52 }
 0x370   : > { %v4732_v40 = vrot.slane %v4725_v13, %v7481_v10  ;;  %v4740_v61 = vrot.slane %v6003_v1, %v7481_v10  ;;  %v4823_v55 = vcombine.low %v4814_v27, %v4822_v51  ;;  %v4824_v41 = vcombine.high %v4814_v27, %v4822_v51 }
 0x371   : > { %v4748_v57 = vrot.slane %v4741_v63, %v7481_v10  ;;  %v4756_v23 = vrot.slane %v6004_v29, %v7481_v10  ;;  %v4009_v9 = vcombine.low %v8743_v47, %v4001_v3  ;;  %v4010_v28 = vcombine.high %v8743_v47, %v4001_v3 }
 0x372   : > { %v4757_v53 = vcombine.low %v4732_v40, %v4740_v61  ;;  %v4025_v39 = vcombine.low %v8744_v54, %v4008_v16  ;;  %v6106_v17 = vpack.c.bf16 %v4823_v55, %v4823_v55  ;;  %v6122_v30 = vpack.c.bf16 %v4824_v41, %v4824_v41 }
 0x373   : > { %v4765_v25 = vcombine.low %v4748_v57, %v4756_v23  ;;  %v4026_v46 = vcombine.high %v8744_v54, %v4008_v16  ;;  %v4017_v32 = vrot.slane %v4009_v9, %v7696_v12  ;;  %v4024_v50 = vrot.slane %v4010_v28, %v7696_v12  ;;  %v3294_v54 = vpop.permute.xlu1 %3293 }
 0x374   : > { %v4764_v22 = vrot.slane %v4757_v53, %v7696_v12  ;;  %v4033_v11 = vrot.slane %v4025_v39, %v7696_v12  ;;  %5311 = vst.msk [vmem:[%s7887_s16 + $0x20] sm:$0xf] %vm3222_vm0, %v6106_v17  ;;  %5327 = vst.msk [vmem:[%s7887_s16 + $0x60] sm:$0xf] %vm3222_vm0, %v6122_v30  ;;  %v3935_v27 = vrot.slane %v3290_v7, %v7481_v10 }
 0x375   : > { %v4772_v60 = vrot.slane %v4765_v25, %v7696_v12  ;;  %v4040_v48 = vrot.slane %v4026_v46, %v7696_v12  ;;  %v3942_v26 = vrot.slane %v3928_v33, %v7481_v10  ;;  %v4875_v6 = vcombine.low %v4017_v32, %v4024_v50 }
 0x376   : > { %v6009_v35 = vcombine.high %v4017_v32, %v4024_v50  ;;  %v4126_v19 = vcombine.high %v3296_v44, %v8739_v52  ;;  %v4133_v43 = vrot.slane %v3296_v44, %v7481_v10  ;;  %v3943_v7 = vcombine.low %v7618_v49, %v3935_v27 }
 0x377   : > { %v4773_v13 = vcombine.low %v4764_v22, %v4772_v60  ;;  %v4774_v1 = vcombine.high %v4764_v22, %v4772_v60  ;;  %v4891_v51 = vcombine.low %v4033_v11, %v4040_v48  ;;  %v6010_v63 = vcombine.high %v4033_v11, %v4040_v48 }
 0x378   : > { %v4882_v29 = vrot.slane %v4875_v6, %v7481_v10  ;;  %v4890_v3 = vrot.slane %v6009_v35, %v7481_v10  ;;  %v3944_v40 = vcombine.high %v7618_v49, %v3935_v27  ;;  %v3951_v57 = vrot.slane %v3943_v7, %v7696_v12 }
 0x379   : > { %v6105_v61 = vpack.c.bf16 %v4773_v13, %v4773_v13  ;;  %v6121_v16 = vpack.c.bf16 %v4774_v1, %v4774_v1  ;;  %v4898_v33 = vrot.slane %v4891_v51, %v7481_v10  ;;  %v4906_v55 = vrot.slane %v6010_v63, %v7481_v10 }
 0x37a   : > { %v4907_v41 = vcombine.low %v4882_v29, %v4890_v3  ;;  %v3958_v23 = vrot.slane %v3944_v40, %v7696_v12  ;;  %v3959_v53 = vcombine.low %v7635_v8, %v3942_v26  ;;  %v3960_v49 = vcombine.high %v7635_v8, %v3942_v26 }
 0x37b   : > { %5310 = vst.msk [vmem:[%s7887_s16 + $0x1c] sm:$0xf] %vm3222_vm0, %v6105_v61  ;;  %5326 = vst.msk [vmem:[%s7887_s16 + $0x5c] sm:$0xf] %vm3222_vm0, %v6121_v16  ;;  %v4915_v47 = vcombine.low %v4898_v33, %v4906_v55  ;;  %v4140_v9 = vrot.slane %v4126_v19, %v7481_v10  ;;  %v4141_v28 = vcombine.low %v7651_v56, %v4133_v43 }
 0x37c   : > { %v4914_v39 = vrot.slane %v4907_v41, %v7696_v12  ;;  %v3967_v17 = vrot.slane %v3959_v53, %v7696_v12  ;;  %v4825_v30 = vcombine.low %v3951_v57, %v3958_v23  ;;  %v6007_v25 = vcombine.high %v3951_v57, %v3958_v23 }
 0x37d   : > { %v4922_v46 = vrot.slane %v4915_v47, %v7696_v12  ;;  %v3974_v44 = vrot.slane %v3960_v49, %v7696_v12  ;;  %v4142_v22 = vcombine.high %v7651_v56, %v4133_v43  ;;  %v4149_v32 = vrot.slane %v4141_v28, %v7696_v12  ;;  %v8745_v28 = vld [vmem:[#allocation32_spill] sm:$0xff] }
 0x37e   : > { %v4832_v8 = vrot.slane %v4825_v30, %v7481_v10  ;;  %v4840_v50 = vrot.slane %v6007_v25, %v7481_v10  ;;  %v4157_v11 = vcombine.low %v7669_v37, %v4140_v9  ;;  %v4158_v60 = vcombine.high %v7669_v37, %v4140_v9  ;;  %v3298_v37 = vpop.permute.xlu1 %3297 }
 0x37f   : > { %v4923_v48 = vcombine.low %v4914_v39, %v4922_v46  ;;  %v4924_v27 = vcombine.high %v4914_v39, %v4922_v46  ;;  %v4841_v26 = vcombine.low %v3967_v17, %v3974_v44  ;;  %v6008_v6 = vcombine.high %v3967_v17, %v3974_v44 }
 0x380   : > { %v4857_v35 = vcombine.low %v4832_v8, %v4840_v50  ;;  %v4156_v19 = vrot.slane %v4142_v22, %v7696_v12  ;;  %v4165_v56 = vrot.slane %v4157_v11, %v7696_v12  ;;  %v4172_v43 = vrot.slane %v4158_v60, %v7696_v12  ;;  %v8746_v11 = vld [vmem:[#allocation33_spill] sm:$0xff] }
 0x381   : > { %v6108_v13 = vpack.c.bf16 %v4923_v48, %v4923_v48  ;;  %v6124_v1 = vpack.c.bf16 %v4924_v27, %v4924_v27  ;;  %v4848_v51 = vrot.slane %v4841_v26, %v7481_v10  ;;  %v4856_v63 = vrot.slane %v6008_v6, %v7481_v10 }
 0x382   : > { %v4864_v29 = vrot.slane %v4857_v35, %v7696_v12  ;;  %v4975_v3 = vcombine.low %v4149_v32, %v4156_v19  ;;  %v6013_v7 = vcombine.high %v4149_v32, %v4156_v19  ;;  %v4991_v40 = vcombine.low %v4165_v56, %v4172_v43  ;;  %v8747_v35 = vld [vmem:[#allocation38_spill] sm:$0xff] }
 0x383   : > { %5313 = vst.msk [vmem:[%s7887_s16 + $0x28] sm:$0xf] %vm3222_vm0, %v6108_v13  ;;  %5329 = vst.msk [vmem:[%s7887_s16 + $0x68] sm:$0xf] %vm3222_vm0, %v6124_v1  ;;  %v4865_v61 = vcombine.low %v4848_v51, %v4856_v63  ;;  %v6014_v16 = vcombine.high %v4165_v56, %v4172_v43  ;;  %v4060_v33 = vcombine.high %v3294_v54, %v8739_v52 }
 0x384   : > { %v4067_v55 = vrot.slane %v3294_v54, %v7481_v10  ;;  %v4982_v41 = vrot.slane %v4975_v3, %v7481_v10  ;;  %v4990_v57 = vrot.slane %v6013_v7, %v7481_v10  ;;  %v4998_v23 = vrot.slane %v4991_v40, %v7481_v10 }
 0x385   : > { %v4192_v53 = vcombine.high %v3298_v37, %v8739_v52  ;;  %v4872_v47 = vrot.slane %v4865_v61, %v7696_v12  ;;  %v5006_v49 = vrot.slane %v6014_v16, %v7481_v10  ;;  %v4074_v9 = vrot.slane %v4060_v33, %v7481_v10  ;;  %v1195_v16 = vpop.permute.xlu0 %1194 }
 0x386   : > { %v4075_v39 = vcombine.low %v8745_v28, %v4067_v55  ;;  %v5007_v17 = vcombine.low %v4982_v41, %v4990_v57  ;;  %v4076_v30 = vcombine.high %v8745_v28, %v4067_v55  ;;  %v4199_v54 = vrot.slane %v3298_v37, %v7481_v10 }
 0x387   : > { %v4206_v25 = vrot.slane %v4192_v53, %v7481_v10  ;;  %v4873_v46 = vcombine.low %v4864_v29, %v4872_v47  ;;  %v4874_v44 = vcombine.high %v4864_v29, %v4872_v47  ;;  %v5015_v22 = vcombine.low %v4998_v23, %v5006_v49 }
 0x388   : > { %v4083_v32 = vrot.slane %v4075_v39, %v7696_v12  ;;  %v5014_v8 = vrot.slane %v5007_v17, %v7696_v12  ;;  %v4090_v50 = vrot.slane %v4076_v30, %v7696_v12  ;;  %v4091_v60 = vcombine.low %v8746_v11, %v4074_v9 }
 0x389   : > { %v4092_v48 = vcombine.high %v8746_v11, %v4074_v9  ;;  %v6107_v27 = vpack.c.bf16 %v4873_v46, %v4873_v46  ;;  %v6123_v26 = vpack.c.bf16 %v4874_v44, %v4874_v44  ;;  %v5022_v6 = vrot.slane %v5015_v22, %v7696_v12  ;;  %v1197_v9 = vpop.permute.xlu1 %1196 }
 0x38a   : > { %v4207_v19 = vcombine.low %v8747_v35, %v4199_v54  ;;  %v4099_v56 = vrot.slane %v4091_v60, %v7696_v12  ;;  %v4925_v13 = vcombine.low %v4083_v32, %v4090_v50  ;;  %v6011_v1 = vcombine.high %v4083_v32, %v4090_v50 }
 0x38b   : > { %v4106_v43 = vrot.slane %v4092_v48, %v7696_v12  ;;  %5312 = vst.msk [vmem:[%s7887_s16 + $0x24] sm:$0xf] %vm3222_vm0, %v6107_v27  ;;  %5328 = vst.msk [vmem:[%s7887_s16 + $0x64] sm:$0xf] %vm3222_vm0, %v6123_v26  ;;  %v5023_v51 = vcombine.low %v5014_v8, %v5022_v6  ;;  %v5024_v63 = vcombine.high %v5014_v8, %v5022_v6 }
 0x38c   : > { %v4208_v37 = vcombine.high %v8747_v35, %v4199_v54  ;;  %v4215_v29 = vrot.slane %v4207_v19, %v7696_v12  ;;  %v4932_v3 = vrot.slane %v4925_v13, %v7481_v10  ;;  %v4940_v7 = vrot.slane %v6011_v1, %v7481_v10 }
 0x38d   : > { %v4941_v40 = vcombine.low %v4099_v56, %v4106_v43  ;;  %v6012_v61 = vcombine.high %v4099_v56, %v4106_v43  ;;  %v6110_v33 = vpack.c.bf16 %v5023_v51, %v5023_v51  ;;  %v6126_v55 = vpack.c.bf16 %v5024_v63, %v5024_v63 }
 0x38e   : > { %v4222_v41 = vrot.slane %v4208_v37, %v7696_v12  ;;  %v4223_v57 = vcombine.low %v7689_v42, %v4206_v25  ;;  %v4957_v47 = vcombine.low %v4932_v3, %v4940_v7  ;;  %v4224_v49 = vcombine.high %v7689_v42, %v4206_v25  ;;  %v1191_v37 = vpop.permute.xlu0 %1190 }
 0x38f   : > { %v4948_v23 = vrot.slane %v4941_v40, %v7481_v10  ;;  %v4956_v53 = vrot.slane %v6012_v61, %v7481_v10  ;;  %5315 = vst.msk [vmem:[%s7887_s16 + $0x30] sm:$0xf] %vm3222_vm0, %v6110_v33  ;;  %5331 = vst.msk [vmem:[%s7887_s16 + $0x70] sm:$0xf] %vm3222_vm0, %v6126_v55  ;;  %v1385_v30 = vcombine.high %v1195_v16, %v8739_v52 }
 0x390   : > { %v4231_v28 = vrot.slane %v4223_v57, %v7696_v12  ;;  %v5025_v39 = vcombine.low %v4215_v29, %v4222_v41  ;;  %v6015_v17 = vcombine.high %v4215_v29, %v4222_v41  ;;  %v4964_v54 = vrot.slane %v4957_v47, %v7696_v12 }
 0x391   : > { %v4965_v46 = vcombine.low %v4948_v23, %v4956_v53  ;;  %v4238_v44 = vrot.slane %v4224_v49, %v7696_v12  ;;  %v1392_v22 = vrot.slane %v1195_v16, %v7481_v10  ;;  %v1399_v32 = vrot.slane %v1385_v30, %v7481_v10 }
 0x392   : > { %v5032_v42 = vrot.slane %v5025_v39, %v7481_v10  ;;  %v5040_v25 = vrot.slane %v6015_v17, %v7481_v10  ;;  %v1451_v8 = vcombine.high %v1197_v9, %v8739_v52  ;;  %v1458_v16 = vrot.slane %v1197_v9, %v7481_v10 }
 0x393   : > { %v4972_v50 = vrot.slane %v4965_v46, %v7696_v12  ;;  %v5041_v11 = vcombine.low %v4231_v28, %v4238_v44  ;;  %v6016_v60 = vcombine.high %v4231_v28, %v4238_v44  ;;  %v1400_v48 = vcombine.low %v7700_v5, %v1392_v22 }
 0x394   : > { %v5057_v27 = vcombine.low %v5032_v42, %v5040_v25  ;;  %v1401_v26 = vcombine.high %v7700_v5, %v1392_v22  ;;  %v1416_v6 = vcombine.low %v7705_v58, %v1399_v32  ;;  %v1417_v35 = vcombine.high %v7705_v58, %v1399_v32 }
 0x395   : > { %v4973_v19 = vcombine.low %v4964_v54, %v4972_v50  ;;  %v4974_v56 = vcombine.high %v4964_v54, %v4972_v50  ;;  %v5048_v43 = vrot.slane %v5041_v11, %v7481_v10  ;;  %v5056_v13 = vrot.slane %v6016_v60, %v7481_v10 }
 0x396   : > { %v5064_v1 = vrot.slane %v5057_v27, %v7696_v12  ;;  %v1408_v51 = vrot.slane %v1400_v48, %v7696_v12  ;;  %v1415_v63 = vrot.slane %v1401_v26, %v7696_v12  ;;  %v1424_v5 = vrot.slane %v1416_v6, %v7696_v12 }
 0x397   : > { %v6109_v29 = vpack.c.bf16 %v4973_v19, %v4973_v19  ;;  %v6125_v3 = vpack.c.bf16 %v4974_v56, %v4974_v56  ;;  %v5065_v58 = vcombine.low %v5048_v43, %v5056_v13  ;;  %v1431_v7 = vrot.slane %v1417_v35, %v7696_v12 }
 0x398   : > { %v2394_v40 = vcombine.low %v1408_v51, %v1415_v63  ;;  %v5929_v61 = vcombine.high %v1408_v51, %v1415_v63  ;;  %v1465_v33 = vrot.slane %v1451_v8, %v7481_v10  ;;  %v1253_v23 = vcombine.high %v1191_v37, %v8739_v52  ;;  %v1193_v8 = vpop.permute.xlu1 %1192 }
 0x399   : > { %5314 = vst.msk [vmem:[%s7887_s16 + $0x2c] sm:$0xf] %vm3222_vm0, %v6109_v29  ;;  %5330 = vst.msk [vmem:[%s7887_s16 + $0x6c] sm:$0xf] %vm3222_vm0, %v6125_v3  ;;  %v5072_v55 = vrot.slane %v5065_v58, %v7696_v12  ;;  %v2410_v41 = vcombine.low %v1424_v5, %v1431_v7  ;;  %v5930_v57 = vcombine.high %v1424_v5, %v1431_v7  ;;  %v8748_v3 = vld [vmem:[#allocation39_spill] sm:$0xff] }
 0x39a   : > { %v2401_v53 = vrot.slane %v2394_v40, %v7481_v10  ;;  %v2409_v47 = vrot.slane %v5929_v61, %v7481_v10  ;;  %v1466_v49 = vcombine.low %v7713_v18, %v1458_v16  ;;  %v1467_v9 = vcombine.high %v7713_v18, %v1458_v16 }
 0x39b   : > { %v5073_v28 = vcombine.low %v5064_v1, %v5072_v55  ;;  %v5074_v39 = vcombine.high %v5064_v1, %v5072_v55  ;;  %v2417_v17 = vrot.slane %v2410_v41, %v7481_v10  ;;  %v2425_v30 = vrot.slane %v5930_v57, %v7481_v10 }
 0x39c   : > { %v2426_v54 = vcombine.low %v2401_v53, %v2409_v47  ;;  %v1474_v46 = vrot.slane %v1466_v49, %v7696_v12  ;;  %v1481_v44 = vrot.slane %v1467_v9, %v7696_v12  ;;  %v1482_v22 = vcombine.low %v7721_v45, %v1465_v33  ;;  %v8749_v47 = vld [vmem:[#allocation40_spill] sm:$0xff] }
 0x39d   : > { %v6111_v42 = vpack.c.bf16 %v5073_v28, %v5073_v28  ;;  %v6127_v25 = vpack.c.bf16 %v5074_v39, %v5074_v39  ;;  %v2434_v32 = vcombine.low %v2417_v17, %v2425_v30  ;;  %v1483_v18 = vcombine.high %v7721_v45, %v1465_v33 }
 0x39e   : > { %v2433_v50 = vrot.slane %v2426_v54, %v7696_v12  ;;  %v1490_v11 = vrot.slane %v1482_v22, %v7696_v12  ;;  %v2444_v60 = vcombine.low %v1474_v46, %v1481_v44  ;;  %v5931_v48 = vcombine.high %v1474_v46, %v1481_v44  ;;  %v8750_v46 = vld [vmem:[#allocation41_spill] sm:$0xff] }
 0x39f   : > { %5316 = vst.msk [vmem:[%s7887_s16 + $0x34] sm:$0xf] %vm3222_vm0, %v6111_v42  ;;  %5332 = vst.msk [vmem:[%s7887_s16 + $0x74] sm:$0xf] %vm3222_vm0, %v6127_v25  ;;  %v2441_v27 = vrot.slane %v2434_v32, %v7696_v12  ;;  %v1497_v26 = vrot.slane %v1483_v18, %v7696_v12  ;;  %v1260_v6 = vrot.slane %v1191_v37, %v7481_v10 }
 0x3a0   : > { %v1267_v35 = vrot.slane %v1253_v23, %v7481_v10  ;;  %v2451_v45 = vrot.slane %v2444_v60, %v7481_v10  ;;  %v2459_v19 = vrot.slane %v5931_v48, %v7481_v10  ;;  %v1319_v56 = vcombine.high %v1193_v8, %v8739_v52 }
 0x3a1   : > { %v1326_v43 = vrot.slane %v1193_v8, %v7481_v10  ;;  %v2442_v13 = vcombine.low %v2433_v50, %v2441_v27  ;;  %v2443_v1 = vcombine.high %v2433_v50, %v2441_v27  ;;  %v2460_v51 = vcombine.low %v1490_v11, %v1497_v26 }
 0x3a2   : > { %v5932_v63 = vcombine.high %v1490_v11, %v1497_v26  ;;  %v2476_v5 = vcombine.low %v2451_v45, %v2459_v19  ;;  %v1268_v29 = vcombine.low %v7717_v15, %v1260_v6  ;;  %v1269_v37 = vcombine.high %v7717_v15, %v1260_v6 }
 0x3a3   : > { %v1284_v58 = vcombine.low %v8748_v3, %v1267_v35  ;;  %v6068_v7 = vpack.c.bf16 %v2442_v13, %v2442_v13  ;;  %v6084_v40 = vpack.c.bf16 %v2443_v1, %v2443_v1  ;;  %v2467_v61 = vrot.slane %v2460_v51, %v7481_v10  ;;  %v1205_v13 = vpop.permute.xlu1 %1204 }
 0x3a4   : > { %v2475_v16 = vrot.slane %v5932_v63, %v7481_v10  ;;  %v2483_v33 = vrot.slane %v2476_v5, %v7696_v12  ;;  %v1276_v55 = vrot.slane %v1268_v29, %v7696_v12  ;;  %v1283_v41 = vrot.slane %v1269_v37, %v7696_v12 }
 0x3a5   : > { %v1285_v57 = vcombine.high %v8748_v3, %v1267_v35  ;;  %3225 = vst.msk [vmem:[%s8181_s27 + $0x8] sm:$0xf] %vm3222_vm0, %v6068_v7  ;;  %3241 = vst.msk [vmem:[%s8181_s27 + $0x48] sm:$0xf] %vm3222_vm0, %v6084_v40  ;;  %v1292_v23 = vrot.slane %v1284_v58, %v7696_v12  ;;  %v1333_v53 = vrot.slane %v1319_v56, %v7481_v10  ;;  %v1203_v35 = vpop.permute.xlu0 %1202 }
 0x3a6   : > { %v2484_v15 = vcombine.low %v2467_v61, %v2475_v16  ;;  %v1334_v49 = vcombine.low %v8749_v47, %v1326_v43  ;;  %v2294_v28 = vcombine.low %v1276_v55, %v1283_v41  ;;  %v5925_v39 = vcombine.high %v1276_v55, %v1283_v41  ;;  %v8751_v41 = vld [vmem:[#allocation42_spill] sm:$0xff] }
 0x3a7   : > { %v1299_v9 = vrot.slane %v1285_v57, %v7696_v12  ;;  %v1335_v17 = vcombine.high %v8749_v47, %v1326_v43  ;;  %v1350_v44 = vcombine.low %v8750_v46, %v1333_v53  ;;  %v1351_v22 = vcombine.high %v8750_v46, %v1333_v53 }
 0x3a8   : > { %v2491_v30 = vrot.slane %v2484_v15, %v7696_v12  ;;  %v1342_v54 = vrot.slane %v1334_v49, %v7696_v12  ;;  %v2301_v42 = vrot.slane %v2294_v28, %v7481_v10  ;;  %v2309_v25 = vrot.slane %v5925_v39, %v7481_v10 }
 0x3a9   : > { %v2310_v32 = vcombine.low %v1292_v23, %v1299_v9  ;;  %v5926_v18 = vcombine.high %v1292_v23, %v1299_v9  ;;  %v1349_v11 = vrot.slane %v1335_v17, %v7696_v12  ;;  %v1358_v60 = vrot.slane %v1350_v44, %v7696_v12  ;;  %v8752_v17 = vld [vmem:[#allocation43_spill] sm:$0xff] }
 0x3aa   : > { %v2492_v8 = vcombine.low %v2483_v33, %v2491_v30  ;;  %v2493_v50 = vcombine.high %v2483_v33, %v2491_v30  ;;  %v2326_v26 = vcombine.low %v2301_v42, %v2309_v25  ;;  %v1365_v6 = vrot.slane %v1351_v22, %v7696_v12 }
 0x3ab   : > { %v2317_v48 = vrot.slane %v2310_v32, %v7481_v10  ;;  %v2325_v27 = vrot.slane %v5926_v18, %v7481_v10  ;;  %v2344_v56 = vcombine.low %v1342_v54, %v1349_v11  ;;  %v5927_v43 = vcombine.high %v1342_v54, %v1349_v11 }
 0x3ac   : > { %v6069_v45 = vpack.c.bf16 %v2492_v8, %v2492_v8  ;;  %v6085_v19 = vpack.c.bf16 %v2493_v50, %v2493_v50  ;;  %v2333_v1 = vrot.slane %v2326_v26, %v7696_v12  ;;  %v2360_v63 = vcombine.low %v1358_v60, %v1365_v6 }
 0x3ad   : > { %v2334_v51 = vcombine.low %v2317_v48, %v2325_v27  ;;  %v5928_v5 = vcombine.high %v1358_v60, %v1365_v6  ;;  %v2351_v29 = vrot.slane %v2344_v56, %v7481_v10  ;;  %v2359_v37 = vrot.slane %v5927_v43, %v7481_v10  ;;  %v8753_v60 = vld [vmem:[#allocation44_spill] sm:$0xff] }
 0x3ae   : > { %3226 = vst.msk [vmem:[%s8181_s27 + $0xc] sm:$0xf] %vm3222_vm0, %v6069_v45  ;;  %3242 = vst.msk [vmem:[%s8181_s27 + $0x4c] sm:$0xf] %vm3222_vm0, %v6085_v19  ;;  %v1649_v3 = vcombine.high %v1203_v35, %v8739_v52  ;;  %v1656_v58 = vrot.slane %v1203_v35, %v7481_v10  ;;  %v2367_v40 = vrot.slane %v2360_v63, %v7481_v10  ;;  %v1199_v45 = vpop.permute.xlu0 %1198 }
 0x3af   : > { %v2341_v7 = vrot.slane %v2334_v51, %v7696_v12  ;;  %v2375_v61 = vrot.slane %v5928_v5, %v7481_v10  ;;  %v1715_v16 = vcombine.high %v1205_v13, %v8739_v52  ;;  %v2376_v33 = vcombine.low %v2351_v29, %v2359_v37  ;;  %v1201_v29 = vpop.permute.xlu1 %1200 }
 0x3b0   : > { %v1663_v55 = vrot.slane %v1649_v3, %v7481_v10  ;;  %v1664_v57 = vcombine.low %v8751_v41, %v1656_v58  ;;  %v1665_v15 = vcombine.high %v8751_v41, %v1656_v58  ;;  %v1722_v49 = vrot.slane %v1205_v13, %v7481_v10 }
 0x3b1   : > { %v2342_v23 = vcombine.low %v2333_v1, %v2341_v7  ;;  %v2343_v53 = vcombine.high %v2333_v1, %v2341_v7  ;;  %v2384_v47 = vcombine.low %v2367_v40, %v2375_v61  ;;  %v2383_v9 = vrot.slane %v2376_v33, %v7696_v12 }
 0x3b2   : > { %v1672_v28 = vrot.slane %v1664_v57, %v7696_v12  ;;  %v1679_v39 = vrot.slane %v1665_v15, %v7696_v12  ;;  %v1680_v30 = vcombine.low %v8752_v17, %v1663_v55  ;;  %v1681_v22 = vcombine.high %v8752_v17, %v1663_v55 }
 0x3b3   : > { %v6066_v54 = vpack.c.bf16 %v2342_v23, %v2342_v23  ;;  %v6082_v46 = vpack.c.bf16 %v2343_v53, %v2343_v53  ;;  %v2391_v44 = vrot.slane %v2384_v47, %v7696_v12  ;;  %v1729_v18 = vrot.slane %v1715_v16, %v7481_v10 }
 0x3b4   : > { %v1688_v42 = vrot.slane %v1680_v30, %v7696_v12  ;;  %v2594_v25 = vcombine.low %v1672_v28, %v1679_v39  ;;  %v5937_v32 = vcombine.high %v1672_v28, %v1679_v39  ;;  %v1695_v11 = vrot.slane %v1681_v22, %v7696_v12 }
 0x3b5   : > { %3223 = vst.msk [vmem:[%s8181_s27] sm:$0xf] %vm3222_vm0, %v6066_v54  ;;  %3239 = vst.msk [vmem:[%s8181_s27 + $0x40] sm:$0xf] %vm3222_vm0, %v6082_v46  ;;  %v2392_v8 = vcombine.low %v2383_v9, %v2391_v44  ;;  %v2393_v50 = vcombine.high %v2383_v9, %v2391_v44  ;;  %v1730_v48 = vcombine.low %v8753_v60, %v1722_v49  ;;  %v8754_v9 = vld [vmem:[#allocation45_spill] sm:$0xff] }
 0x3b6   : > { %v2601_v27 = vrot.slane %v2594_v25, %v7481_v10  ;;  %v2609_v26 = vrot.slane %v5937_v32, %v7481_v10  ;;  %v1731_v6 = vcombine.high %v8753_v60, %v1722_v49  ;;  %v1746_v35 = vcombine.low %v7760_v0, %v1729_v18  ;;  %v1211_v60 = vpop.permute.xlu0 %1210 }
 0x3b7   : > { %v6067_v19 = vpack.c.bf16 %v2392_v8, %v2392_v8  ;;  %v6083_v56 = vpack.c.bf16 %v2393_v50, %v2393_v50  ;;  %v2610_v43 = vcombine.low %v1688_v42, %v1695_v11  ;;  %v5938_v13 = vcombine.high %v1688_v42, %v1695_v11 }
 0x3b8   : > { %v2626_v1 = vcombine.low %v2601_v27, %v2609_v26  ;;  %v1738_v51 = vrot.slane %v1730_v48, %v7696_v12  ;;  %v1745_v63 = vrot.slane %v1731_v6, %v7696_v12  ;;  %v1747_v5 = vcombine.high %v7760_v0, %v1729_v18 }
 0x3b9   : > { %3224 = vst.msk [vmem:[%s8181_s27 + $0x4] sm:$0xf] %vm3222_vm0, %v6067_v19  ;;  %3240 = vst.msk [vmem:[%s8181_s27 + $0x44] sm:$0xf] %vm3222_vm0, %v6083_v56  ;;  %v2617_v37 = vrot.slane %v2610_v43, %v7481_v10  ;;  %v2625_v3 = vrot.slane %v5938_v13, %v7481_v10  ;;  %v1754_v58 = vrot.slane %v1746_v35, %v7696_v12 }
 0x3ba   : > { %v1517_v7 = vcombine.high %v1199_v45, %v8739_v52  ;;  %v2633_v40 = vrot.slane %v2626_v1, %v7696_v12  ;;  %v1761_v61 = vrot.slane %v1747_v5, %v7696_v12  ;;  %v2644_v16 = vcombine.low %v1738_v51, %v1745_v63 }
 0x3bb   : > { %v5939_v33 = vcombine.high %v1738_v51, %v1745_v63  ;;  %v2634_v0 = vcombine.low %v2617_v37, %v2625_v3  ;;  %v1524_v55 = vrot.slane %v1199_v45, %v7481_v10  ;;  %v1583_v57 = vcombine.high %v1201_v29, %v8739_v52 }
 0x3bc   : > { %v1531_v41 = vrot.slane %v1517_v7, %v7481_v10  ;;  %v2651_v15 = vrot.slane %v2644_v16, %v7481_v10  ;;  %v2660_v53 = vcombine.low %v1754_v58, %v1761_v61  ;;  %v5940_v47 = vcombine.high %v1754_v58, %v1761_v61 }
 0x3bd   : > { %v2659_v23 = vrot.slane %v5939_v33, %v7481_v10  ;;  %v2641_v49 = vrot.slane %v2634_v0, %v7696_v12  ;;  %v1532_v28 = vcombine.low %v8754_v9, %v1524_v55  ;;  %v1533_v39 = vcombine.high %v8754_v9, %v1524_v55  ;;  %v1213_v0 = vpop.permute.xlu1 %1212 }
 0x3be   : > { %v1548_v17 = vcombine.low %v7763_v2, %v1531_v41  ;;  %v2667_v30 = vrot.slane %v2660_v53, %v7481_v10  ;;  %v2675_v54 = vrot.slane %v5940_v47, %v7481_v10  ;;  %v1549_v44 = vcombine.high %v7763_v2, %v1531_v41 }
 0x3bf   : > { %v2676_v46 = vcombine.low %v2651_v15, %v2659_v23  ;;  %v2642_v22 = vcombine.low %v2633_v40, %v2641_v49  ;;  %v2643_v42 = vcombine.high %v2633_v40, %v2641_v49  ;;  %v1540_v25 = vrot.slane %v1532_v28, %v7696_v12 }
 0x3c0   : > { %v1547_v32 = vrot.slane %v1533_v39, %v7696_v12  ;;  %v2684_v8 = vcombine.low %v2667_v30, %v2675_v54  ;;  %v1556_v50 = vrot.slane %v1548_v17, %v7696_v12  ;;  %v1563_v11 = vrot.slane %v1549_v44, %v7696_v12 }
 0x3c1   : > { %v2683_v18 = vrot.slane %v2676_v46, %v7696_v12  ;;  %v6072_v48 = vpack.c.bf16 %v2642_v22, %v2642_v22  ;;  %v6088_v27 = vpack.c.bf16 %v2643_v42, %v2643_v42  ;;  %v1590_v19 = vrot.slane %v1201_v29, %v7481_v10 }
 0x3c2   : > { %v2494_v26 = vcombine.low %v1540_v25, %v1547_v32  ;;  %v5933_v2 = vcombine.high %v1540_v25, %v1547_v32  ;;  %v2691_v6 = vrot.slane %v2684_v8, %v7696_v12  ;;  %v2510_v35 = vcombine.low %v1556_v50, %v1563_v11 }
 0x3c3   : > { %v5934_v45 = vcombine.high %v1556_v50, %v1563_v11  ;;  %3229 = vst.msk [vmem:[%s8181_s27 + $0x18] sm:$0xf] %vm3222_vm0, %v6072_v48  ;;  %3245 = vst.msk [vmem:[%s8181_s27 + $0x58] sm:$0xf] %vm3222_vm0, %v6088_v27  ;;  %v1597_v13 = vrot.slane %v1583_v57, %v7481_v10  ;;  %v1913_v1 = vcombine.high %v1211_v60, %v8739_v52 }
 0x3c4   : > { %v2501_v56 = vrot.slane %v2494_v26, %v7481_v10  ;;  %v2509_v43 = vrot.slane %v5933_v2, %v7481_v10  ;;  %v2692_v51 = vcombine.low %v2683_v18, %v2691_v6  ;;  %v2693_v63 = vcombine.high %v2683_v18, %v2691_v6 }
 0x3c5   : > { %v2517_v5 = vrot.slane %v2510_v35, %v7481_v10  ;;  %v2525_v29 = vrot.slane %v5934_v45, %v7481_v10  ;;  %v1598_v3 = vcombine.low %v7770_v31, %v1590_v19  ;;  %v1599_v58 = vcombine.high %v7770_v31, %v1590_v19 }
 0x3c6   : > { %v2526_v37 = vcombine.low %v2501_v56, %v2509_v43  ;;  %v1614_v7 = vcombine.low %v7773_v59, %v1597_v13  ;;  %v6073_v40 = vpack.c.bf16 %v2692_v51, %v2692_v51  ;;  %v6089_v61 = vpack.c.bf16 %v2693_v63, %v2693_v63 }
 0x3c7   : > { %v2534_v16 = vcombine.low %v2517_v5, %v2525_v29  ;;  %v1615_v33 = vcombine.high %v7773_v59, %v1597_v13  ;;  %v1606_v41 = vrot.slane %v1598_v3, %v7696_v12  ;;  %v1613_v57 = vrot.slane %v1599_v58, %v7696_v12 }
 0x3c8   : > { %v2533_v55 = vrot.slane %v2526_v37, %v7696_v12  ;;  %v1622_v15 = vrot.slane %v1614_v7, %v7696_v12  ;;  %3230 = vst.msk [vmem:[%s8181_s27 + $0x1c] sm:$0xf] %vm3222_vm0, %v6073_v40  ;;  %3246 = vst.msk [vmem:[%s8181_s27 + $0x5c] sm:$0xf] %vm3222_vm0, %v6089_v61  ;;  %v1920_v53 = vrot.slane %v1211_v60, %v7481_v10 }
 0x3c9   : > { %v2541_v31 = vrot.slane %v2534_v16, %v7696_v12  ;;  %v1629_v23 = vrot.slane %v1615_v33, %v7696_v12  ;;  %v1927_v59 = vrot.slane %v1913_v1, %v7481_v10  ;;  %v2544_v47 = vcombine.low %v1606_v41, %v1613_v57  ;;  %v1207_v16 = vpop.permute.xlu0 %1206 }
 0x3ca   : > { %v5935_v49 = vcombine.high %v1606_v41, %v1613_v57  ;;  %v1979_v9 = vcombine.high %v1213_v0, %v8739_v52  ;;  %v1986_v28 = vrot.slane %v1213_v0, %v7481_v10  ;;  %v1928_v22 = vcombine.low %v7777_v62, %v1920_v53  ;;  %v1209_v41 = vpop.permute.xlu1 %1208 }
 0x3cb   : > { %v2542_v39 = vcombine.low %v2533_v55, %v2541_v31  ;;  %v2543_v17 = vcombine.high %v2533_v55, %v2541_v31  ;;  %v2560_v30 = vcombine.low %v1622_v15, %v1629_v23  ;;  %v5936_v54 = vcombine.high %v1622_v15, %v1629_v23 }
 0x3cc   : > { %v2551_v46 = vrot.slane %v2544_v47, %v7481_v10  ;;  %v2559_v44 = vrot.slane %v5935_v49, %v7481_v10  ;;  %v1929_v42 = vcombine.high %v7777_v62, %v1920_v53  ;;  %v1936_v11 = vrot.slane %v1928_v22, %v7696_v12 }
 0x3cd   : > { %v6070_v25 = vpack.c.bf16 %v2542_v39, %v2542_v39  ;;  %v6086_v32 = vpack.c.bf16 %v2543_v17, %v2543_v17  ;;  %v2567_v18 = vrot.slane %v2560_v30, %v7481_v10  ;;  %v2575_v8 = vrot.slane %v5936_v54, %v7481_v10 }
 0x3ce   : > { %v2576_v50 = vcombine.low %v2551_v46, %v2559_v44  ;;  %v1943_v60 = vrot.slane %v1929_v42, %v7696_v12  ;;  %v1944_v48 = vcombine.low %v7781_v14, %v1927_v59  ;;  %v1945_v62 = vcombine.high %v7781_v14, %v1927_v59 }
 0x3cf   : > { %3227 = vst.msk [vmem:[%s8181_s27 + $0x10] sm:$0xf] %vm3222_vm0, %v6070_v25  ;;  %3243 = vst.msk [vmem:[%s8181_s27 + $0x50] sm:$0xf] %vm3222_vm0, %v6086_v32  ;;  %v2584_v27 = vcombine.low %v2567_v18, %v2575_v8  ;;  %v1993_v26 = vrot.slane %v1979_v9, %v7481_v10  ;;  %v1994_v2 = vcombine.low %v7785_v21, %v1986_v28 }
 0x3d0   : > { %v2583_v6 = vrot.slane %v2576_v50, %v7696_v12  ;;  %v1952_v35 = vrot.slane %v1944_v48, %v7696_v12  ;;  %v2794_v45 = vcombine.low %v1936_v11, %v1943_v60  ;;  %v5945_v19 = vcombine.high %v1936_v11, %v1943_v60 }
 0x3d1   : > { %v2591_v56 = vrot.slane %v2584_v27, %v7696_v12  ;;  %v1959_v43 = vrot.slane %v1945_v62, %v7696_v12  ;;  %v1995_v13 = vcombine.high %v7785_v21, %v1986_v28  ;;  %v2002_v1 = vrot.slane %v1994_v2, %v7696_v12 }
 0x3d2   : > { %v2801_v14 = vrot.slane %v2794_v45, %v7481_v10  ;;  %v2809_v51 = vrot.slane %v5945_v19, %v7481_v10  ;;  %v2010_v63 = vcombine.low %v7788_v36, %v1993_v26  ;;  %v2011_v5 = vcombine.high %v7788_v36, %v1993_v26 }
 0x3d3   : > { %v2592_v29 = vcombine.low %v2583_v6, %v2591_v56  ;;  %v2593_v37 = vcombine.high %v2583_v6, %v2591_v56  ;;  %v2810_v3 = vcombine.low %v1952_v35, %v1959_v43  ;;  %v5946_v58 = vcombine.high %v1952_v35, %v1959_v43 }
 0x3d4   : > { %v2826_v7 = vcombine.low %v2801_v14, %v2809_v51  ;;  %v2009_v40 = vrot.slane %v1995_v13, %v7696_v12  ;;  %v2018_v21 = vrot.slane %v2010_v63, %v7696_v12  ;;  %v2025_v61 = vrot.slane %v2011_v5, %v7696_v12 }
 0x3d5   : > { %v6071_v33 = vpack.c.bf16 %v2592_v29, %v2592_v29  ;;  %v6087_v0 = vpack.c.bf16 %v2593_v37, %v2593_v37  ;;  %v2817_v55 = vrot.slane %v2810_v3, %v7481_v10  ;;  %v2825_v36 = vrot.slane %v5946_v58, %v7481_v10  ;;  %v1219_v29 = vpop.permute.xlu0 %1218 }
 0x3d6   : > { %v2833_v57 = vrot.slane %v2826_v7, %v7696_v12  ;;  %v2844_v15 = vcombine.low %v2002_v1, %v2009_v40  ;;  %v5947_v31 = vcombine.high %v2002_v1, %v2009_v40  ;;  %v2860_v23 = vcombine.low %v2018_v21, %v2025_v61 }
 0x3d7   : > { %3228 = vst.msk [vmem:[%s8181_s27 + $0x14] sm:$0xf] %vm3222_vm0, %v6071_v33  ;;  %3244 = vst.msk [vmem:[%s8181_s27 + $0x54] sm:$0xf] %vm3222_vm0, %v6087_v0  ;;  %v2834_v53 = vcombine.low %v2817_v55, %v2825_v36  ;;  %v5948_v59 = vcombine.high %v2018_v21, %v2025_v61  ;;  %v1781_v47 = vcombine.high %v1207_v16, %v8739_v52 }
 0x3d8   : > { %v1788_v49 = vrot.slane %v1207_v16, %v7481_v10  ;;  %v2851_v9 = vrot.slane %v2844_v15, %v7481_v10  ;;  %v2859_v28 = vrot.slane %v5947_v31, %v7481_v10  ;;  %v2867_v39 = vrot.slane %v2860_v23, %v7481_v10  ;;  %v1221_v16 = vpop.permute.xlu1 %1220 }
 0x3d9   : > { %v1847_v17 = vcombine.high %v1209_v41, %v8739_v52  ;;  %v2841_v30 = vrot.slane %v2834_v53, %v7696_v12  ;;  %v2875_v54 = vrot.slane %v5948_v59, %v7481_v10  ;;  %v1795_v46 = vrot.slane %v1781_v47, %v7481_v10 }
 0x3da   : > { %v1796_v44 = vcombine.low %v7792_v24, %v1788_v49  ;;  %v2876_v22 = vcombine.low %v2851_v9, %v2859_v28  ;;  %v1797_v42 = vcombine.high %v7792_v24, %v1788_v49  ;;  %v1854_v25 = vrot.slane %v1209_v41, %v7481_v10  ;;  %v8755_v28 = vld [vmem:[#allocation46_spill] sm:$0xff] }
 0x3db   : > { %v1861_v32 = vrot.slane %v1847_v17, %v7481_v10  ;;  %v2842_v18 = vcombine.low %v2833_v57, %v2841_v30  ;;  %v2843_v8 = vcombine.high %v2833_v57, %v2841_v30  ;;  %v2884_v50 = vcombine.low %v2867_v39, %v2875_v54  ;;  %v8756_v54 = vld [vmem:[#allocation47_spill] sm:$0xff] }
 0x3dc   : > { %v1804_v11 = vrot.slane %v1796_v44, %v7696_v12  ;;  %v2883_v60 = vrot.slane %v2876_v22, %v7696_v12  ;;  %v1811_v48 = vrot.slane %v1797_v42, %v7696_v12  ;;  %v1812_v27 = vcombine.low %v7795_v4, %v1795_v46 }
 0x3dd   : > { %v1813_v62 = vcombine.high %v7795_v4, %v1795_v46  ;;  %v6076_v24 = vpack.c.bf16 %v2842_v18, %v2842_v18  ;;  %v6092_v26 = vpack.c.bf16 %v2843_v8, %v2843_v8  ;;  %v2891_v2 = vrot.slane %v2884_v50, %v7696_v12 }
 0x3de   : > { %v1862_v6 = vcombine.low %v7801_v38, %v1854_v25  ;;  %v1820_v35 = vrot.slane %v1812_v27, %v7696_v12  ;;  %v2694_v19 = vcombine.low %v1804_v11, %v1811_v48  ;;  %v5941_v56 = vcombine.high %v1804_v11, %v1811_v48 }
 0x3df   : > { %v1827_v45 = vrot.slane %v1813_v62, %v7696_v12  ;;  %3233 = vst.msk [vmem:[%s8181_s27 + $0x28] sm:$0xf] %vm3222_vm0, %v6076_v24  ;;  %3249 = vst.msk [vmem:[%s8181_s27 + $0x68] sm:$0xf] %vm3222_vm0, %v6092_v26  ;;  %v2892_v43 = vcombine.low %v2883_v60, %v2891_v2  ;;  %v2893_v13 = vcombine.high %v2883_v60, %v2891_v2  ;;  %v1215_v60 = vpop.permute.xlu0 %1214 }
 0x3e0   : > { %v1863_v4 = vcombine.high %v7801_v38, %v1854_v25  ;;  %v1870_v1 = vrot.slane %v1862_v6, %v7696_v12  ;;  %v2701_v14 = vrot.slane %v2694_v19, %v7481_v10  ;;  %v2709_v51 = vrot.slane %v5941_v56, %v7481_v10 }
 0x3e1   : > { %v2710_v63 = vcombine.low %v1820_v35, %v1827_v45  ;;  %v5942_v5 = vcombine.high %v1820_v35, %v1827_v45  ;;  %v6077_v37 = vpack.c.bf16 %v2892_v43, %v2892_v43  ;;  %v6093_v3 = vpack.c.bf16 %v2893_v13, %v2893_v13 }
 0x3e2   : > { %v1877_v58 = vrot.slane %v1863_v4, %v7696_v12  ;;  %v1878_v7 = vcombine.low %v7808_v34, %v1861_v32  ;;  %v2726_v21 = vcombine.low %v2701_v14, %v2709_v51  ;;  %v1879_v61 = vcombine.high %v7808_v34, %v1861_v32 }
 0x3e3   : > { %v2717_v40 = vrot.slane %v2710_v63, %v7481_v10  ;;  %v2725_v38 = vrot.slane %v5942_v5, %v7481_v10  ;;  %3234 = vst.msk [vmem:[%s8181_s27 + $0x2c] sm:$0xf] %vm3222_vm0, %v6077_v37  ;;  %3250 = vst.msk [vmem:[%s8181_s27 + $0x6c] sm:$0xf] %vm3222_vm0, %v6093_v3  ;;  %v2177_v36 = vcombine.high %v1219_v29, %v8739_v52 }
 0x3e4   : > { %v1886_v33 = vrot.slane %v1878_v7, %v7696_v12  ;;  %v2744_v0 = vcombine.low %v1870_v1, %v1877_v58  ;;  %v5943_v55 = vcombine.high %v1870_v1, %v1877_v58  ;;  %v2733_v41 = vrot.slane %v2726_v21, %v7696_v12  ;;  %v8757_v1 = vld [vmem:[#allocation48_spill] sm:$0xff] }
 0x3e5   : > { %v2734_v57 = vcombine.low %v2717_v40, %v2725_v38  ;;  %v1893_v15 = vrot.slane %v1879_v61, %v7696_v12  ;;  %v2184_v31 = vrot.slane %v1219_v29, %v7481_v10  ;;  %v2191_v53 = vrot.slane %v2177_v36, %v7481_v10 }
 0x3e6   : > { %v2751_v34 = vrot.slane %v2744_v0, %v7481_v10  ;;  %v2759_v23 = vrot.slane %v5943_v55, %v7481_v10  ;;  %v2243_v59 = vcombine.high %v1221_v16, %v8739_v52  ;;  %v2250_v6 = vrot.slane %v1221_v16, %v7481_v10 }
 0x3e7   : > { %v2741_v47 = vrot.slane %v2734_v57, %v7696_v12  ;;  %v2760_v49 = vcombine.low %v1886_v33, %v1893_v15  ;;  %v5944_v9 = vcombine.high %v1886_v33, %v1893_v15  ;;  %v2192_v39 = vcombine.low %v8755_v28, %v2184_v31  ;;  %v3300_v33 = vpop.permute.xlu0 %3299 }
 0x3e8   : > { %v2776_v17 = vcombine.low %v2751_v34, %v2759_v23  ;;  %v2193_v30 = vcombine.high %v8755_v28, %v2184_v31  ;;  %v2208_v46 = vcombine.low %v8756_v54, %v2191_v53  ;;  %v2209_v44 = vcombine.high %v8756_v54, %v2191_v53 }
 0x3e9   : > { %v2742_v22 = vcombine.low %v2733_v41, %v2741_v47  ;;  %v2743_v42 = vcombine.high %v2733_v41, %v2741_v47  ;;  %v2767_v25 = vrot.slane %v2760_v49, %v7481_v10  ;;  %v2775_v32 = vrot.slane %v5944_v9, %v7481_v10 }
 0x3ea   : > { %v2783_v18 = vrot.slane %v2776_v17, %v7696_v12  ;;  %v2200_v8 = vrot.slane %v2192_v39, %v7696_v12  ;;  %v2207_v50 = vrot.slane %v2193_v30, %v7696_v12  ;;  %v2216_v11 = vrot.slane %v2208_v46, %v7696_v12  ;;  %v8758_v17 = vld [vmem:[#allocation49_spill] sm:$0xff]  ;;  %v8759_v46 = vld [vmem:[#allocation50_spill] sm:$0xff] }
 0x3eb   : > { %v6074_v48 = vpack.c.bf16 %v2742_v22, %v2742_v22  ;;  %v6090_v27 = vpack.c.bf16 %v2743_v42, %v2743_v42  ;;  %v2784_v62 = vcombine.low %v2767_v25, %v2775_v32  ;;  %v2223_v24 = vrot.slane %v2209_v44, %v7696_v12 }
 0x3ec   : > { %v2994_v26 = vcombine.low %v2200_v8, %v2207_v50  ;;  %v5953_v2 = vcombine.high %v2200_v8, %v2207_v50  ;;  %v2257_v35 = vrot.slane %v2243_v59, %v7481_v10  ;;  %v2045_v43 = vcombine.high %v1215_v60, %v8739_v52 }
 0x3ed   : > { %3231 = vst.msk [vmem:[%s8181_s27 + $0x20] sm:$0xf] %vm3222_vm0, %v6074_v48  ;;  %3247 = vst.msk [vmem:[%s8181_s27 + $0x60] sm:$0xf] %vm3222_vm0, %v6090_v27  ;;  %v2791_v45 = vrot.slane %v2784_v62, %v7696_v12  ;;  %v3010_v19 = vcombine.low %v2216_v11, %v2223_v24  ;;  %v5954_v56 = vcombine.high %v2216_v11, %v2223_v24  ;;  %v8760_v62 = vld [vmem:[#allocation34_spill] sm:$0xff] }
 0x3ee   : > { %v3001_v13 = vrot.slane %v2994_v26, %v7481_v10  ;;  %v3009_v4 = vrot.slane %v5953_v2, %v7481_v10  ;;  %v2258_v14 = vcombine.low %v8757_v1, %v2250_v6  ;;  %v2259_v51 = vcombine.high %v8757_v1, %v2250_v6 }
 0x3ef   : > { %v2792_v63 = vcombine.low %v2783_v18, %v2791_v45  ;;  %v2793_v5 = vcombine.high %v2783_v18, %v2791_v45  ;;  %v3017_v29 = vrot.slane %v3010_v19, %v7481_v10  ;;  %v3025_v37 = vrot.slane %v5954_v56, %v7481_v10  ;;  %v1217_v45 = vpop.permute.xlu1 %1216 }
 0x3f0   : > { %v3026_v3 = vcombine.low %v3001_v13, %v3009_v4  ;;  %v2266_v58 = vrot.slane %v2258_v14, %v7696_v12  ;;  %v2273_v7 = vrot.slane %v2259_v51, %v7696_v12  ;;  %v2274_v40 = vcombine.low %v7827_v20, %v2257_v35 }
 0x3f1   : > { %v6075_v38 = vpack.c.bf16 %v2792_v63, %v2792_v63  ;;  %v6091_v21 = vpack.c.bf16 %v2793_v5, %v2793_v5  ;;  %v3034_v61 = vcombine.low %v3017_v29, %v3025_v37  ;;  %v2275_v16 = vcombine.high %v7827_v20, %v2257_v35 }
 0x3f2   : > { %v3033_v0 = vrot.slane %v3026_v3, %v7696_v12  ;;  %v2282_v55 = vrot.slane %v2274_v40, %v7696_v12  ;;  %v3044_v36 = vcombine.low %v2266_v58, %v2273_v7  ;;  %v5955_v41 = vcombine.high %v2266_v58, %v2273_v7 }
 0x3f3   : > { %3232 = vst.msk [vmem:[%s8181_s27 + $0x24] sm:$0xf] %vm3222_vm0, %v6075_v38  ;;  %3248 = vst.msk [vmem:[%s8181_s27 + $0x64] sm:$0xf] %vm3222_vm0, %v6091_v21  ;;  %v3041_v57 = vrot.slane %v3034_v61, %v7696_v12  ;;  %v2289_v15 = vrot.slane %v2275_v16, %v7696_v12  ;;  %v2052_v31 = vrot.slane %v1215_v60, %v7481_v10 }
 0x3f4   : > { %v2059_v34 = vrot.slane %v2045_v43, %v7481_v10  ;;  %v3051_v20 = vrot.slane %v3044_v36, %v7481_v10  ;;  %v3059_v23 = vrot.slane %v5955_v41, %v7481_v10  ;;  %v4258_v53 = vcombine.high %v3300_v33, %v8739_v52  ;;  %v8761_v43 = vld [vmem:[#allocation35_spill] sm:$0xff] }
 0x3f5   : > { %v4265_v59 = vrot.slane %v3300_v33, %v7481_v10  ;;  %v3042_v47 = vcombine.low %v3033_v0, %v3041_v57  ;;  %v3043_v49 = vcombine.high %v3033_v0, %v3041_v57  ;;  %v3060_v9 = vcombine.low %v2282_v55, %v2289_v15  ;;  %v3302_v57 = vpop.permute.xlu1 %3301 }
 0x3f6   : > { %v5956_v28 = vcombine.high %v2282_v55, %v2289_v15  ;;  %v3076_v39 = vcombine.low %v3051_v20, %v3059_v23  ;;  %v2060_v30 = vcombine.low %v8758_v17, %v2052_v31  ;;  %v2061_v54 = vcombine.high %v8758_v17, %v2052_v31  ;;  %v8763_v23 = vld [vmem:[#allocation52_spill] sm:$0xff] }
 0x3f7   : > { %v2076_v44 = vcombine.low %v8759_v46, %v2059_v34  ;;  %v6080_v22 = vpack.c.bf16 %v3042_v47, %v3042_v47  ;;  %v6096_v42 = vpack.c.bf16 %v3043_v49, %v3043_v49  ;;  %v3067_v25 = vrot.slane %v3060_v9, %v7481_v10 }
 0x3f8   : > { %v3075_v32 = vrot.slane %v5956_v28, %v7481_v10  ;;  %v3083_v18 = vrot.slane %v3076_v39, %v7696_v12  ;;  %v2068_v8 = vrot.slane %v2060_v30, %v7696_v12  ;;  %v2075_v50 = vrot.slane %v2061_v54, %v7696_v12 }
 0x3f9   : > { %v2077_v11 = vcombine.high %v8759_v46, %v2059_v34  ;;  %3237 = vst.msk [vmem:[%s8181_s27 + $0x38] sm:$0xf] %vm3222_vm0, %v6080_v22  ;;  %3253 = vst.msk [vmem:[%s8181_s27 + $0x78] sm:$0xf] %vm3222_vm0, %v6096_v42  ;;  %v2084_v48 = vrot.slane %v2076_v44, %v7696_v12  ;;  %v4272_v27 = vrot.slane %v4258_v53, %v7481_v10  ;;  %v8762_v34 = vld [vmem:[#allocation51_spill] sm:$0xff] }
 0x3fa   : > { %v3084_v60 = vcombine.low %v3067_v25, %v3075_v32  ;;  %v4273_v24 = vcombine.low %v8760_v62, %v4265_v59  ;;  %v2894_v2 = vcombine.low %v2068_v8, %v2075_v50  ;;  %v5949_v6 = vcombine.high %v2068_v8, %v2075_v50 }
 0x3fb   : > { %v2091_v26 = vrot.slane %v2077_v11, %v7696_v12  ;;  %v4274_v35 = vcombine.high %v8760_v62, %v4265_v59  ;;  %v4289_v13 = vcombine.low %v8761_v43, %v4272_v27  ;;  %v4290_v4 = vcombine.high %v8761_v43, %v4272_v27  ;;  %v8764_v62 = vld [vmem:[#allocation36_spill] sm:$0xff] }
 0x3fc   : > { %v3091_v19 = vrot.slane %v3084_v60, %v7696_v12  ;;  %v4281_v56 = vrot.slane %v4273_v24, %v7696_v12  ;;  %v2901_v1 = vrot.slane %v2894_v2, %v7481_v10  ;;  %v2909_v14 = vrot.slane %v5949_v6, %v7481_v10 }
 0x3fd   : > { %v2910_v51 = vcombine.low %v2084_v48, %v2091_v26  ;;  %v5950_v63 = vcombine.high %v2084_v48, %v2091_v26  ;;  %v4288_v37 = vrot.slane %v4274_v35, %v7696_v12  ;;  %v4297_v3 = vrot.slane %v4289_v13, %v7696_v12 }
 0x3fe   : > { %v3092_v5 = vcombine.low %v3083_v18, %v3091_v19  ;;  %v3093_v29 = vcombine.high %v3083_v18, %v3091_v19  ;;  %v2926_v40 = vcombine.low %v2901_v1, %v2909_v14  ;;  %v4304_v38 = vrot.slane %v4290_v4, %v7696_v12  ;;  %v8765_v14 = vld [vmem:[#allocation37_spill] sm:$0xff] }
 0x3ff   : > { %v2917_v58 = vrot.slane %v2910_v51, %v7481_v10  ;;  %v2925_v7 = vrot.slane %v5950_v63, %v7481_v10  ;;  %v5075_v16 = vcombine.low %v4281_v56, %v4288_v37  ;;  %v6017_v33 = vcombine.high %v4281_v56, %v4288_v37 }
 0x400   : > { %v6081_v21 = vpack.c.bf16 %v3092_v5, %v3092_v5  ;;  %v6097_v61 = vpack.c.bf16 %v3093_v29, %v3093_v29  ;;  %v2933_v0 = vrot.slane %v2926_v40, %v7696_v12  ;;  %v5091_v36 = vcombine.low %v4297_v3, %v4304_v38 }
 0x401   : > { %v2934_v55 = vcombine.low %v2917_v58, %v2925_v7  ;;  %v6018_v41 = vcombine.high %v4297_v3, %v4304_v38  ;;  %v5082_v15 = vrot.slane %v5075_v16, %v7481_v10  ;;  %v5090_v31 = vrot.slane %v6017_v33, %v7481_v10 }
 0x402   : > { %3238 = vst.msk [vmem:[%s8181_s27 + $0x3c] sm:$0xf] %vm3222_vm0, %v6081_v21  ;;  %3254 = vst.msk [vmem:[%s8181_s27 + $0x7c] sm:$0xf] %vm3222_vm0, %v6097_v61  ;;  %v2103_v20 = vrot.slane %v8762_v34, %v7481_v10  ;;  %v2110_v53 = vrot.slane %v8763_v23, %v7481_v10  ;;  %v5098_v47 = vrot.slane %v5091_v36, %v7481_v10 }
 0x403   : > { %v2941_v59 = vrot.slane %v2934_v55, %v7696_v12  ;;  %v5106_v49 = vrot.slane %v6018_v41, %v7481_v10  ;;  %v2111_v9 = vcombine.high %v1217_v45, %v8739_v52  ;;  %v5107_v28 = vcombine.low %v5082_v15, %v5090_v31 }
 0x404   : > { %v2118_v39 = vrot.slane %v1217_v45, %v7481_v10  ;;  %v4324_v17 = vcombine.high %v3302_v57, %v8739_v52  ;;  %v4331_v30 = vrot.slane %v3302_v57, %v7481_v10 }
 0x405   : > { %v2942_v54 = vcombine.low %v2933_v0, %v2941_v59  ;;  %v2943_v46 = vcombine.high %v2933_v0, %v2941_v59  ;;  %v5115_v44 = vcombine.low %v5098_v47, %v5106_v49  ;;  %v2125_v22 = vrot.slane %v2111_v9, %v7481_v10 }
 0x406   : > { %v5114_v42 = vrot.slane %v5107_v28, %v7696_v12  ;;  %v2126_v25 = vcombine.low %v2103_v20, %v2118_v39  ;;  %v2127_v32 = vcombine.high %v2103_v20, %v2118_v39  ;;  %v4338_v18 = vrot.slane %v4324_v17, %v7481_v10 }
 0x407   : > { %v6078_v8 = vpack.c.bf16 %v2942_v54, %v2942_v54  ;;  %v6094_v50 = vpack.c.bf16 %v2943_v46, %v2943_v46  ;;  %v5122_v11 = vrot.slane %v5115_v44, %v7696_v12  ;;  %v2142_v52 = vcombine.low %v2110_v53, %v2125_v22  ;;  %v5374_v46 = vld [vmem:[%s8181_s27 + $0x10] sm:$0xff] (%p8767_p3)   ;;  %v5378_v44 = vld [vmem:[%s8181_s27 + $0x18] sm:$0xff] (%p8767_p3)  }
 0x408   : > { %v2134_v60 = vrot.slane %v2126_v25, %v7696_v12  ;;  %v2141_v48 = vrot.slane %v2127_v32, %v7696_v12  ;;  %v2143_v27 = vcombine.high %v2110_v53, %v2125_v22  ;;  %v4339_v24 = vcombine.low %v8764_v62, %v4331_v30  ;;  %v5382_v22 = vld [vmem:[%s8181_s27 + $0x20] sm:$0xff] (%p8767_p3)   ;;  %5375 = vst [vmem:[%s5350_s12 + $0x10] sm:$0xff] (%p8767_p3), %v5374_v46  }
 0x409   : > { %3235 = vst.msk [vmem:[%s8181_s27 + $0x30] sm:$0xf] %vm3222_vm0, %v6078_v8  ;;  %3251 = vst.msk [vmem:[%s8181_s27 + $0x70] sm:$0xf] %vm3222_vm0, %v6094_v50  ;;  %v5123_v26 = vcombine.low %v5114_v42, %v5122_v11  ;;  %v5124_v2 = vcombine.high %v5114_v42, %v5122_v11  ;;  %v2150_v6 = vrot.slane %v2142_v52, %v7696_v12  ;;  %v5386_v42 = vld [vmem:[%s8181_s27 + $0x28] sm:$0xff] (%p8767_p3)   ;;  %v5394_v32 = vld [vmem:[%s8181_s27 + $0x38] sm:$0xff] (%p8767_p3)  }
 0x40a   : > { %v4340_v35 = vcombine.high %v8764_v62, %v4331_v30  ;;  %v2157_v45 = vrot.slane %v2143_v27, %v7696_v12  ;;  %v2944_v19 = vcombine.low %v2134_v60, %v2141_v48  ;;  %v5951_v56 = vcombine.high %v2134_v60, %v2141_v48  ;;  %v5402_v8 = vld [vmem:[%s8181_s27 + $0x48] sm:$0xff] (%p8767_p3)   ;;  %v5406_v50 = vld [vmem:[%s8181_s27 + $0x50] sm:$0xff] (%p8767_p3)   ;;  %v5410_v11 = vld [vmem:[%s8181_s27 + $0x58] sm:$0xff] (%p8767_p3)   ;;  %5379 = vst [vmem:[%s5350_s12 + $0x18] sm:$0xff] (%p8767_p3), %v5378_v44  }
 0x40b   : > { %v4347_v43 = vrot.slane %v4339_v24, %v7696_v12  ;;  %v6112_v13 = vpack.c.bf16 %v5123_v26, %v5123_v26  ;;  %v6128_v4 = vpack.c.bf16 %v5124_v2, %v5124_v2  ;;  %v4355_v51 = vcombine.low %v8765_v14, %v4338_v18  ;;  %5383 = vst [vmem:[%s5350_s12 + $0x20] sm:$0xff] (%p8767_p3), %v5382_v22   ;;  %v5414_v52 = vld [vmem:[%s8181_s27 + $0x60] sm:$0xff] (%p8767_p3)   ;;  %v5418_v60 = vld [vmem:[%s8181_s27 + $0x68] sm:$0xff] (%p8767_p3)   ;;  %v5426_v27 = vld [vmem:[%s8181_s27 + $0x78] sm:$0xff] (%p8767_p3)  }
 0x40c   : > { %v4354_v1 = vrot.slane %v4340_v35, %v7696_v12  ;;  %v2951_v63 = vrot.slane %v2944_v19, %v7481_v10  ;;  %v2959_v5 = vrot.slane %v5951_v56, %v7481_v10  ;;  %v2960_v29 = vcombine.low %v2150_v6, %v2157_v45  ;;  %5387 = vst [vmem:[%s5350_s12 + $0x28] sm:$0xff] (%p8767_p3), %v5386_v42  }
 0x40d   : > { %v5952_v37 = vcombine.high %v2150_v6, %v2157_v45  ;;  %5317 = vst.msk [vmem:[%s7887_s16 + $0x38] sm:$0xf] %vm3222_vm0, %v6112_v13  ;;  %5333 = vst.msk [vmem:[%s7887_s16 + $0x78] sm:$0xf] %vm3222_vm0, %v6128_v4  ;;  %v4356_v3 = vcombine.high %v8765_v14, %v4338_v18  ;;  %v4363_v58 = vrot.slane %v4355_v51, %v7696_v12  ;;  %v5398_v18 = vld [vmem:[%s8181_s27 + $0x40] sm:$0xff] (%p8767_p3)  }
 0x40e   : > { %v5125_v7 = vcombine.low %v4347_v43, %v4354_v1  ;;  %v6019_v40 = vcombine.high %v4347_v43, %v4354_v1  ;;  %v2967_v38 = vrot.slane %v2960_v29, %v7481_v10  ;;  %v2976_v61 = vcombine.low %v2951_v63, %v2959_v5  ;;  %5395 = vst [vmem:[%s5350_s12 + $0x38] sm:$0xff] (%p8767_p3), %v5394_v32  }
 0x40f   : > { %v2975_v21 = vrot.slane %v5952_v37, %v7481_v10  ;;  %v4370_v16 = vrot.slane %v4356_v3, %v7696_v12  ;;  %5399 = vst [vmem:[%s5350_s12 + $0x80] sm:$0xff] (%p8767_p3), %v5398_v18   ;;  %5403 = vst [vmem:[%s5350_s12 + $0x88] sm:$0xff] (%p8767_p3), %v5402_v8  }
 0x410   : > { %v5132_v33 = vrot.slane %v5125_v7, %v7481_v10  ;;  %v5140_v0 = vrot.slane %v6019_v40, %v7481_v10  ;;  %v2983_v57 = vrot.slane %v2976_v61, %v7696_v12  ;;  %5407 = vst [vmem:[%s5350_s12 + $0x90] sm:$0xff] (%p8767_p3), %v5406_v50   ;;  %5411 = vst [vmem:[%s5350_s12 + $0x98] sm:$0xff] (%p8767_p3), %v5410_v11  }
 0x411   : > { %v2984_v55 = vcombine.low %v2967_v38, %v2975_v21  ;;  %v5141_v36 = vcombine.low %v4363_v58, %v4370_v16  ;;  %v6020_v41 = vcombine.high %v4363_v58, %v4370_v16  ;;  %5415 = vst [vmem:[%s5350_s12 + $0xa0] sm:$0xff] (%p8767_p3), %v5414_v52   ;;  %5419 = vst [vmem:[%s5350_s12 + $0xa8] sm:$0xff] (%p8767_p3), %v5418_v60  }
 0x412   : > { %v5157_v20 = vcombine.low %v5132_v33, %v5140_v0  ;;  %5427 = vst [vmem:[%s5350_s12 + $0xb8] sm:$0xff] (%p8767_p3), %v5426_v27  }
 0x413   : > { %v2991_v15 = vrot.slane %v2984_v55, %v7696_v12  ;;  %v5148_v31 = vrot.slane %v5141_v36, %v7481_v10  ;;  %v5156_v34 = vrot.slane %v6020_v41, %v7481_v10  ;;  %v5366_v10 = vld [vmem:[%s8181_s27] sm:$0xff] (%p8767_p3)  }
 0x414   : > { %v5164_v9 = vrot.slane %v5157_v20, %v7696_v12  ;;  %5367 = vst [vmem:[%s5350_s12] sm:$0xff] (%p8767_p3), %v5366_v10  }
 0x415   : > { %v2992_v23 = vcombine.low %v2983_v57, %v2991_v15  ;;  %v2993_v53 = vcombine.high %v2983_v57, %v2991_v15  ;;  %v5165_v59 = vcombine.low %v5148_v31, %v5156_v34 }
 0x417   : > { %v6079_v47 = vpack.c.bf16 %v2992_v23, %v2992_v23  ;;  %v6095_v49 = vpack.c.bf16 %v2993_v53, %v2993_v53  ;;  %v5172_v28 = vrot.slane %v5165_v59, %v7696_v12  ;;  %5345 = sbr.rel (!%p8767_p3) target bundleno = 1059 (0x423), region = 76  ;;  %v5370_v12 = vld [vmem:[%s8181_s27 + $0x8] sm:$0xff] (%p8767_p3)  }
 0x418   : > { %5371 = vst [vmem:[%s5350_s12 + $0x8] sm:$0xff] (%p8767_p3), %v5370_v12  }
 0x419   : > { %3236 = vst.msk [vmem:[%s8181_s27 + $0x34] sm:$0xf] %vm3222_vm0, %v6079_v47  ;;  %3252 = vst.msk [vmem:[%s8181_s27 + $0x74] sm:$0xf] %vm3222_vm0, %v6095_v49  ;;  %v5173_v39 = vcombine.low %v5164_v9, %v5172_v28  ;;  %v5174_v17 = vcombine.high %v5164_v9, %v5172_v28 }
 0x41b   : > { %v6113_v30 = vpack.c.bf16 %v5173_v39, %v5173_v39  ;;  %v6129_v54 = vpack.c.bf16 %v5174_v17, %v5174_v17 }
 0x41d   : > { %5318 = vst.msk [vmem:[%s7887_s16 + $0x3c] sm:$0xf] %vm3222_vm0, %v6113_v30  ;;  %5334 = vst.msk [vmem:[%s7887_s16 + $0x7c] sm:$0xf] %vm3222_vm0, %v6129_v54 }
 0x420   : > { %v5390_v25 = vld [vmem:[%s8181_s27 + $0x30] sm:$0xff]  }
 0x421   : > { %5391 = vst [vmem:[%s5350_s12 + $0x30] sm:$0xff] %v5390_v25   ;;  %v5422_v48 = vld [vmem:[%s8181_s27 + $0x70] sm:$0xff]  }
 0x422   : > { %5423 = vst [vmem:[%s5350_s12 + $0xb0] sm:$0xff] %v5422_v48  }
 0x423 PF: > { %s8771_s29 = sld [smem:[#allocation29_spill]] }
 0x429   : > { %p8772_p7 = scmp.ne.s32.totalorder %s8771_s29, 0 }
 0x42a   : > { %s8773_s11 = sld [smem:[#allocation21_spill]] (%p8772_p7)  ;;  %s8774_s8 = sld [smem:[#allocation22_spill]] (%p8772_p7)  ;;  %v5537_v62 = vld [vmem:[%s7887_s16] sm:$0xff] (%p8772_p7)   ;;  %v5541_v24 = vld [vmem:[%s7887_s16 + $0x8] sm:$0xff] (%p8772_p7)   ;;  %v5545_v26 = vld [vmem:[%s7887_s16 + $0x10] sm:$0xff] (%p8772_p7)  }
 0x42b   : > { %5516 = sbr.rel (!%p8772_p7) target bundleno = 1084 (0x43c), region = 117  ;;  %v5549_v2 = vld [vmem:[%s7887_s16 + $0x18] sm:$0xff] (%p8772_p7)   ;;  %v5553_v6 = vld [vmem:[%s7887_s16 + $0x20] sm:$0xff] (%p8772_p7)   ;;  %v5557_v35 = vld [vmem:[%s7887_s16 + $0x28] sm:$0xff] (%p8772_p7)   ;;  %s8775_s28 = sld [smem:[#allocation58_spill]] (%p8772_p7) }
 0x42c   : > { %v5561_v45 = vld [vmem:[%s7887_s16 + $0x30] sm:$0xff] (%p8772_p7)   ;;  %v5565_v19 = vld [vmem:[%s7887_s16 + $0x38] sm:$0xff] (%p8772_p7)   ;;  %v5569_v56 = vld [vmem:[%s7887_s16 + $0x40] sm:$0xff] (%p8772_p7)  }
 0x42d   : > { %v5573_v43 = vld [vmem:[%s7887_s16 + $0x48] sm:$0xff] (%p8772_p7)   ;;  %v5577_v13 = vld [vmem:[%s7887_s16 + $0x50] sm:$0xff] (%p8772_p7)   ;;  %v5581_v4 = vld [vmem:[%s7887_s16 + $0x58] sm:$0xff] (%p8772_p7)  }
 0x42e   : > { %v5585_v1 = vld [vmem:[%s7887_s16 + $0x60] sm:$0xff] (%p8772_p7)   ;;  %v5589_v14 = vld [vmem:[%s7887_s16 + $0x68] sm:$0xff] (%p8772_p7)   ;;  %v5593_v51 = vld [vmem:[%s7887_s16 + $0x70] sm:$0xff] (%p8772_p7)  }
 0x42f   : > { %v5597_v63 = vld [vmem:[%s7887_s16 + $0x78] sm:$0xff] (%p8772_p7)  }
 0x430   : > { %s6058_s21 = sshll.u32 (%p8772_p7), %s8773_s11, 4  ;;  %s6059_s4 = sshll.u32 (%p8772_p7), %s8774_s8, 6 }
 0x431   : > { %s5519_s24 = sadd.s32 (%p8772_p7), %s6059_s4, %s6058_s21 }
 0x432   : > { %s6060_s7 = sshll.u32 %s5519_s24, 2 }
 0x433   : > { %s5521_s25 = scalar_lea.vmem %s8775_s28, %s6060_s7 }
 0x434   : > { %5538 = vst [vmem:[%s5521_s25] sm:$0xff] %v5537_v62   ;;  %5542 = vst [vmem:[%s5521_s25 + $0x8] sm:$0xff] %v5541_v24  }
 0x435   : > { %5546 = vst [vmem:[%s5521_s25 + $0x10] sm:$0xff] %v5545_v26   ;;  %5550 = vst [vmem:[%s5521_s25 + $0x18] sm:$0xff] %v5549_v2  }
 0x436   : > { %5554 = vst [vmem:[%s5521_s25 + $0x20] sm:$0xff] %v5553_v6   ;;  %5558 = vst [vmem:[%s5521_s25 + $0x28] sm:$0xff] %v5557_v35  }
 0x437   : > { %5562 = vst [vmem:[%s5521_s25 + $0x30] sm:$0xff] %v5561_v45   ;;  %5566 = vst [vmem:[%s5521_s25 + $0x38] sm:$0xff] %v5565_v19  }
 0x438   : > { %5570 = vst [vmem:[%s5521_s25 + $0x80] sm:$0xff] %v5569_v56   ;;  %5574 = vst [vmem:[%s5521_s25 + $0x88] sm:$0xff] %v5573_v43  }
 0x439   : > { %5578 = vst [vmem:[%s5521_s25 + $0x90] sm:$0xff] %v5577_v13   ;;  %5582 = vst [vmem:[%s5521_s25 + $0x98] sm:$0xff] %v5581_v4  }
 0x43a   : > { %5586 = vst [vmem:[%s5521_s25 + $0xa0] sm:$0xff] %v5585_v1   ;;  %5590 = vst [vmem:[%s5521_s25 + $0xa8] sm:$0xff] %v5589_v14  }
 0x43b   : > { %5594 = vst [vmem:[%s5521_s25 + $0xb0] sm:$0xff] %v5593_v51   ;;  %5598 = vst [vmem:[%s5521_s25 + $0xb8] sm:$0xff] %v5597_v63  }
 0x43c PF: > { %s29_s15 = sadd.s32 1, %s6697_s15   ;;  %s8776_s27 = sld [smem:[#allocation19_spill]] }
 0x43d   : > { %p26_p13 = scmp.ge.s32.totalorder %s29_s15, 6   ;;  %s8777_s28 = sld [smem:[#allocation20_spill]] }
 0x43e   : > { %s8778_s29 = sld [smem:[#allocation28_spill]]  ;;  %s8779_s20 = sld [smem:[#allocation27_spill]] }
 0x43f   : > { %s8780_s30 = smov %s6673_s9  ;;  %s8781_s9 = smov %s6677_s10 }
 0x440   : > { %s8782_s10 = smov %s7001_s18  ;;  %s8783_s11 = smov %s6689_s13 }
 0x441   : > { %s8784_s12 = smov %s6693_s14  ;;  %s8786_s14 = smov %s8792_s22 }
 0x442   :  { %28 = sbr.rel (!%p26_p13) target bundleno = 19 (0x13), region = 227 }
 0x444   : > { %s8785_s13 = smov %s8779_s20 }
 0x449   :  { %5704 = vsyncpa [#allocation3], 1 }
 0x44a   :  { %5706 = vsyncpa [#allocation3 + $0x1], 1 }
 0x44b   :  { %5707 = vsyncpa [#allocation5], 1 }
 0x44c   :  { %5709 = vsyncpa [#allocation5 + $0x1], 1 }
 0x44d   :  { %5710 = vsyncpa [#allocation8], 1 }
 0x44e   :  { %5712 = vsyncpa [#allocation8 + $0x1], 1 }
 0x44f   :  { %5713 = vsyncpa [#allocation11], 1 }

</bundles_post_ra>
